<compile_context>
chip_gen: v5e
topology: v5e:2x2
jax: 0.10.0
libtpu: 0.0.40
codegen_flags: <defaults>
</compile_context>

<pallas_src>
import functools

import jax
import jax.numpy as jnp
from jax import lax
from jax.experimental import pallas as pl
from jax.experimental.pallas import tpu as pltpu

# Per-step working set is ~1.2 MiB, so a modest budget is plenty and stays safe
# on v7x (64 MiB physical VMEM); raise per-generation only if N is tiled up.
_VMEM_LIMIT = 32 * 1024 * 1024


def _fused_attention_kernel(x_ref, w_qkv_ref, w_proj_ref, b_ref, o_ref, *,
                            num_heads, scale):
    N, D = x_ref.shape
    H = num_heads
    hd = D // H

    # ---- QKV projection: one 128-deep (N,D)@(D,3D) MXU matmul ---------------
    x_bf = x_ref[...].astype(jnp.bfloat16)
    w_qkv_bf = w_qkv_ref[...].astype(jnp.bfloat16)           # (3D, D), untransposed
    # qkv[n, o] = sum_c x[n, c] * W_qkv[o, c]   (nn.Linear, bias=False)
    qkv = lax.dot_general(x_bf, w_qkv_bf, (((1,), (1,)), ((), ())),
                          preferred_element_type=jnp.float32)  # (N, 3D) f32

    # ---- Per-head attention (all H heads in this grid step, static unroll) --
    heads = []
    for h in range(H):
        q_h = qkv[:, h * hd:(h + 1) * hd].astype(jnp.bfloat16)              # (N, hd)
        k_h = qkv[:, D + h * hd:D + (h + 1) * hd].astype(jnp.bfloat16)      # (N, hd)
        v_h = qkv[:, 2 * D + h * hd:2 * D + (h + 1) * hd].astype(jnp.bfloat16)

        # s = (q @ k^T) * scale, accumulated in f32
        s = lax.dot_general(q_h, k_h, (((1,), (1,)), ((), ())),
                            preferred_element_type=jnp.float32) * scale     # (N, N)
        # numerically-stable softmax, f32 stats; reciprocal on the EUP slot
        s = s - jnp.max(s, axis=-1, keepdims=True)
        p = jnp.exp(s)
        p = p * pl.reciprocal(jnp.sum(p, axis=-1, keepdims=True), approx=True)
        # o_h = p @ v with f32 accumulation
        heads.append(jnp.dot(p.astype(jnp.bfloat16), v_h,
                             preferred_element_type=jnp.float32))           # (N, hd)

    # ---- Head merge + output projection --------------------------------------
    # merged[n, h*hd + d] = o_h[n, d]   (== x.transpose(1,2).reshape(B, N, D))
    merged = jnp.concatenate(heads, axis=-1).astype(jnp.bfloat16)           # (N, D)
    w_proj_bf = w_proj_ref[...].astype(jnp.bfloat16)                        # (D, D)
    out = lax.dot_general(merged, w_proj_bf, (((1,), (1,)), ((), ())),
                          preferred_element_type=jnp.float32)               # (N, D)
    o_ref[...] = (out + b_ref[...].astype(jnp.float32)).astype(o_ref.dtype)


def attention_forward(x, w_qkv, w_proj, b_proj, num_heads):
    """Pallas implementation of Attention.forward (inference, dropout = identity)."""
    B, N, D = x.shape
    assert D % num_heads == 0
    assert w_qkv.shape == (3 * D, D) and w_proj.shape == (D, D)
    scale = (D // num_heads) ** -0.5

    kernel = functools.partial(_fused_attention_kernel,
                               num_heads=num_heads, scale=scale)

    # TODO(synk): for long sequences (H*N*N*4 bytes approaching VMEM), tile N and
    # switch the attention core to an online-softmax (flash) reduction axis.
    return pl.pallas_call(
        kernel,
        out_shape=jax.ShapeDtypeStruct((B, N, D), x.dtype),
        grid=(B,),
        in_specs=[
            pl.BlockSpec((None, N, D), lambda b: (b, 0, 0)),   # x[b]
            pl.BlockSpec((3 * D, D), lambda b: (0, 0)),        # W_qkv (untransposed)
            pl.BlockSpec((D, D), lambda b: (0, 0)),            # W_proj (untransposed)
            pl.BlockSpec((1, D), lambda b: (0, 0)),            # b_proj
        ],
        out_specs=pl.BlockSpec((None, N, D), lambda b: (b, 0, 0)),
        compiler_params=pltpu.CompilerParams(
            # B on a parallel axis: with B>=2 both v7x TensorCores get work.
            dimension_semantics=("parallel",),
            vmem_limit_bytes=_VMEM_LIMIT,
        ),
    )(x, w_qkv, w_proj, b_proj.reshape(1, D))


if __name__ == "__main__":
    key = jax.random.PRNGKey(0)
    k1, k2, k3, k4 = jax.random.split(key, 4)

    B, N, D, H = 2, 128, 128, 8
    hd = D // H

    x = jax.random.normal(k1, (B, N, D), dtype=jnp.float32)
    w_qkv = jax.random.normal(k2, (3 * D, D), dtype=jnp.float32) * (D ** -0.5)
    w_proj = jax.random.normal(k3, (D, D), dtype=jnp.float32) * (D ** -0.5)
    b_proj = jax.random.normal(k4, (D,), dtype=jnp.float32) * 0.1

    out = attention_forward(x, w_qkv, w_proj, b_proj, num_heads=H)
    out = jax.block_until_ready(out)

    # Pure-JAX f32 reference mirroring the PyTorch module exactly.
    scale = hd ** -0.5
    qkv_ref = (x @ w_qkv.T).reshape(B, N, 3, H, hd).transpose(2, 0, 3, 1, 4)
    q_r, k_r, v_r = qkv_ref[0], qkv_ref[1], qkv_ref[2]
    attn = jax.nn.softmax(jnp.einsum("bhqd,bhkd->bhqk", q_r, k_r) * scale, axis=-1)
    o_r = jnp.einsum("bhqk,bhkd->bhqd", attn, v_r)
    ref = o_r.transpose(0, 2, 1, 3).reshape(B, N, D) @ w_proj.T + b_proj

    assert out.shape == (B, N, D), out.shape
    err = float(jnp.max(jnp.abs(out - ref)))
    # Tolerance accounts for bf16 MXU operands (f32 accumulation / f32 softmax).
    assert jnp.allclose(out, ref, rtol=2e-2, atol=3e-2), err

    print("KERNEL_OK")
</pallas_src>

<mosaic_0001>
module attributes {stable_mosaic.version = 11 : i64} {
  func.func @_fused_attention_kernel(%arg0: i32, %arg1: memref<1x128x128xf32, #tpu.memory_space<vmem>>, %arg2: memref<384x128xf32, #tpu.memory_space<vmem>>, %arg3: memref<128x128xf32, #tpu.memory_space<vmem>>, %arg4: memref<1x128xf32, #tpu.memory_space<vmem>>, %arg5: memref<1x128x128xf32, #tpu.memory_space<vmem>>) attributes {dimension_semantics = [#tpu.dimension_semantics<parallel>], iteration_bounds = array<i64: 2>, scalar_prefetch = 0 : i64, scratch_operands = 0 : i64, tpu.core_type = #tpu.core_type<tc>, window_params = [{transform_indices = @transform_0, window_bounds = array<i64: 1, 128, 128>}, {pipeline_mode = #tpu.pipeline_mode<synchronous>, transform_indices = @transform_1, window_bounds = array<i64: 384, 128>}, {pipeline_mode = #tpu.pipeline_mode<synchronous>, transform_indices = @transform_2, window_bounds = array<i64: 128, 128>}, {pipeline_mode = #tpu.pipeline_mode<synchronous>, transform_indices = @transform_3, window_bounds = array<i64: 1, 128>}, {transform_indices = @transform_4, window_bounds = array<i64: 1, 128, 128>}]} {
    %c0 = arith.constant 0 : index
    %c0_0 = arith.constant 0 : index
    %c0_1 = arith.constant 0 : index
    %0 = vector.load %arg1[%c0, %c0_0, %c0_1] : memref<1x128x128xf32, #tpu.memory_space<vmem>>, vector<1x128x128xf32>
    %1 = vector.shape_cast %0 : vector<1x128x128xf32> to vector<128x128xf32>
    %2 = arith.truncf %1 : vector<128x128xf32> to vector<128x128xbf16>
    %c0_2 = arith.constant 0 : index
    %c0_3 = arith.constant 0 : index
    %3 = vector.load %arg2[%c0_2, %c0_3] : memref<384x128xf32, #tpu.memory_space<vmem>>, vector<384x128xf32>
    %4 = arith.truncf %3 : vector<384x128xf32> to vector<384x128xbf16>
    %cst = arith.constant dense<0.000000e+00> : vector<128x384xf32>
    %5 = tpu.matmul %2, %4, %cst {dimension_numbers = #tpu.dot_dimension_numbers<[1], [1], [0], [0], [0, 0, 1, 0], [], []>} : vector<128x128xbf16>, vector<384x128xbf16>, vector<128x384xf32> -> vector<128x384xf32>
    %6 = vector.extract_strided_slice %5 {offsets = [0, 0], sizes = [128, 16], strides = [1, 1]} : vector<128x384xf32> to vector<128x16xf32>
    %7 = arith.truncf %6 : vector<128x16xf32> to vector<128x16xbf16>
    %8 = vector.extract_strided_slice %5 {offsets = [0, 128], sizes = [128, 16], strides = [1, 1]} : vector<128x384xf32> to vector<128x16xf32>
    %9 = arith.truncf %8 : vector<128x16xf32> to vector<128x16xbf16>
    %10 = vector.extract_strided_slice %5 {offsets = [0, 256], sizes = [128, 16], strides = [1, 1]} : vector<128x384xf32> to vector<128x16xf32>
    %11 = arith.truncf %10 : vector<128x16xf32> to vector<128x16xbf16>
    %cst_4 = arith.constant dense<0.000000e+00> : vector<128x128xf32>
    %12 = tpu.matmul %7, %9, %cst_4 {dimension_numbers = #tpu.dot_dimension_numbers<[1], [1], [0], [0], [0, 0, 1, 0], [], []>} : vector<128x16xbf16>, vector<128x16xbf16>, vector<128x128xf32> -> vector<128x128xf32>
    %cst_5 = arith.constant 2.500000e-01 : f32
    %13 = vector.broadcast %cst_5 : f32 to vector<128x128xf32>
    %14 = arith.mulf %12, %13 : vector<128x128xf32>
    %cst_6 = arith.constant dense<0xFF800000> : vector<128xf32>
    %15 = vector.multi_reduction <maximumf>, %14, %cst_6 [1] : vector<128x128xf32> to vector<128xf32>
    %16 = vector.shape_cast %15 : vector<128xf32> to vector<128x1xf32>
    %17 = vector.broadcast %16 : vector<128x1xf32> to vector<128x128xf32>
    %18 = arith.subf %14, %17 : vector<128x128xf32>
    %19 = math.exp %18 : vector<128x128xf32>
    %cst_7 = arith.constant dense<0.000000e+00> : vector<128xf32>
    %20 = vector.multi_reduction <add>, %19, %cst_7 [1] : vector<128x128xf32> to vector<128xf32>
    %21 = vector.shape_cast %20 : vector<128xf32> to vector<128x1xf32>
    %22 = tpu.reciprocal %21 {approx = true} : vector<128x1xf32> -> vector<128x1xf32>
    %23 = vector.broadcast %22 : vector<128x1xf32> to vector<128x128xf32>
    %24 = arith.mulf %19, %23 : vector<128x128xf32>
    %25 = arith.truncf %24 : vector<128x128xf32> to vector<128x128xbf16>
    %cst_8 = arith.constant dense<0.000000e+00> : vector<128x16xf32>
    %26 = tpu.matmul %25, %11, %cst_8 {dimension_numbers = #tpu.dot_dimension_numbers<[1], [0], [0], [1], [0, 0, 1, 1], [], []>} : vector<128x128xbf16>, vector<128x16xbf16>, vector<128x16xf32> -> vector<128x16xf32>
    %27 = vector.extract_strided_slice %5 {offsets = [0, 16], sizes = [128, 16], strides = [1, 1]} : vector<128x384xf32> to vector<128x16xf32>
    %28 = arith.truncf %27 : vector<128x16xf32> to vector<128x16xbf16>
    %29 = vector.extract_strided_slice %5 {offsets = [0, 144], sizes = [128, 16], strides = [1, 1]} : vector<128x384xf32> to vector<128x16xf32>
    %30 = arith.truncf %29 : vector<128x16xf32> to vector<128x16xbf16>
    %31 = vector.extract_strided_slice %5 {offsets = [0, 272], sizes = [128, 16], strides = [1, 1]} : vector<128x384xf32> to vector<128x16xf32>
    %32 = arith.truncf %31 : vector<128x16xf32> to vector<128x16xbf16>
    %cst_9 = arith.constant dense<0.000000e+00> : vector<128x128xf32>
    %33 = tpu.matmul %28, %30, %cst_9 {dimension_numbers = #tpu.dot_dimension_numbers<[1], [1], [0], [0], [0, 0, 1, 0], [], []>} : vector<128x16xbf16>, vector<128x16xbf16>, vector<128x128xf32> -> vector<128x128xf32>
    %cst_10 = arith.constant 2.500000e-01 : f32
    %34 = vector.broadcast %cst_10 : f32 to vector<128x128xf32>
    %35 = arith.mulf %33, %34 : vector<128x128xf32>
    %cst_11 = arith.constant dense<0xFF800000> : vector<128xf32>
    %36 = vector.multi_reduction <maximumf>, %35, %cst_11 [1] : vector<128x128xf32> to vector<128xf32>
    %37 = vector.shape_cast %36 : vector<128xf32> to vector<128x1xf32>
    %38 = vector.broadcast %37 : vector<128x1xf32> to vector<128x128xf32>
    %39 = arith.subf %35, %38 : vector<128x128xf32>
    %40 = math.exp %39 : vector<128x128xf32>
    %cst_12 = arith.constant dense<0.000000e+00> : vector<128xf32>
    %41 = vector.multi_reduction <add>, %40, %cst_12 [1] : vector<128x128xf32> to vector<128xf32>
    %42 = vector.shape_cast %41 : vector<128xf32> to vector<128x1xf32>
    %43 = tpu.reciprocal %42 {approx = true} : vector<128x1xf32> -> vector<128x1xf32>
    %44 = vector.broadcast %43 : vector<128x1xf32> to vector<128x128xf32>
    %45 = arith.mulf %40, %44 : vector<128x128xf32>
    %46 = arith.truncf %45 : vector<128x128xf32> to vector<128x128xbf16>
    %cst_13 = arith.constant dense<0.000000e+00> : vector<128x16xf32>
    %47 = tpu.matmul %46, %32, %cst_13 {dimension_numbers = #tpu.dot_dimension_numbers<[1], [0], [0], [1], [0, 0, 1, 1], [], []>} : vector<128x128xbf16>, vector<128x16xbf16>, vector<128x16xf32> -> vector<128x16xf32>
    %48 = vector.extract_strided_slice %5 {offsets = [0, 32], sizes = [128, 16], strides = [1, 1]} : vector<128x384xf32> to vector<128x16xf32>
    %49 = arith.truncf %48 : vector<128x16xf32> to vector<128x16xbf16>
    %50 = vector.extract_strided_slice %5 {offsets = [0, 160], sizes = [128, 16], strides = [1, 1]} : vector<128x384xf32> to vector<128x16xf32>
    %51 = arith.truncf %50 : vector<128x16xf32> to vector<128x16xbf16>
    %52 = vector.extract_strided_slice %5 {offsets = [0, 288], sizes = [128, 16], strides = [1, 1]} : vector<128x384xf32> to vector<128x16xf32>
    %53 = arith.truncf %52 : vector<128x16xf32> to vector<128x16xbf16>
    %cst_14 = arith.constant dense<0.000000e+00> : vector<128x128xf32>
    %54 = tpu.matmul %49, %51, %cst_14 {dimension_numbers = #tpu.dot_dimension_numbers<[1], [1], [0], [0], [0, 0, 1, 0], [], []>} : vector<128x16xbf16>, vector<128x16xbf16>, vector<128x128xf32> -> vector<128x128xf32>
    %cst_15 = arith.constant 2.500000e-01 : f32
    %55 = vector.broadcast %cst_15 : f32 to vector<128x128xf32>
    %56 = arith.mulf %54, %55 : vector<128x128xf32>
    %cst_16 = arith.constant dense<0xFF800000> : vector<128xf32>
    %57 = vector.multi_reduction <maximumf>, %56, %cst_16 [1] : vector<128x128xf32> to vector<128xf32>
    %58 = vector.shape_cast %57 : vector<128xf32> to vector<128x1xf32>
    %59 = vector.broadcast %58 : vector<128x1xf32> to vector<128x128xf32>
    %60 = arith.subf %56, %59 : vector<128x128xf32>
    %61 = math.exp %60 : vector<128x128xf32>
    %cst_17 = arith.constant dense<0.000000e+00> : vector<128xf32>
    %62 = vector.multi_reduction <add>, %61, %cst_17 [1] : vector<128x128xf32> to vector<128xf32>
    %63 = vector.shape_cast %62 : vector<128xf32> to vector<128x1xf32>
    %64 = tpu.reciprocal %63 {approx = true} : vector<128x1xf32> -> vector<128x1xf32>
    %65 = vector.broadcast %64 : vector<128x1xf32> to vector<128x128xf32>
    %66 = arith.mulf %61, %65 : vector<128x128xf32>
    %67 = arith.truncf %66 : vector<128x128xf32> to vector<128x128xbf16>
    %cst_18 = arith.constant dense<0.000000e+00> : vector<128x16xf32>
    %68 = tpu.matmul %67, %53, %cst_18 {dimension_numbers = #tpu.dot_dimension_numbers<[1], [0], [0], [1], [0, 0, 1, 1], [], []>} : vector<128x128xbf16>, vector<128x16xbf16>, vector<128x16xf32> -> vector<128x16xf32>
    %69 = vector.extract_strided_slice %5 {offsets = [0, 48], sizes = [128, 16], strides = [1, 1]} : vector<128x384xf32> to vector<128x16xf32>
    %70 = arith.truncf %69 : vector<128x16xf32> to vector<128x16xbf16>
    %71 = vector.extract_strided_slice %5 {offsets = [0, 176], sizes = [128, 16], strides = [1, 1]} : vector<128x384xf32> to vector<128x16xf32>
    %72 = arith.truncf %71 : vector<128x16xf32> to vector<128x16xbf16>
    %73 = vector.extract_strided_slice %5 {offsets = [0, 304], sizes = [128, 16], strides = [1, 1]} : vector<128x384xf32> to vector<128x16xf32>
    %74 = arith.truncf %73 : vector<128x16xf32> to vector<128x16xbf16>
    %cst_19 = arith.constant dense<0.000000e+00> : vector<128x128xf32>
    %75 = tpu.matmul %70, %72, %cst_19 {dimension_numbers = #tpu.dot_dimension_numbers<[1], [1], [0], [0], [0, 0, 1, 0], [], []>} : vector<128x16xbf16>, vector<128x16xbf16>, vector<128x128xf32> -> vector<128x128xf32>
    %cst_20 = arith.constant 2.500000e-01 : f32
    %76 = vector.broadcast %cst_20 : f32 to vector<128x128xf32>
    %77 = arith.mulf %75, %76 : vector<128x128xf32>
    %cst_21 = arith.constant dense<0xFF800000> : vector<128xf32>
    %78 = vector.multi_reduction <maximumf>, %77, %cst_21 [1] : vector<128x128xf32> to vector<128xf32>
    %79 = vector.shape_cast %78 : vector<128xf32> to vector<128x1xf32>
    %80 = vector.broadcast %79 : vector<128x1xf32> to vector<128x128xf32>
    %81 = arith.subf %77, %80 : vector<128x128xf32>
    %82 = math.exp %81 : vector<128x128xf32>
    %cst_22 = arith.constant dense<0.000000e+00> : vector<128xf32>
    %83 = vector.multi_reduction <add>, %82, %cst_22 [1] : vector<128x128xf32> to vector<128xf32>
    %84 = vector.shape_cast %83 : vector<128xf32> to vector<128x1xf32>
    %85 = tpu.reciprocal %84 {approx = true} : vector<128x1xf32> -> vector<128x1xf32>
    %86 = vector.broadcast %85 : vector<128x1xf32> to vector<128x128xf32>
    %87 = arith.mulf %82, %86 : vector<128x128xf32>
    %88 = arith.truncf %87 : vector<128x128xf32> to vector<128x128xbf16>
    %cst_23 = arith.constant dense<0.000000e+00> : vector<128x16xf32>
    %89 = tpu.matmul %88, %74, %cst_23 {dimension_numbers = #tpu.dot_dimension_numbers<[1], [0], [0], [1], [0, 0, 1, 1], [], []>} : vector<128x128xbf16>, vector<128x16xbf16>, vector<128x16xf32> -> vector<128x16xf32>
    %90 = vector.extract_strided_slice %5 {offsets = [0, 64], sizes = [128, 16], strides = [1, 1]} : vector<128x384xf32> to vector<128x16xf32>
    %91 = arith.truncf %90 : vector<128x16xf32> to vector<128x16xbf16>
    %92 = vector.extract_strided_slice %5 {offsets = [0, 192], sizes = [128, 16], strides = [1, 1]} : vector<128x384xf32> to vector<128x16xf32>
    %93 = arith.truncf %92 : vector<128x16xf32> to vector<128x16xbf16>
    %94 = vector.extract_strided_slice %5 {offsets = [0, 320], sizes = [128, 16], strides = [1, 1]} : vector<128x384xf32> to vector<128x16xf32>
    %95 = arith.truncf %94 : vector<128x16xf32> to vector<128x16xbf16>
    %cst_24 = arith.constant dense<0.000000e+00> : vector<128x128xf32>
    %96 = tpu.matmul %91, %93, %cst_24 {dimension_numbers = #tpu.dot_dimension_numbers<[1], [1], [0], [0], [0, 0, 1, 0], [], []>} : vector<128x16xbf16>, vector<128x16xbf16>, vector<128x128xf32> -> vector<128x128xf32>
    %cst_25 = arith.constant 2.500000e-01 : f32
    %97 = vector.broadcast %cst_25 : f32 to vector<128x128xf32>
    %98 = arith.mulf %96, %97 : vector<128x128xf32>
    %cst_26 = arith.constant dense<0xFF800000> : vector<128xf32>
    %99 = vector.multi_reduction <maximumf>, %98, %cst_26 [1] : vector<128x128xf32> to vector<128xf32>
    %100 = vector.shape_cast %99 : vector<128xf32> to vector<128x1xf32>
    %101 = vector.broadcast %100 : vector<128x1xf32> to vector<128x128xf32>
    %102 = arith.subf %98, %101 : vector<128x128xf32>
    %103 = math.exp %102 : vector<128x128xf32>
    %cst_27 = arith.constant dense<0.000000e+00> : vector<128xf32>
    %104 = vector.multi_reduction <add>, %103, %cst_27 [1] : vector<128x128xf32> to vector<128xf32>
    %105 = vector.shape_cast %104 : vector<128xf32> to vector<128x1xf32>
    %106 = tpu.reciprocal %105 {approx = true} : vector<128x1xf32> -> vector<128x1xf32>
    %107 = vector.broadcast %106 : vector<128x1xf32> to vector<128x128xf32>
    %108 = arith.mulf %103, %107 : vector<128x128xf32>
    %109 = arith.truncf %108 : vector<128x128xf32> to vector<128x128xbf16>
    %cst_28 = arith.constant dense<0.000000e+00> : vector<128x16xf32>
    %110 = tpu.matmul %109, %95, %cst_28 {dimension_numbers = #tpu.dot_dimension_numbers<[1], [0], [0], [1], [0, 0, 1, 1], [], []>} : vector<128x128xbf16>, vector<128x16xbf16>, vector<128x16xf32> -> vector<128x16xf32>
    %111 = vector.extract_strided_slice %5 {offsets = [0, 80], sizes = [128, 16], strides = [1, 1]} : vector<128x384xf32> to vector<128x16xf32>
    %112 = arith.truncf %111 : vector<128x16xf32> to vector<128x16xbf16>
    %113 = vector.extract_strided_slice %5 {offsets = [0, 208], sizes = [128, 16], strides = [1, 1]} : vector<128x384xf32> to vector<128x16xf32>
    %114 = arith.truncf %113 : vector<128x16xf32> to vector<128x16xbf16>
    %115 = vector.extract_strided_slice %5 {offsets = [0, 336], sizes = [128, 16], strides = [1, 1]} : vector<128x384xf32> to vector<128x16xf32>
    %116 = arith.truncf %115 : vector<128x16xf32> to vector<128x16xbf16>
    %cst_29 = arith.constant dense<0.000000e+00> : vector<128x128xf32>
    %117 = tpu.matmul %112, %114, %cst_29 {dimension_numbers = #tpu.dot_dimension_numbers<[1], [1], [0], [0], [0, 0, 1, 0], [], []>} : vector<128x16xbf16>, vector<128x16xbf16>, vector<128x128xf32> -> vector<128x128xf32>
    %cst_30 = arith.constant 2.500000e-01 : f32
    %118 = vector.broadcast %cst_30 : f32 to vector<128x128xf32>
    %119 = arith.mulf %117, %118 : vector<128x128xf32>
    %cst_31 = arith.constant dense<0xFF800000> : vector<128xf32>
    %120 = vector.multi_reduction <maximumf>, %119, %cst_31 [1] : vector<128x128xf32> to vector<128xf32>
    %121 = vector.shape_cast %120 : vector<128xf32> to vector<128x1xf32>
    %122 = vector.broadcast %121 : vector<128x1xf32> to vector<128x128xf32>
    %123 = arith.subf %119, %122 : vector<128x128xf32>
    %124 = math.exp %123 : vector<128x128xf32>
    %cst_32 = arith.constant dense<0.000000e+00> : vector<128xf32>
    %125 = vector.multi_reduction <add>, %124, %cst_32 [1] : vector<128x128xf32> to vector<128xf32>
    %126 = vector.shape_cast %125 : vector<128xf32> to vector<128x1xf32>
    %127 = tpu.reciprocal %126 {approx = true} : vector<128x1xf32> -> vector<128x1xf32>
    %128 = vector.broadcast %127 : vector<128x1xf32> to vector<128x128xf32>
    %129 = arith.mulf %124, %128 : vector<128x128xf32>
    %130 = arith.truncf %129 : vector<128x128xf32> to vector<128x128xbf16>
    %cst_33 = arith.constant dense<0.000000e+00> : vector<128x16xf32>
    %131 = tpu.matmul %130, %116, %cst_33 {dimension_numbers = #tpu.dot_dimension_numbers<[1], [0], [0], [1], [0, 0, 1, 1], [], []>} : vector<128x128xbf16>, vector<128x16xbf16>, vector<128x16xf32> -> vector<128x16xf32>
    %132 = vector.extract_strided_slice %5 {offsets = [0, 96], sizes = [128, 16], strides = [1, 1]} : vector<128x384xf32> to vector<128x16xf32>
    %133 = arith.truncf %132 : vector<128x16xf32> to vector<128x16xbf16>
    %134 = vector.extract_strided_slice %5 {offsets = [0, 224], sizes = [128, 16], strides = [1, 1]} : vector<128x384xf32> to vector<128x16xf32>
    %135 = arith.truncf %134 : vector<128x16xf32> to vector<128x16xbf16>
    %136 = vector.extract_strided_slice %5 {offsets = [0, 352], sizes = [128, 16], strides = [1, 1]} : vector<128x384xf32> to vector<128x16xf32>
    %137 = arith.truncf %136 : vector<128x16xf32> to vector<128x16xbf16>
    %cst_34 = arith.constant dense<0.000000e+00> : vector<128x128xf32>
    %138 = tpu.matmul %133, %135, %cst_34 {dimension_numbers = #tpu.dot_dimension_numbers<[1], [1], [0], [0], [0, 0, 1, 0], [], []>} : vector<128x16xbf16>, vector<128x16xbf16>, vector<128x128xf32> -> vector<128x128xf32>
    %cst_35 = arith.constant 2.500000e-01 : f32
    %139 = vector.broadcast %cst_35 : f32 to vector<128x128xf32>
    %140 = arith.mulf %138, %139 : vector<128x128xf32>
    %cst_36 = arith.constant dense<0xFF800000> : vector<128xf32>
    %141 = vector.multi_reduction <maximumf>, %140, %cst_36 [1] : vector<128x128xf32> to vector<128xf32>
    %142 = vector.shape_cast %141 : vector<128xf32> to vector<128x1xf32>
    %143 = vector.broadcast %142 : vector<128x1xf32> to vector<128x128xf32>
    %144 = arith.subf %140, %143 : vector<128x128xf32>
    %145 = math.exp %144 : vector<128x128xf32>
    %cst_37 = arith.constant dense<0.000000e+00> : vector<128xf32>
    %146 = vector.multi_reduction <add>, %145, %cst_37 [1] : vector<128x128xf32> to vector<128xf32>
    %147 = vector.shape_cast %146 : vector<128xf32> to vector<128x1xf32>
    %148 = tpu.reciprocal %147 {approx = true} : vector<128x1xf32> -> vector<128x1xf32>
    %149 = vector.broadcast %148 : vector<128x1xf32> to vector<128x128xf32>
    %150 = arith.mulf %145, %149 : vector<128x128xf32>
    %151 = arith.truncf %150 : vector<128x128xf32> to vector<128x128xbf16>
    %cst_38 = arith.constant dense<0.000000e+00> : vector<128x16xf32>
    %152 = tpu.matmul %151, %137, %cst_38 {dimension_numbers = #tpu.dot_dimension_numbers<[1], [0], [0], [1], [0, 0, 1, 1], [], []>} : vector<128x128xbf16>, vector<128x16xbf16>, vector<128x16xf32> -> vector<128x16xf32>
    %153 = vector.extract_strided_slice %5 {offsets = [0, 112], sizes = [128, 16], strides = [1, 1]} : vector<128x384xf32> to vector<128x16xf32>
    %154 = arith.truncf %153 : vector<128x16xf32> to vector<128x16xbf16>
    %155 = vector.extract_strided_slice %5 {offsets = [0, 240], sizes = [128, 16], strides = [1, 1]} : vector<128x384xf32> to vector<128x16xf32>
    %156 = arith.truncf %155 : vector<128x16xf32> to vector<128x16xbf16>
    %157 = vector.extract_strided_slice %5 {offsets = [0, 368], sizes = [128, 16], strides = [1, 1]} : vector<128x384xf32> to vector<128x16xf32>
    %158 = arith.truncf %157 : vector<128x16xf32> to vector<128x16xbf16>
    %cst_39 = arith.constant dense<0.000000e+00> : vector<128x128xf32>
    %159 = tpu.matmul %154, %156, %cst_39 {dimension_numbers = #tpu.dot_dimension_numbers<[1], [1], [0], [0], [0, 0, 1, 0], [], []>} : vector<128x16xbf16>, vector<128x16xbf16>, vector<128x128xf32> -> vector<128x128xf32>
    %cst_40 = arith.constant 2.500000e-01 : f32
    %160 = vector.broadcast %cst_40 : f32 to vector<128x128xf32>
    %161 = arith.mulf %159, %160 : vector<128x128xf32>
    %cst_41 = arith.constant dense<0xFF800000> : vector<128xf32>
    %162 = vector.multi_reduction <maximumf>, %161, %cst_41 [1] : vector<128x128xf32> to vector<128xf32>
    %163 = vector.shape_cast %162 : vector<128xf32> to vector<128x1xf32>
    %164 = vector.broadcast %163 : vector<128x1xf32> to vector<128x128xf32>
    %165 = arith.subf %161, %164 : vector<128x128xf32>
    %166 = math.exp %165 : vector<128x128xf32>
    %cst_42 = arith.constant dense<0.000000e+00> : vector<128xf32>
    %167 = vector.multi_reduction <add>, %166, %cst_42 [1] : vector<128x128xf32> to vector<128xf32>
    %168 = vector.shape_cast %167 : vector<128xf32> to vector<128x1xf32>
    %169 = tpu.reciprocal %168 {approx = true} : vector<128x1xf32> -> vector<128x1xf32>
    %170 = vector.broadcast %169 : vector<128x1xf32> to vector<128x128xf32>
    %171 = arith.mulf %166, %170 : vector<128x128xf32>
    %172 = arith.truncf %171 : vector<128x128xf32> to vector<128x128xbf16>
    %cst_43 = arith.constant dense<0.000000e+00> : vector<128x16xf32>
    %173 = tpu.matmul %172, %158, %cst_43 {dimension_numbers = #tpu.dot_dimension_numbers<[1], [0], [0], [1], [0, 0, 1, 1], [], []>} : vector<128x128xbf16>, vector<128x16xbf16>, vector<128x16xf32> -> vector<128x16xf32>
    %174 = tpu.concatenate %26, %47, %68, %89, %110, %131, %152, %173 in 1 : vector<128x16xf32>, vector<128x16xf32>, vector<128x16xf32>, vector<128x16xf32>, vector<128x16xf32>, vector<128x16xf32>, vector<128x16xf32>, vector<128x16xf32> -> vector<128x128xf32>
    %175 = arith.truncf %174 : vector<128x128xf32> to vector<128x128xbf16>
    %c0_44 = arith.constant 0 : index
    %c0_45 = arith.constant 0 : index
    %176 = vector.load %arg3[%c0_44, %c0_45] : memref<128x128xf32, #tpu.memory_space<vmem>>, vector<128x128xf32>
    %177 = arith.truncf %176 : vector<128x128xf32> to vector<128x128xbf16>
    %cst_46 = arith.constant dense<0.000000e+00> : vector<128x128xf32>
    %178 = tpu.matmul %175, %177, %cst_46 {dimension_numbers = #tpu.dot_dimension_numbers<[1], [1], [0], [0], [0, 0, 1, 0], [], []>} : vector<128x128xbf16>, vector<128x128xbf16>, vector<128x128xf32> -> vector<128x128xf32>
    %c0_47 = arith.constant 0 : index
    %c0_48 = arith.constant 0 : index
    %179 = vector.load %arg4[%c0_47, %c0_48] : memref<1x128xf32, #tpu.memory_space<vmem>>, vector<1x128xf32>
    %180 = vector.broadcast %179 : vector<1x128xf32> to vector<128x128xf32>
    %181 = arith.addf %178, %180 : vector<128x128xf32>
    %c0_49 = arith.constant 0 : index
    %c0_50 = arith.constant 0 : index
    %c0_51 = arith.constant 0 : index
    %182 = vector.load %arg5[%c0_49, %c0_50, %c0_51] : memref<1x128x128xf32, #tpu.memory_space<vmem>>, vector<1x128x128xf32>
    %183 = vector.shape_cast %182 : vector<1x128x128xf32> to vector<128x128xf32>
    %184 = vector.shape_cast %181 : vector<128x128xf32> to vector<1x128x128xf32>
    tpu.vector_store %arg5[%c0_49, %c0_50, %c0_51], %184 {strides = array<i32>} : memref<1x128x128xf32, #tpu.memory_space<vmem>>, vector<1x128x128xf32>,
    return
  }
  func.func @transform_0(%arg0: i32) -> (i32, i32, i32) {
    %c0_i32 = arith.constant 0 : i32
    %c0_i32_0 = arith.constant 0 : i32
    %c0_i32_1 = arith.constant 0 : i32
    return %arg0, %c0_i32, %c0_i32_0 : i32, i32, i32
  }
  func.func @transform_1(%arg0: i32) -> (i32, i32) {
    %c0_i32 = arith.constant 0 : i32
    %c0_i32_0 = arith.constant 0 : i32
    %c0_i32_1 = arith.constant 0 : i32
    return %c0_i32, %c0_i32_0 : i32, i32
  }
  func.func @transform_2(%arg0: i32) -> (i32, i32) {
    %c0_i32 = arith.constant 0 : i32
    %c0_i32_0 = arith.constant 0 : i32
    %c0_i32_1 = arith.constant 0 : i32
    return %c0_i32, %c0_i32_0 : i32, i32
  }
  func.func @transform_3(%arg0: i32) -> (i32, i32) {
    %c0_i32 = arith.constant 0 : i32
    %c0_i32_0 = arith.constant 0 : i32
    %c0_i32_1 = arith.constant 0 : i32
    return %c0_i32, %c0_i32_0 : i32, i32
  }
  func.func @transform_4(%arg0: i32) -> (i32, i32, i32) {
    %c0_i32 = arith.constant 0 : i32
    %c0_i32_0 = arith.constant 0 : i32
    %c0_i32_1 = arith.constant 0 : i32
    return %arg0, %c0_i32, %c0_i32_0 : i32, i32, i32
  }
}

</mosaic_0001>

<bundles_post_ra>
// kernel: tpu_custom_call.1
= control target key start
LH: loop header
LB: loop body
LE: loop exit
PB: predicated region body
PF: predicated region fallthrough
CT: control target
= control target key end

     0   :  { %9 = vsyncpa [#allocation3], 0  ;;  %s8130_s0 = inlined_call_operand.hbm [shape: f32[2,128,128], index: 0, kind: input, shape index: {}]   ;;  %s8131_s1 = inlined_call_operand.hbm [shape: f32[384,128], index: 1, kind: input, shape index: {}]   ;;  %s8132_s2 = inlined_call_operand.hbm [shape: f32[128,128], index: 2, kind: input, shape index: {}]   ;;  %s8133_s3 = inlined_call_operand.vmem [shape: f32[1,128], index: 3, kind: input, shape index: {}]   ;;  %s8134_s4 = inlined_call_operand.hbm [shape: f32[2,128,128], index: 4, kind: output, shape index: {}]  }
   0x1   :  { %11 = vsyncpa [#allocation3 + $0x1], 0 }
   0x2   :  { %12 = vsyncpa [#allocation6], 0 }
   0x3   :  { %13 = vsyncpa [#allocation4], 0 }
   0x4   :  { %15 = vsyncpa [#allocation4 + $0x1], 0  ;;  %s5377_s15 = smov 0   ;;  %s5379_s16 = smov 0  }
   0x5   :  { %s5381_s17 = smov 0   ;;  %s5383_s18 = smov 0  }
   0x6 LB: > { %s5398_s19 = sadd.s32 4294967295, %s5337_s18   ;;  %s4222_s20 = sadd.s32 4294967294, %s5337_s18   ;;  %s5337_s18 = sphi %s5383_s18, %s8564_s18   ;;  %s5333_s17 = sphi %s5381_s17, %s8563_s17   ;;  %s5329_s16 = sphi %s5379_s16, %s8562_s16   ;;  %s5325_s15 = sphi %s5377_s15, %s8561_s15  }
   0x7   : > { %p41_p0 = scmp.ne.s32.totalorder %s5329_s16, %s5325_s15  ;;  %p42_p1 = scmp.eq.s32.totalorder %s5398_s19, 0 }
   0x8   : > { %p128_p2 = scmp.eq.s32.totalorder %s5398_s19, 1  ;;  %p134_p3 = scmp.eq.s32.totalorder %s4222_s20, 1 }
   0x9   : > { %p5407_p4 = por %p42_p1, %p41_p0  ;;  %p4223_p5 = scmp.ge.s32.totalorder %s5337_s18, 1 }
   0xa   : > { %p5412_p6 = por %p134_p3, %p41_p0  ;;  %p141_p7 = scmp.lt.s32.totalorder %s5337_s18, 3 }
   0xb   : > { %s152_s25 = sshll.u32 %s8131_s1, 4  ;;  %s5339_s27 = smov [#allocation5]   ;;  %s153_s25 = int_to_ptr.hbm [resolvable:$true] %s152_s25 }
   0xc   : > { %p5420_p8 = pnand %p4223_p5, %p141_p7  ;;  %s154_s28 = sshll.u32 %s5339_s27, 4  ;;  %s155_s28 = int_to_ptr.vmem [resolvable:$true] %s154_s28 }
   0xd   : > { %s166_s5 = sshll.u32 %s8132_s2, 4  ;;  %s5340_s6 = smov 128   ;;  %s167_s5 = int_to_ptr.hbm [resolvable:$true] %s166_s5 }
   0xe   : > { %p4318_p9 = pneg %p5420_p8  ;;  %s5341_s7 = smov 8  }
   0xf   : > { %s5342_s8 = smov [#allocation7]   ;;  %s5439_s10 = sadd.s32 1, %s5337_s18  }
  0x10   : > { %p4319_p10 = pnand %p4318_p9, %p42_p1  ;;  %s168_s9 = sshll.u32 %s5342_s8, 4  ;;  %s169_s9 = int_to_ptr.vmem [resolvable:$true] %s168_s9 }
  0x11   : > { %s28_s11 = sadd.s32 1, %s5333_s17  ;;  %s25_s12 = ssub.s32 %s5337_s18, %s5439_s10 }
  0x12   : > { %4321 = dma.hbm_to_vmem [thread:$0]  (!%p4319_p10), %s153_s25, 6144, %s155_s28, [#allocation6], %s5340_s6, %s5340_s6, %s5341_s7  }
  0x13   : > { %4324 = dma.hbm_to_vmem [thread:$0]  (!%p4319_p10), %s167_s5, 2048, %s169_s9, [#allocation6], %s5340_s6, %s5340_s6, %s5341_s7  }
  0x14   : > { %p35_p12 = scmp.ne.s32.totalorder %s5333_s17, %s5329_s16  ;;  %p26_p13 = scmp.eq.s32.totalorder %s25_s12, 0 }
  0x15   : > { %p36_p0 = scmp.eq.s32.totalorder %s5337_s18, 0  ;;  %p4335_p5 = scmp.lt.s32.totalorder %s5337_s18, 2 }
  0x16   : > { %p5449_p3 = por %p128_p2, %p35_p12  ;;  %s185_s20 = sand.u32 1, %s5333_s17  }
  0x17   : > { %s5455_s14 = scalar_select %p26_p13, %s5333_s17, %s28_s11  }
  0x18   : > { %p37_p7 = por %p36_p0, %p35_p12  ;;  %s4227_s23 = sshll.u32 %s185_s20, 7 }
  0x19   : > { %s4304_s24 = sshll.u32 %s5337_s18, 7  ;;  %s189_s29 = scalar_lea.vmem [#allocation2], %s4227_s23 }
  0x1a   : > { %s194_s28 = scalar_lea.hbm %s8130_s0, %s4304_s24  ;;  %s197_s30 = sshll.u32 %s189_s29, 4  ;;  %s198_s30 = int_to_ptr.vmem [resolvable:$true] %s197_s30 }
  0x1b   : > { %s195_s5 = sshll.u32 %s194_s28, 4  ;;  %p5462_p2 = pnand %p4335_p5, %p37_p7  ;;  %s196_s5 = int_to_ptr.hbm [resolvable:$true] %s195_s5 }
  0x1c   : > { %s186_s9 = scalar_lea.sflag [#allocation3], %s185_s20  ;;  %s5237_s11 = sshra.s32 %s196_s5, 4  ;;  %s5238_s11 = int_to_ptr.hbm [resolvable:$true] %s5237_s11 }
  0x1d   : > { %s5239_s12 = scalar_lea.hbm %s5238_s11, 128  ;;  %p5241_p10 = pneg %p5462_p2 }
  0x1e   : > { %p5240_p9 = scmp.ne.s32.totalorder %s5238_s11, %s5239_s12  ;;  %s5244_s25 = scalar_lea.hbm %s8130_s0, 256 }
  0x1f   : > { %p5245_p0 = scmp.lt.s32.totalorder %s5238_s11, %s8130_s0  ;;  %p5246_p5 = scmp.lt.s32.totalorder %s5244_s25, %s5239_s12 }
  0x20   : > { %p5242_p12 = pnand %p5241_p10, %p5240_p9 }
  0x21   : > { %p5247_p7 = por %p5246_p5, %p5245_p0 }
  0x22   : > { %p5243_p13 = pneg %p5242_p12 }
  0x24   : > { %p5248_p11 = pnand %p5247_p7, %p5243_p13 }
  0x26   : > { %5251 = shalt.err (!%p5248_p11)
}
  0x27   : > { %4328 = dma.hbm_to_vmem [thread:$0]  (!%p5462_p2), %s196_s5, 2048, %s198_s30, %s186_s9, %s5340_s6, %s5340_s6, %s5341_s7  }
  0x28   : > { %209 = sbr.rel (%p5420_p8) target bundleno = 2551 (0x9f7), region = 36 }
  0x2d   : > { %s5482_s20 = sand.u32 1, %s5329_s16  }
  0x2e   : > { %s4231_s29 = sshll.u32 %s5482_s20, 7  ;;  %s212_s11 = scalar_lea.sflag [#allocation3], %s5482_s20 }
  0x2f   : > { %s5488_s12 = scalar_lea.vmem [#allocation2], %s4231_s29 }
  0x30   : > { %5312 = dma.done.wait (%p5407_p4), %s212_s11, 2048  }
  0x31   : > { %5314 = vsyncadd (%p5407_p4), %s212_s11, 4294965248 }
  0x32   : > { %5316 = dma.done.wait (%p42_p1), [#allocation6], 8192  }
  0x33   : > { %5318 = vsyncadd (%p42_p1), [#allocation6], 4294959104  ;;  %v289_v0 = vld [vmem:[#allocation5 + $0x70] sm:$0xff]  ;;  %v290_v1 = vld [vmem:[#allocation5 + $0x78] sm:$0xff]  ;;  %s5343_s21 = smov 112   ;;  %s5344_s26 = smov 96  }
  0x34   : > { %v305_v2 = vld [vmem:[#allocation5 + $0xf0] sm:$0xff]  ;;  %v330_v3 = vpack.c.bf16 %v290_v1, %v289_v0  ;;  %v306_v4 = vld [vmem:[#allocation5 + $0xf8] sm:$0xff]  ;;  %v287_v9 = vld [vmem:[#allocation5 + $0x60] sm:$0xff]  ;;  %s5345_s6 = smov 80   ;;  %s5346_s7 = smov 64   ;;  %vm518_vm0 = vcmask 130048  }
  0x35   : > { %v321_v5 = vld [vmem:[#allocation5 + $0x170] sm:$0xff]  ;;  %v322_v6 = vld [vmem:[#allocation5 + $0x178] sm:$0xff]  ;;  %v338_v7 = vpack.c.bf16 %v306_v4, %v305_v2  ;;  %v288_v10 = vld [vmem:[#allocation5 + $0x68] sm:$0xff]  ;;  %s5347_s30 = smov 48   ;;  %s5348_s5 = smov 16   ;;  %vm3911_vm1 = vcmask 261120  }
  0x36   : > { %v346_v8 = vpack.c.bf16 %v322_v6, %v321_v5  ;;  %347 = vmatpush.bf16.xpose.msra.mxu0 %v330_v3  ;;  %v303_v11 = vld [vmem:[#allocation5 + $0xe0] sm:$0xff]  ;;  %v304_v12 = vld [vmem:[#allocation5 + $0xe8] sm:$0xff]  ;;  %v329_v15 = vpack.c.bf16 %v288_v10, %v287_v9  ;;  %v285_v18 = vld [vmem:[#allocation5 + $0x50] sm:$0xff]  ;;  %s5349_s8 = smov 32   ;;  %vm3928_vm2 = vcmask 392192   ;;  %vm3945_vm3 = vcmask 523264  }
  0x37   : > { %396 = vmatpush.bf16.xpose.msra.mxu1 %v338_v7  ;;  %v319_v13 = vld [vmem:[#allocation5 + $0x160] sm:$0xff]  ;;  %v320_v14 = vld [vmem:[#allocation5 + $0x168] sm:$0xff]  ;;  %v337_v16 = vpack.c.bf16 %v304_v12, %v303_v11  ;;  %v286_v19 = vld [vmem:[#allocation5 + $0x58] sm:$0xff]  ;;  %vm3962_vm4 = vcmask 654336   ;;  %vm3979_vm5 = vcmask 785408   ;;  %vm3996_vm6 = vcmask 916480  }
  0x38   : > { %445 = vmatpush.bf16.xpose.msra.mxu2 %v346_v8  ;;  %v345_v17 = vpack.c.bf16 %v320_v14, %v319_v13  ;;  %v301_v20 = vld [vmem:[#allocation5 + $0xd0] sm:$0xff]  ;;  %v302_v21 = vld [vmem:[#allocation5 + $0xd8] sm:$0xff]  ;;  %v328_v24 = vpack.c.bf16 %v286_v19, %v285_v18  ;;  %v283_v27 = vld [vmem:[#allocation5 + $0x40] sm:$0xff]  ;;  %s8015_s23 = scalar_lea.vmem [#allocation8], %s4231_s29  ;;  %s4305_s25 = sshll.u32 %s5398_s19, 7 }
  0x39   : > { %v317_v22 = vld [vmem:[#allocation5 + $0x150] sm:$0xff]  ;;  %v318_v23 = vld [vmem:[#allocation5 + $0x158] sm:$0xff]  ;;  %v336_v25 = vpack.c.bf16 %v302_v21, %v301_v20  ;;  %v284_v28 = vld [vmem:[#allocation5 + $0x48] sm:$0xff]  ;;  %s4126_s29 = scalar_lea.hbm %s8134_s4, %s4305_s25  ;;  %s4127_s11 = sshll.u32 %s8015_s23, 4  ;;  %s4128_s11 = int_to_ptr.vmem [resolvable:$true] %s4127_s11 }
  0x3a   : > { %v344_v26 = vpack.c.bf16 %v318_v23, %v317_v22  ;;  %v299_v29 = vld [vmem:[#allocation5 + $0xc0] sm:$0xff]  ;;  %v300_v30 = vld [vmem:[#allocation5 + $0xc8] sm:$0xff]  ;;  %v327_v33 = vpack.c.bf16 %v284_v28, %v283_v27  ;;  %v281_v36 = vld [vmem:[#allocation5 + $0x30] sm:$0xff] }
  0x3b   : > { %v315_v31 = vld [vmem:[#allocation5 + $0x140] sm:$0xff]  ;;  %v316_v32 = vld [vmem:[#allocation5 + $0x148] sm:$0xff]  ;;  %v335_v34 = vpack.c.bf16 %v300_v30, %v299_v29  ;;  %v282_v37 = vld [vmem:[#allocation5 + $0x38] sm:$0xff] }
  0x3c   : > { %v343_v35 = vpack.c.bf16 %v316_v32, %v315_v31  ;;  %v297_v38 = vld [vmem:[#allocation5 + $0xb0] sm:$0xff]  ;;  %v298_v39 = vld [vmem:[#allocation5 + $0xb8] sm:$0xff]  ;;  %v326_v42 = vpack.c.bf16 %v282_v37, %v281_v36  ;;  %v279_v45 = vld [vmem:[#allocation5 + $0x20] sm:$0xff] }
  0x3d   : > { %v313_v40 = vld [vmem:[#allocation5 + $0x130] sm:$0xff]  ;;  %v314_v41 = vld [vmem:[#allocation5 + $0x138] sm:$0xff]  ;;  %v334_v43 = vpack.c.bf16 %v298_v39, %v297_v38  ;;  %v280_v46 = vld [vmem:[#allocation5 + $0x28] sm:$0xff] }
  0x3e   : > { %348 = vmatpush.bf16.xpose.msra.mxu0 %v329_v15  ;;  %v342_v44 = vpack.c.bf16 %v314_v41, %v313_v40  ;;  %v295_v47 = vld [vmem:[#allocation5 + $0xa0] sm:$0xff]  ;;  %v296_v48 = vld [vmem:[#allocation5 + $0xa8] sm:$0xff]  ;;  %v325_v51 = vpack.c.bf16 %v280_v46, %v279_v45  ;;  %v277_v54 = vld [vmem:[#allocation5 + $0x10] sm:$0xff] }
  0x3f   : > { %397 = vmatpush.bf16.xpose.msra.mxu1 %v337_v16  ;;  %v311_v49 = vld [vmem:[#allocation5 + $0x120] sm:$0xff]  ;;  %v312_v50 = vld [vmem:[#allocation5 + $0x128] sm:$0xff]  ;;  %v333_v52 = vpack.c.bf16 %v296_v48, %v295_v47  ;;  %v278_v55 = vld [vmem:[#allocation5 + $0x18] sm:$0xff] }
  0x40   : > { %446 = vmatpush.bf16.xpose.msra.mxu2 %v345_v17  ;;  %v341_v53 = vpack.c.bf16 %v312_v50, %v311_v49  ;;  %v293_v56 = vld [vmem:[#allocation5 + $0x90] sm:$0xff]  ;;  %v294_v57 = vld [vmem:[#allocation5 + $0x98] sm:$0xff]  ;;  %v324_v60 = vpack.c.bf16 %v278_v55, %v277_v54  ;;  %v275_v63 = vld [vmem:[#allocation5] sm:$0xff] }
  0x41   : > { %v309_v58 = vld [vmem:[#allocation5 + $0x110] sm:$0xff]  ;;  %v310_v59 = vld [vmem:[#allocation5 + $0x118] sm:$0xff]  ;;  %v332_v61 = vpack.c.bf16 %v294_v57, %v293_v56  ;;  %v276_v0 = vld [vmem:[#allocation5 + $0x8] sm:$0xff] }
  0x42   : > { %v340_v62 = vpack.c.bf16 %v310_v59, %v309_v58  ;;  %v291_v1 = vld [vmem:[#allocation5 + $0x80] sm:$0xff]  ;;  %v292_v2 = vld [vmem:[#allocation5 + $0x88] sm:$0xff]  ;;  %v323_v5 = vpack.c.bf16 %v276_v0, %v275_v63  ;;  %v253_v11 = vld [vmem:[%s5488_s12 + $0x10] sm:$0xff] }
  0x43   : > { %v307_v3 = vld [vmem:[#allocation5 + $0x100] sm:$0xff]  ;;  %v308_v4 = vld [vmem:[#allocation5 + $0x108] sm:$0xff]  ;;  %v331_v6 = vpack.c.bf16 %v292_v2, %v291_v1  ;;  %v254_v12 = vld [vmem:[%s5488_s12 + $0x18] sm:$0xff] }
  0x44   : > { %v339_v7 = vpack.c.bf16 %v308_v4, %v307_v3  ;;  %v251_v8 = vld [vmem:[%s5488_s12] sm:$0xff]  ;;  %v252_v9 = vld [vmem:[%s5488_s12 + $0x8] sm:$0xff]  ;;  %v268_v13 = vpack.c.bf16 %v254_v12, %v253_v11  ;;  %v257_v17 = vld [vmem:[%s5488_s12 + $0x30] sm:$0xff] }
  0x45   : > { %v267_v10 = vpack.c.bf16 %v252_v9, %v251_v8  ;;  %v255_v14 = vld [vmem:[%s5488_s12 + $0x20] sm:$0xff]  ;;  %v256_v15 = vld [vmem:[%s5488_s12 + $0x28] sm:$0xff]  ;;  %v258_v18 = vld [vmem:[%s5488_s12 + $0x38] sm:$0xff] }
  0x46   : > { %349 = vmatpush.bf16.xpose.msra.mxu0 %v328_v24  ;;  %v269_v16 = vpack.c.bf16 %v256_v15, %v255_v14  ;;  %v270_v19 = vpack.c.bf16 %v258_v18, %v257_v17  ;;  %v259_v20 = vld [vmem:[%s5488_s12 + $0x40] sm:$0xff]  ;;  %v260_v21 = vld [vmem:[%s5488_s12 + $0x48] sm:$0xff]  ;;  %v261_v23 = vld [vmem:[%s5488_s12 + $0x50] sm:$0xff] }
  0x47   : > { %398 = vmatpush.bf16.xpose.msra.mxu1 %v336_v25  ;;  %v271_v22 = vpack.c.bf16 %v260_v21, %v259_v20  ;;  %v262_v24 = vld [vmem:[%s5488_s12 + $0x58] sm:$0xff]  ;;  %v264_v27 = vld [vmem:[%s5488_s12 + $0x68] sm:$0xff]  ;;  %v265_v29 = vld [vmem:[%s5488_s12 + $0x70] sm:$0xff] }
  0x48   : > { %447 = vmatpush.bf16.xpose.msra.mxu2 %v344_v26  ;;  %v272_v25 = vpack.c.bf16 %v262_v24, %v261_v23  ;;  %v263_v26 = vld [vmem:[%s5488_s12 + $0x60] sm:$0xff]  ;;  %v266_v30 = vld [vmem:[%s5488_s12 + $0x78] sm:$0xff]  ;;  %s4129_s12 = sshll.u32 %s4126_s29, 4  ;;  %s4130_s12 = int_to_ptr.hbm [resolvable:$true] %s4129_s12 }
  0x49   : > { %v273_v28 = vpack.c.bf16 %v264_v27, %v263_v26  ;;  %v274_v31 = vpack.c.bf16 %v266_v30, %v265_v29 }
  0x4e   : > { %350 = vmatpush.bf16.xpose.msra.mxu0 %v327_v33 }
  0x4f   : > { %399 = vmatpush.bf16.xpose.msra.mxu1 %v335_v34 }
  0x50   : > { %448 = vmatpush.bf16.xpose.msra.mxu2 %v343_v35 }
  0x56   : > { %351 = vmatpush.bf16.xpose.msra.mxu0 %v326_v42 }
  0x57   : > { %400 = vmatpush.bf16.xpose.msra.mxu1 %v334_v43 }
  0x58   : > { %449 = vmatpush.bf16.xpose.msra.mxu2 %v342_v44 }
  0x5e   : > { %352 = vmatpush.bf16.xpose.msra.mxu0 %v325_v51 }
  0x5f   : > { %401 = vmatpush.bf16.xpose.msra.mxu1 %v333_v52 }
  0x60   : > { %450 = vmatpush.bf16.xpose.msra.mxu2 %v341_v53 }
  0x66   : > { %353 = vmatpush.bf16.xpose.msra.mxu0 %v324_v60 }
  0x67   : > { %402 = vmatpush.bf16.xpose.msra.mxu1 %v332_v61 }
  0x68   : > { %451 = vmatpush.bf16.xpose.msra.mxu2 %v340_v62 }
  0x6e   : > { %354 = vmatpush.bf16.xpose.msra.mxu0 %v323_v5 }
  0x6f   : > { %403 = vmatpush.bf16.xpose.msra.mxu1 %v331_v6 }
  0x70   : > { %452 = vmatpush.bf16.xpose.msra.mxu2 %v339_v7 }
  0x75   : > { %355 = vmatmul.bf16.vlgmr.msra.gmra.mxu0 %v267_v10 }
  0x76   : > { %404 = vmatmul.bf16.vlgmr.msra.gmra.mxu1 %v267_v10 }
  0x77   : > { %453 = vmatmul.bf16.vlgmr.msra.gmra.mxu2 %v267_v10 }
  0x85   : > { %360 = vmatmul.bf16.gmra.mxu0 %v268_v13 }
  0x86   : > { %409 = vmatmul.bf16.gmra.mxu1 %v268_v13 }
  0x87   : > { %458 = vmatmul.bf16.gmra.mxu2 %v268_v13 }
  0x95   : > { %365 = vmatmul.bf16.gmra.mxu0 %v269_v16 }
  0x96   : > { %414 = vmatmul.bf16.gmra.mxu1 %v269_v16 }
  0x97   : > { %463 = vmatmul.bf16.gmra.mxu2 %v269_v16 }
  0xa5   : > { %370 = vmatmul.bf16.gmra.mxu0 %v270_v19 }
  0xa6   : > { %419 = vmatmul.bf16.gmra.mxu1 %v270_v19 }
  0xa7   : > { %468 = vmatmul.bf16.gmra.mxu2 %v270_v19 }
  0xb5   : > { %375 = vmatmul.bf16.gmra.mxu0 %v271_v22 }
  0xb6   : > { %424 = vmatmul.bf16.gmra.mxu1 %v271_v22 }
  0xb7   : > { %473 = vmatmul.bf16.gmra.mxu2 %v271_v22 }
  0xc5   : > { %380 = vmatmul.bf16.gmra.mxu0 %v272_v25 }
  0xc6   : > { %429 = vmatmul.bf16.gmra.mxu1 %v272_v25 }
  0xc7   : > { %478 = vmatmul.bf16.gmra.mxu2 %v272_v25 }
  0xd5   : > { %385 = vmatmul.bf16.gmra.mxu0 %v273_v28 }
  0xd6   : > { %434 = vmatmul.bf16.gmra.mxu1 %v273_v28 }
  0xd7   : > { %483 = vmatmul.bf16.gmra.mxu2 %v273_v28 }
  0xe5   : > { %390 = vmatmul.bf16.gmra.mxu0 %v274_v31 }
  0xe6   : > { %439 = vmatmul.bf16.gmra.mxu1 %v274_v31 }
  0xe7   : > { %488 = vmatmul.bf16.gmra.mxu2 %v274_v31 }
  0xf2   : > { %v356_v32 = vpop.f32.mrf.mxu0 }
  0xf3   : > { %v405_v33 = vpop.f32.mrf.mxu1 }
  0xfa   : > { %v454_v34 = vpop.f32.mrf.mxu2  ;;  %v358_v35 = vpop.f32.mrf.mxu0 }
  0xfb   : > { %v5514_v36 = vpack.c.bf16 %v358_v35, %v356_v32  ;;  %v407_v37 = vpop.f32.mrf.mxu1 }
  0xfc   : > { %v5516_v38 = vpack.c.bf16 %v407_v37, %v405_v33 }
  0xfd   : > { %8236 = vst [vmem:[#allocation12_spill] sm:$0xff] %v5514_v36  ;;  %841 = vrot.lane.b32.xlu2 %v5514_v36, %s5343_s21 }
  0xfe   : > { %8237 = vst [vmem:[#allocation13_spill] sm:$0xff] %v5516_v38  ;;  %1243 = vrot.lane.b32.xlu1 %v5516_v38, %s5344_s26 }
 0x102   : > { %v456_v39 = vpop.f32.mrf.mxu2  ;;  %v361_v40 = vpop.f32.mrf.mxu0 }
 0x103   : > { %v410_v41 = vpop.f32.mrf.mxu1  ;;  %v5534_v48 = vpack.c.bf16 %v456_v39, %v454_v34 }
 0x105   : > { %865 = vrot.lane.b32.xlu2 %v5516_v38, %s5343_s21  ;;  %8239 = vst [vmem:[#allocation15_spill] sm:$0xff] %v5534_v48 }
 0x106   : > { %1597 = vrot.lane.b32.xlu1 %v5514_v36, %s5345_s6 }
 0x10a   : > { %v459_v42 = vpop.f32.mrf.mxu2  ;;  %v363_v43 = vpop.f32.mrf.mxu0 }
 0x10b   : > { %v5526_v44 = vpack.c.bf16 %v363_v43, %v361_v40  ;;  %v412_v45 = vpop.f32.mrf.mxu1 }
 0x10c   : > { %v5548_v53 = vpack.c.bf16 %v412_v45, %v410_v41 }
 0x10d   : > { %8238 = vst [vmem:[#allocation14_spill] sm:$0xff] %v5526_v44  ;;  %1227 = vrot.lane.b32.xlu2 %v5514_v36, %s5344_s26  ;;  %843 = vrot.lane.b32.xlu0 %v5526_v44, %s5343_s21 }
 0x10e   : > { %1983 = vrot.lane.b32.xlu1 %v5516_v38, %s5346_s7  ;;  %8240 = vst [vmem:[#allocation16_spill] sm:$0xff] %v5548_v53 }
 0x112   : > { %v461_v46 = vpop.f32.mrf.mxu2  ;;  %v366_v54 = vpop.f32.mrf.mxu0 }
 0x113   : > { %v415_v47 = vpop.f32.mrf.mxu1  ;;  %v5556_v55 = vpack.c.bf16 %v461_v46, %v459_v42 }
 0x115   : > { %1613 = vrot.lane.b32.xlu2 %v5516_v38, %s5345_s6  ;;  %1229 = vrot.lane.b32.xlu0 %v5526_v44, %s5344_s26  ;;  %8241 = vst [vmem:[#allocation17_spill] sm:$0xff] %v5556_v55 }
 0x116   : > { %1154 = vrot.lane.b32.xlu1 %v5534_v48, %s5343_s21 }
 0x11a   : > { %v464_v49 = vpop.f32.mrf.mxu2  ;;  %v368_v58 = vpop.f32.mrf.mxu0 }
 0x11b   : > { %v417_v50 = vpop.f32.mrf.mxu1  ;;  %v5564_v61 = vpack.c.bf16 %v368_v58, %v366_v54 }
 0x11c   : > { %v5584_v2 = vpack.c.bf16 %v417_v50, %v415_v47 }
 0x11d   : > { %1967 = vrot.lane.b32.xlu2 %v5514_v36, %s5346_s7  ;;  %1599 = vrot.lane.b32.xlu0 %v5526_v44, %s5345_s6  ;;  %8242 = vst [vmem:[#allocation18_spill] sm:$0xff] %v5564_v61 }
 0x11e   : > { %1894 = vrot.lane.b32.xlu1 %v5534_v48, %s5345_s6  ;;  %8244 = vst [vmem:[#allocation20_spill] sm:$0xff] %v5584_v2 }
 0x122   : > { %v466_v51 = vpop.f32.mrf.mxu2  ;;  %v371_v4 = vpop.f32.mrf.mxu0 }
 0x123   : > { %v420_v52 = vpop.f32.mrf.mxu1  ;;  %v5580_v0 = vpack.c.bf16 %v466_v51, %v464_v49 }
 0x125   : > { %1524 = vrot.lane.b32.xlu2 %v5534_v48, %s5344_s26  ;;  %1969 = vrot.lane.b32.xlu0 %v5526_v44, %s5346_s7  ;;  %8243 = vst [vmem:[#allocation19_spill] sm:$0xff] %v5580_v0 }
 0x126   : > { %867 = vrot.lane.b32.xlu1 %v5548_v53, %s5343_s21 }
 0x12a   : > { %v469_v56 = vpop.f32.mrf.mxu2  ;;  %v373_v7 = vpop.f32.mrf.mxu0 }
 0x12b   : > { %v422_v57 = vpop.f32.mrf.mxu1  ;;  %v5598_v9 = vpack.c.bf16 %v373_v7, %v371_v4 }
 0x12c   : > { %v5600_v11 = vpack.c.bf16 %v422_v57, %v420_v52 }
 0x12d   : > { %1245 = vrot.lane.b32.xlu2 %v5548_v53, %s5344_s26  ;;  %1156 = vrot.lane.b32.xlu0 %v5556_v55, %s5343_s21  ;;  %8245 = vst [vmem:[#allocation21_spill] sm:$0xff] %v5598_v9 }
 0x12e   : > { %1615 = vrot.lane.b32.xlu1 %v5548_v53, %s5345_s6  ;;  %8246 = vst [vmem:[#allocation22_spill] sm:$0xff] %v5600_v11  ;;  %v553_v57 = vsel %vm518_vm0, %v5600_v11, 0 }
 0x132   : > { %v471_v59 = vpop.f32.mrf.mxu2  ;;  %v376_v21 = vpop.f32.mrf.mxu0 }
 0x133   : > { %v425_v60 = vpop.f32.mrf.mxu1  ;;  %v5618_v16 = vpack.c.bf16 %v471_v59, %v469_v56 }
 0x135   : > { %1985 = vrot.lane.b32.xlu2 %v5548_v53, %s5346_s7  ;;  %1526 = vrot.lane.b32.xlu0 %v5556_v55, %s5344_s26  ;;  %8247 = vst [vmem:[#allocation23_spill] sm:$0xff] %v5618_v16 }
 0x136   : > { %845 = vrot.lane.b32.xlu1 %v5564_v61, %s5343_s21 }
 0x13a   : > { %v5572_v62 = vpop.f32.mrf.mxu2  ;;  %v378_v32 = vpop.f32.mrf.mxu0 }
 0x13b   : > { %v427_v63 = vpop.f32.mrf.mxu1  ;;  %v5668_v40 = vpack.c.bf16 %v378_v32, %v376_v21 }
 0x13c   : > { %v5628_v23 = vpack.c.bf16 %v427_v63, %v425_v60  ;;  %v550_v63 = vsel %vm518_vm0, %v5584_v2, 0 }
 0x13d   : > { %1896 = vrot.lane.b32.xlu0 %v5556_v55, %s5345_s6  ;;  %1601 = vrot.lane.b32.xlu2 %v5564_v61, %s5345_s6  ;;  %8258 = vst [vmem:[#allocation34_spill] sm:$0xff] %v5668_v40 }
 0x13e   : > { %1231 = vrot.lane.b32.xlu1 %v5564_v61, %s5344_s26  ;;  %8248 = vst [vmem:[#allocation24_spill] sm:$0xff] %v5628_v23  ;;  %v556_v49 = vsel %vm518_vm0, %v5628_v23, 0 }
 0x142   : > { %v5582_v1 = vpop.f32.mrf.mxu2  ;;  %v381_v43 = vpop.f32.mrf.mxu0 }
 0x143   : > { %v430_v3 = vpop.f32.mrf.mxu1  ;;  %v5672_v41 = vpack.c.bf16 %v5582_v1, %v5572_v62 }
 0x145   : > { %869 = vrot.lane.b32.xlu0 %v5584_v2, %s5343_s21  ;;  %1158 = vrot.lane.b32.xlu2 %v5580_v0, %s5343_s21  ;;  %8259 = vst [vmem:[#allocation35_spill] sm:$0xff] %v5672_v41 }
 0x146   : > { %1971 = vrot.lane.b32.xlu1 %v5564_v61, %s5346_s7 }
 0x14a   : > { %v479_v5 = vpop.f32.mrf.mxu2  ;;  %v383_v54 = vpop.f32.mrf.mxu0 }
 0x14b   : > { %v432_v6 = vpop.f32.mrf.mxu1  ;;  %v5706_v56 = vpack.c.bf16 %v383_v54, %v381_v43 }
 0x14c   : > { %v5661_v35 = vpack.c.bf16 %v432_v6, %v430_v3 }
 0x14d   : > { %1247 = vrot.lane.b32.xlu0 %v5584_v2, %s5344_s26  ;;  %1898 = vrot.lane.b32.xlu2 %v5580_v0, %s5345_s6  ;;  %8261 = vst [vmem:[#allocation37_spill] sm:$0xff] %v5706_v56 }
 0x14e   : > { %1528 = vrot.lane.b32.xlu1 %v5580_v0, %s5344_s26  ;;  %8255 = vst [vmem:[#allocation31_spill] sm:$0xff] %v5661_v35  ;;  %v559_v42 = vsel %vm518_vm0, %v5661_v35, 0 }
 0x152   : > { %v481_v8 = vpop.f32.mrf.mxu2  ;;  %v386_v62 = vpop.f32.mrf.mxu0 }
 0x153   : > { %v435_v10 = vpop.f32.mrf.mxu1  ;;  %v5663_v37 = vpack.c.bf16 %v481_v8, %v479_v5  ;;  %v547_v5 = vsel %vm518_vm0, %v5548_v53, 0 }
 0x155   : > { %1617 = vrot.lane.b32.xlu0 %v5584_v2, %s5345_s6  ;;  %847 = vrot.lane.b32.xlu2 %v5598_v9, %s5343_s21  ;;  %8256 = vst [vmem:[#allocation32_spill] sm:$0xff] %v5663_v37 }
 0x156   : > { %1249 = vrot.lane.b32.xlu1 %v5600_v11, %s5344_s26 }
 0x157   : > { %v5608_v12 = vpop.permute.xlu2 %841 }
 0x15a   : > { %v484_v13 = vpop.f32.mrf.mxu2 }
 0x15b   : > { %v437_v14 = vpop.f32.mrf.mxu1 }
 0x15c   : > { %v5642_v27 = vpack.c.bf16 %v437_v14, %v435_v10  ;;  %v388_v10 = vpop.f32.mrf.mxu0  ;;  %v544_v14 = vsel %vm518_vm0, %v5516_v38, 0 }
 0x15d   : > { %1987 = vrot.lane.b32.xlu0 %v5584_v2, %s5346_s7  ;;  %871 = vrot.lane.b32.xlu2 %v5600_v11, %s5343_s21 }
 0x15e   : > { %1603 = vrot.lane.b32.xlu1 %v5598_v9, %s5345_s6  ;;  %8251 = vst [vmem:[#allocation27_spill] sm:$0xff] %v5642_v27  ;;  %v562_v33 = vsel %vm518_vm0, %v5642_v27, 0 }
 0x15f   : > { %v5616_v15 = vpop.permute.xlu2 %865 }
 0x162   : > { %v486_v17 = vpop.f32.mrf.mxu2 }
 0x163   : > { %v440_v18 = vpop.f32.mrf.mxu1  ;;  %v5648_v31 = vpack.c.bf16 %v486_v17, %v484_v13  ;;  %v5752_v13 = vpack.c.bf16 %v388_v10, %v386_v62 }
 0x164   : > { %v391_v54 = vpop.f32.mrf.mxu0 }
 0x165   : > { %1160 = vrot.lane.b32.xlu0 %v5618_v16, %s5343_s21  ;;  %1233 = vrot.lane.b32.xlu2 %v5598_v9, %s5344_s26  ;;  %8253 = vst [vmem:[#allocation29_spill] sm:$0xff] %v5648_v31 }
 0x166   : > { %1989 = vrot.lane.b32.xlu1 %v5600_v11, %s5346_s7  ;;  %8266 = vst [vmem:[#allocation42_spill] sm:$0xff] %v5752_v13 }
 0x167   : > { %v5626_v19 = vpop.permute.xlu2 %1227 }
 0x16a   : > { %v489_v20 = vpop.f32.mrf.mxu2 }
 0x16b   : > { %v442_v22 = vpop.f32.mrf.mxu1 }
 0x16c   : > { %v5630_v24 = vpack.c.bf16 %v442_v22, %v440_v18 }
 0x16d   : > { %1530 = vrot.lane.b32.xlu0 %v5618_v16, %s5344_s26  ;;  %1619 = vrot.lane.b32.xlu2 %v5600_v11, %s5345_s6 }
 0x16e   : > { %8249 = vst [vmem:[#allocation25_spill] sm:$0xff] %v5630_v24  ;;  %873 = vrot.lane.b32.xlu1 %v5628_v23, %s5343_s21  ;;  %v565_v25 = vsel %vm518_vm0, %v5630_v24, 0 }
 0x16f   : > { %567 = vmatpush.bf16.xpose.msra.mxu3 %v565_v25  ;;  %v5640_v26 = vpop.permute.xlu2 %1613 }
 0x170   : > { %8250 = vst [vmem:[#allocation26_spill] sm:$0xff] %v5640_v26  ;;  %v5644_v28 = vpop.permute.xlu1 %1243 }
 0x172   : > { %v491_v29 = vpop.f32.mrf.mxu2 }
 0x173   : > { %v5646_v30 = vpack.c.bf16 %v491_v29, %v489_v20 }
 0x175   : > { %8252 = vst [vmem:[#allocation28_spill] sm:$0xff] %v5646_v30  ;;  %784 = vmatpush.bf16.msrb.mxu0 %v5646_v30  ;;  %1900 = vrot.lane.b32.xlu0 %v5618_v16, %s5345_s6 }
 0x176   : > { %1973 = vrot.lane.b32.xlu2 %v5598_v9, %s5346_s7  ;;  %1621 = vrot.lane.b32.xlu1 %v5628_v23, %s5345_s6 }
 0x177   : > { %568 = vmatpush.bf16.xpose.msra.mxu3 %v562_v33  ;;  %v5659_v34 = vpop.permute.xlu2 %1967 }
 0x178   : > { %8254 = vst [vmem:[#allocation30_spill] sm:$0xff] %v5659_v34  ;;  %v5666_v39 = vpop.permute.xlu1 %1597 }
 0x179   : > { %785 = vmatpush.bf16.msrb.mxu0 %v5648_v31  ;;  %8257 = vst [vmem:[#allocation33_spill] sm:$0xff] %v5666_v39 }
 0x17d   : > { %786 = vmatpush.bf16.msrb.mxu0 %v5663_v37  ;;  %849 = vrot.lane.b32.xlu0 %v5668_v40, %s5343_s21 }
 0x17e   : > { %1251 = vrot.lane.b32.xlu2 %v5628_v23, %s5344_s26  ;;  %1162 = vrot.lane.b32.xlu1 %v5672_v41, %s5343_s21 }
 0x17f   : > { %569 = vmatpush.bf16.xpose.msra.mxu3 %v559_v42  ;;  %v5683_v45 = vpop.permute.xlu2 %1524  ;;  %v5685_v46 = vpop.permute.xlu0 %843 }
 0x180   : > { %v5688_v47 = vpop.permute.xlu1 %1983 }
 0x181   : > { %787 = vmatpush.bf16.msrb.mxu0 %v5672_v41  ;;  %8260 = vst [vmem:[#allocation36_spill] sm:$0xff] %v5688_v47 }
 0x185   : > { %788 = vmatpush.bf16.msrb.mxu0 %v5618_v16  ;;  %1235 = vrot.lane.b32.xlu0 %v5668_v40, %s5344_s26 }
 0x186   : > { %1991 = vrot.lane.b32.xlu2 %v5628_v23, %s5346_s7  ;;  %1902 = vrot.lane.b32.xlu1 %v5672_v41, %s5345_s6 }
 0x187   : > { %570 = vmatpush.bf16.xpose.msra.mxu3 %v556_v49  ;;  %v5699_v50 = vpop.permute.xlu2 %1245  ;;  %v5701_v51 = vpop.permute.xlu0 %1229 }
 0x188   : > { %v5704_v52 = vpop.permute.xlu1 %1154 }
 0x189   : > { %789 = vmatpush.bf16.msrb.mxu0 %v5580_v0 }
 0x18d   : > { %790 = vmatpush.bf16.msrb.mxu0 %v5556_v55  ;;  %1605 = vrot.lane.b32.xlu0 %v5668_v40, %s5345_s6 }
 0x18e   : > { %1532 = vrot.lane.b32.xlu2 %v5672_v41, %s5344_s26  ;;  %1237 = vrot.lane.b32.xlu1 %v5706_v56, %s5344_s26 }
 0x18f   : > { %571 = vmatpush.bf16.xpose.msra.mxu3 %v553_v57  ;;  %v5717_v58 = vpop.permute.xlu2 %1985  ;;  %v5719_v59 = vpop.permute.xlu0 %1599 }
 0x190   : > { %8262 = vst [vmem:[#allocation38_spill] sm:$0xff] %v5719_v59  ;;  %v5722_v60 = vpop.permute.xlu1 %1894 }
 0x191   : > { %791 = vmatpush.bf16.msrb.mxu0 %v5534_v48 }
 0x195   : > { %1975 = vrot.lane.b32.xlu0 %v5668_v40, %s5346_s7 }
 0x196   : > { %851 = vrot.lane.b32.xlu2 %v5706_v56, %s5343_s21  ;;  %1977 = vrot.lane.b32.xlu1 %v5706_v56, %s5346_s7 }
 0x197   : > { %572 = vmatpush.bf16.xpose.msra.mxu3 %v550_v63  ;;  %v5732_v1 = vpop.permute.xlu0 %1969  ;;  %v5734_v3 = vpop.permute.xlu2 %1601 }
 0x198   : > { %8263 = vst [vmem:[#allocation39_spill] sm:$0xff] %v5732_v1  ;;  %v5736_v4 = vpop.permute.xlu1 %867 }
 0x199   : > { %8264 = vst [vmem:[#allocation40_spill] sm:$0xff] %v5734_v3 }
 0x19d   : > { %875 = vrot.lane.b32.xlu0 %v5661_v35, %s5343_s21 }
 0x19e   : > { %1607 = vrot.lane.b32.xlu2 %v5706_v56, %s5345_s6  ;;  %1534 = vrot.lane.b32.xlu1 %v5663_v37, %s5344_s26 }
 0x19f   : > { %573 = vmatpush.bf16.xpose.msra.mxu3 %v547_v5  ;;  %v5746_v6 = vpop.permute.xlu0 %1156  ;;  %v5748_v7 = vpop.permute.xlu2 %1158 }
 0x1a0   : > { %v5750_v8 = vpop.permute.xlu1 %1615  ;;  %v393_v5 = vpop.f32.mrf.mxu0 }
 0x1a1   : > { %8265 = vst [vmem:[#allocation41_spill] sm:$0xff] %v5750_v8 }
 0x1a5   : > { %1253 = vrot.lane.b32.xlu0 %v5661_v35, %s5344_s26 }
 0x1a6   : > { %1164 = vrot.lane.b32.xlu2 %v5663_v37, %s5343_s21  ;;  %853 = vrot.lane.b32.xlu1 %v5752_v13, %s5343_s21 }
 0x1a7   : > { %574 = vmatpush.bf16.xpose.msra.mxu3 %v544_v14  ;;  %v5762_v17 = vpop.permute.xlu0 %1526  ;;  %v5764_v18 = vpop.permute.xlu2 %1898 }
 0x1a8   : > { %v5766_v20 = vpop.permute.xlu1 %845 }
 0x1ad   : > { %1623 = vrot.lane.b32.xlu0 %v5661_v35, %s5345_s6 }
 0x1ae   : > { %1904 = vrot.lane.b32.xlu2 %v5663_v37, %s5345_s6  ;;  %4235 = vmatmul.msk.bf16.vlgmr.msra.gmra.mxu3 %vm518_vm0, %v5514_v36 }
 0x1af   : > { %1255 = vrot.lane.b32.xlu1 %v5642_v27, %s5344_s26  ;;  %v5776_v21 = vpop.permute.xlu0 %1896  ;;  %v5778_v22 = vpop.permute.xlu2 %847 }
 0x1b0   : > { %8267 = vst [vmem:[#allocation43_spill] sm:$0xff] %v5778_v22  ;;  %v5780_v25 = vpop.permute.xlu1 %1231 }
 0x1b5   : > { %1993 = vrot.lane.b32.xlu0 %v5661_v35, %s5346_s7 }
 0x1b6   : > { %877 = vrot.lane.b32.xlu2 %v5642_v27, %s5343_s21 }
 0x1b7   : > { %1609 = vrot.lane.b32.xlu1 %v5752_v13, %s5345_s6  ;;  %v5788_v29 = vpop.permute.xlu0 %869  ;;  %v5790_v32 = vpop.permute.xlu2 %871 }
 0x1b8   : > { %v5792_v33 = vpop.permute.xlu1 %1971 }
 0x1b9   : > { %8268 = vst [vmem:[#allocation44_spill] sm:$0xff] %v5792_v33  ;;  %v5834_v33 = vpack.c.bf16 %v393_v5, %v391_v54 }
 0x1bb   : > { %8271 = vst [vmem:[#allocation47_spill] sm:$0xff] %v5834_v33 }
 0x1bd   : > { %1166 = vrot.lane.b32.xlu0 %v5648_v31, %s5343_s21 }
 0x1be   : > { %1239 = vrot.lane.b32.xlu2 %v5752_v13, %s5344_s26  ;;  %4236 = vmatmul.msk.bf16.gmra.mxu3 %vm518_vm0, %v5526_v44 }
 0x1bf   : > { %1995 = vrot.lane.b32.xlu1 %v5642_v27, %s5346_s7  ;;  %v5802_v42 = vpop.permute.xlu0 %1247  ;;  %v5804_v43 = vpop.permute.xlu2 %1233 }
 0x1c0   : > { %v5806_v49 = vpop.permute.xlu1 %1528 }
 0x1c5   : > { %1536 = vrot.lane.b32.xlu0 %v5648_v31, %s5344_s26 }
 0x1c6   : > { %1625 = vrot.lane.b32.xlu2 %v5642_v27, %s5345_s6 }
 0x1c7   : > { %879 = vrot.lane.b32.xlu1 %v5630_v24, %s5343_s21  ;;  %v5814_v57 = vpop.permute.xlu0 %1617  ;;  %v5816_v62 = vpop.permute.xlu2 %1619 }
 0x1c8   : > { %v5818_v63 = vpop.permute.xlu1 %1249 }
 0x1cd   : > { %1906 = vrot.lane.b32.xlu0 %v5648_v31, %s5345_s6 }
 0x1ce   : > { %1979 = vrot.lane.b32.xlu2 %v5752_v13, %s5346_s7  ;;  %4237 = vmatmul.msk.bf16.gmra.mxu3 %vm518_vm0, %v5564_v61 }
 0x1cf   : > { %1627 = vrot.lane.b32.xlu1 %v5630_v24, %s5345_s6  ;;  %v5828_v10 = vpop.permute.xlu0 %1987 }
 0x1d0   : > { %v5830_v14 = vpop.permute.xlu2 %1973  ;;  %v5832_v3 = vpop.permute.xlu1 %1603 }
 0x1d1   : > { %8269 = vst [vmem:[#allocation45_spill] sm:$0xff] %v5830_v14 }
 0x1d2   : > { %8270 = vst [vmem:[#allocation46_spill] sm:$0xff] %v5832_v3 }
 0x1d5   : > { %855 = vrot.lane.b32.xlu0 %v5834_v33, %s5343_s21 }
 0x1d6   : > { %1257 = vrot.lane.b32.xlu2 %v5630_v24, %s5344_s26 }
 0x1d7   : > { %1168 = vrot.lane.b32.xlu1 %v5646_v30, %s5343_s21  ;;  %v5842_v59 = vpop.permute.xlu0 %1160 }
 0x1d8   : > { %v5844_v1 = vpop.permute.xlu2 %1251  ;;  %v5846_v39 = vpop.permute.xlu1 %1989 }
 0x1dd   : > { %1241 = vrot.lane.b32.xlu0 %v5834_v33, %s5344_s26 }
 0x1de   : > { %1997 = vrot.lane.b32.xlu2 %v5630_v24, %s5346_s7  ;;  %4238 = vmatmul.msk.bf16.gmra.mxu3 %vm518_vm0, %v5598_v9 }
 0x1df   : > { %2266 = vrot.lane.b32.xlu1 %v5556_v55, %s5346_s7  ;;  %v5856_v54 = vpop.permute.xlu0 %1530 }
 0x1e0   : > { %v5858_v5 = vpop.permute.xlu2 %1991  ;;  %v5860_v3 = vpop.permute.xlu1 %873 }
 0x1e5   : > { %1611 = vrot.lane.b32.xlu0 %v5834_v33, %s5345_s6 }
 0x1e6   : > { %1538 = vrot.lane.b32.xlu2 %v5646_v30, %s5344_s26 }
 0x1e7   : > { %1908 = vrot.lane.b32.xlu1 %v5646_v30, %s5345_s6  ;;  %v5868_v14 = vpop.permute.xlu0 %1900 }
 0x1e8   : > { %v5870_v34 = vpop.permute.xlu2 %1532  ;;  %v5872_v55 = vpop.permute.xlu1 %1621 }
 0x1ed   : > { %1981 = vrot.lane.b32.xlu0 %v5834_v33, %s5346_s7 }
 0x1ee   : > { %2264 = vrot.lane.b32.xlu2 %v5534_v48, %s5346_s7  ;;  %4239 = vmatmul.msk.bf16.gmra.mxu3 %vm518_vm0, %v5668_v40 }
 0x1ef   : > { %2363 = vrot.lane.b32.xlu1 %v5661_v35, %s5347_s30  ;;  %v5882_v26 = vpop.permute.xlu0 %849 }
 0x1f0   : > { %8272 = vst [vmem:[#allocation48_spill] sm:$0xff] %v5882_v26  ;;  %v5884_v22 = vpop.permute.xlu2 %851  ;;  %v5886_v47 = vpop.permute.xlu1 %1162 }
 0x1f1   : > { %8273 = vst [vmem:[#allocation49_spill] sm:$0xff] %v5884_v22 }
 0x1f5   : > { %2367 = vrot.lane.b32.xlu0 %v5630_v24, %s5347_s30 }
 0x1f6   : > { %2365 = vrot.lane.b32.xlu2 %v5642_v27, %s5347_s30 }
 0x1f7   : > { %2276 = vrot.lane.b32.xlu1 %v5648_v31, %s5346_s7  ;;  %v5894_v48 = vpop.permute.xlu0 %1235 }
 0x1f8   : > { %v5896_v8 = vpop.permute.xlu2 %1607  ;;  %v5898_v35 = vpop.permute.xlu1 %1902 }
 0x1f9   : > { %8274 = vst [vmem:[#allocation50_spill] sm:$0xff] %v5896_v8 }
 0x1fd   : > { %2268 = vrot.lane.b32.xlu0 %v5580_v0, %s5346_s7 }
 0x1fe   : > { %2272 = vrot.lane.b32.xlu2 %v5672_v41, %s5346_s7  ;;  %4240 = vmatmul.msk.bf16.gmra.mxu3 %vm518_vm0, %v5706_v56 }
 0x1ff   : > { %2337 = vrot.lane.b32.xlu1 %v5514_v36, %s5347_s30  ;;  %v5908_v27 = vpop.permute.xlu0 %1605 }
 0x200   : > { %8275 = vst [vmem:[#allocation51_spill] sm:$0xff] %v5908_v27  ;;  %v5910_v31 = vpop.permute.xlu2 %1164  ;;  %v5912_v24 = vpop.permute.xlu1 %1237 }
 0x201   : > { %8276 = vst [vmem:[#allocation52_spill] sm:$0xff] %v5912_v24 }
 0x205   : > { %2270 = vrot.lane.b32.xlu0 %v5618_v16, %s5346_s7 }
 0x206   : > { %2361 = vrot.lane.b32.xlu2 %v5628_v23, %s5347_s30 }
 0x207   : > { %2341 = vrot.lane.b32.xlu1 %v5564_v61, %s5347_s30  ;;  %v5920_v0 = vpop.permute.xlu0 %1975 }
 0x208   : > { %8277 = vst [vmem:[#allocation53_spill] sm:$0xff] %v5920_v0  ;;  %v5922_v41 = vpop.permute.xlu2 %1904  ;;  %v5924_v36 = vpop.permute.xlu1 %1977 }
 0x209   : > { %8278 = vst [vmem:[#allocation54_spill] sm:$0xff] %v5924_v36 }
 0x20d   : > { %2274 = vrot.lane.b32.xlu0 %v5663_v37, %s5346_s7 }
 0x20e   : > { %2359 = vrot.lane.b32.xlu2 %v5600_v11, %s5347_s30  ;;  %4241 = vmatmul.msk.bf16.gmra.mxu3 %vm518_vm0, %v5752_v13 }
 0x20f   : > { %2345 = vrot.lane.b32.xlu1 %v5668_v40, %s5347_s30  ;;  %v876_v23 = vpop.permute.xlu0 %875 }
 0x210   : > { %v878_v16 = vpop.permute.xlu2 %877  ;;  %v1535_v61 = vpop.permute.xlu1 %1534 }
 0x215   : > { %2278 = vrot.lane.b32.xlu0 %v5646_v30, %s5346_s7 }
 0x216   : > { %2357 = vrot.lane.b32.xlu2 %v5584_v2, %s5347_s30 }
 0x217   : > { %2349 = vrot.lane.b32.xlu1 %v5752_v13, %s5347_s30  ;;  %v1254_v40 = vpop.permute.xlu0 %1253 }
 0x218   : > { %v5940_v11 = vpop.permute.xlu2 %1239  ;;  %v5942_v37 = vpop.permute.xlu1 %853 }
 0x219   : > { %8279 = vst [vmem:[#allocation55_spill] sm:$0xff] %v5940_v11 }
 0x21a   : > { %8280 = vst [vmem:[#allocation56_spill] sm:$0xff] %v5942_v37 }
 0x21d   : > { %2339 = vrot.lane.b32.xlu0 %v5526_v44, %s5347_s30 }
 0x21e   : > { %2343 = vrot.lane.b32.xlu2 %v5598_v9, %s5347_s30  ;;  %4242 = vmatmul.msk.bf16.gmra.mxu3 %vm518_vm0, %v5834_v33 }
 0x21f   : > { %v5952_v8 = vpop.permute.xlu0 %1623 }
 0x220   : > { %v5950_v2 = vpop.permute.xlu2 %1625 }
 0x221   : > { %v1256_v30 = vpop.permute.xlu1 %1255 }
 0x225   : > { %2355 = vrot.lane.b32.xlu0 %v5548_v53, %s5347_s30 }
 0x226   : > { %2347 = vrot.lane.b32.xlu2 %v5706_v56, %s5347_s30 }
 0x227   : > { %v5964_v44 = vpop.permute.xlu0 %1993 }
 0x228   : > { %v5958_v13 = vpop.permute.xlu2 %1979 }
 0x229   : > { %8281 = vst [vmem:[#allocation57_spill] sm:$0xff] %v5958_v13  ;;  %v5960_v9 = vpop.permute.xlu1 %1609 }
 0x22a   : > { %8282 = vst [vmem:[#allocation58_spill] sm:$0xff] %v5960_v9  ;;  %v1302_v9 = vsel %vm518_vm0, %v1256_v30, 0 }
 0x22d   : > { %2353 = vrot.lane.b32.xlu0 %v5516_v38, %s5347_s30 }
 0x22f   : > { %v1167_v13 = vpop.permute.xlu0 %1166 }
 0x230   : > { %v1258_v36 = vpop.permute.xlu2 %1257 }
 0x231   : > { %v5966_v27 = vpop.permute.xlu1 %1995  ;;  %v1305_v0 = vsel %vm518_vm0, %v1258_v36, 0  ;;  %v576_v37 = vpop.f32.mrf.mxu3  ;;  %v1299_v36 = vsel %vm518_vm0, %v1254_v40, 0  ;;  %v921_v40 = vsel %vm518_vm0, %v876_v23, 0  ;;  %v918_v23 = vsel %vm518_vm0, %v5860_v3, 0 }
 0x232   : > { %1307 = vmatpush.bf16.xpose.msrb.mxu3 %v1305_v0 }
 0x235   : > { %2351 = vrot.lane.b32.xlu0 %v5834_v33, %s5347_s30  ;;  %v924_v33 = vsel %vm518_vm0, %v878_v16, 0 }
 0x237   : > { %v1537_v30 = vpop.permute.xlu0 %1536 }
 0x238   : > { %v5971_v56 = vpop.permute.xlu2 %1997 }
 0x239   : > { %v880_v53 = vpop.permute.xlu1 %879  ;;  %v578_v11 = vpop.f32.mrf.mxu3 }
 0x23a   : > { %v927_v38 = vsel %vm518_vm0, %v880_v53, 0  ;;  %1308 = vmatpush.bf16.xpose.msrb.mxu3 %v1302_v9 }
 0x23b   : > { %929 = vmatpush.bf16.xpose.msrb.mxu1 %v927_v38  ;;  %v1296_v38 = vsel %vm518_vm0, %v5844_v1, 0 }
 0x240   : > { %v1539_v22 = vpop.permute.xlu2 %1538 }
 0x241   : > { %v5975_v24 = vpop.permute.xlu1 %1627  ;;  %1548 = vmatpush.bf16.msra.mxu0 %v1539_v22  ;;  %v581_v0 = vpop.f32.mrf.mxu3 }
 0x242   : > { %1309 = vmatpush.bf16.xpose.msrb.mxu3 %v1299_v36  ;;  %v5979_v26 = vmul.f32 0.25, %v581_v0 }
 0x243   : > { %930 = vmatpush.bf16.xpose.msrb.mxu1 %v924_v33 }
 0x244   : > { %636 = vmax.xlane.f32.xlu1 %v5979_v26 }
 0x245   : > { %1549 = vmatpush.bf16.msra.mxu0 %v1537_v30  ;;  %v2027_v30 = vsel %vm518_vm0, %v5717_v58, 0  ;;  %v8284_v58 = vld [vmem:[#allocation36_spill] sm:$0xff] }
 0x249   : > { %v1169_v53 = vpop.permute.xlu1 %1168  ;;  %1550 = vmatpush.bf16.msra.mxu0 %v1535_v61  ;;  %v583_v9 = vpop.f32.mrf.mxu3  ;;  %v1293_v61 = vsel %vm518_vm0, %v5818_v63, 0 }
 0x24a   : > { %1178 = vmatpush.bf16.msrb.mxu2 %v1169_v53  ;;  %1310 = vmatpush.bf16.xpose.msrb.mxu3 %v1296_v38  ;;  %v5985_v16 = vmul.f32 0.25, %v583_v9 }
 0x24b   : > { %931 = vmatpush.bf16.xpose.msrb.mxu1 %v921_v40  ;;  %v2024_v40 = vsel %vm518_vm0, %v8284_v58, 0 }
 0x24c   : > { %638 = vmax.xlane.f32.xlu1 %v5985_v16 }
 0x24d   : > { %1551 = vmatpush.bf16.msra.mxu0 %v5870_v34  ;;  %v1290_v34 = vsel %vm518_vm0, %v5802_v42, 0  ;;  %v1907_v42 = vpop.permute.xlu0 %1906 }
 0x24e   : > { %1179 = vmatpush.bf16.msrb.mxu2 %v1167_v13 }
 0x251   : > { %1552 = vmatpush.bf16.msra.mxu0 %v5856_v54  ;;  %v586_v22 = vpop.f32.mrf.mxu3  ;;  %v6008_v33 = vpop.permute.xlu1 %2266 }
 0x252   : > { %1180 = vmatpush.bf16.msrb.mxu2 %v5910_v31  ;;  %1311 = vmatpush.bf16.xpose.msrb.mxu3 %v1293_v61  ;;  %v5995_v1 = vmul.f32 0.25, %v586_v22  ;;  %v915_v31 = vsel %vm518_vm0, %v5790_v32, 0  ;;  %v912_v32 = vsel %vm518_vm0, %v5788_v29, 0  ;;  %v8285_v22 = vld [vmem:[#allocation43_spill] sm:$0xff] }
 0x253   : > { %932 = vmatpush.bf16.xpose.msrb.mxu1 %v918_v23 }
 0x254   : > { %640 = vmax.xlane.f32.xlu2 %v5995_v1 }
 0x255   : > { %1553 = vmatpush.bf16.msra.mxu0 %v5806_v49 }
 0x256   : > { %1181 = vmatpush.bf16.msrb.mxu2 %v5886_v47  ;;  %v6012_v47 = vmul.f32 0.25, %v576_v37  ;;  %v6022_v37 = vmul.f32 0.25, %v578_v11 }
 0x259   : > { %1554 = vmatpush.bf16.msra.mxu0 %v5762_v17  ;;  %v588_v13 = vpop.f32.mrf.mxu3  ;;  %v1909_v49 = vpop.permute.xlu1 %1908 }
 0x25a   : > { %1182 = vmatpush.bf16.msrb.mxu2 %v5842_v59  ;;  %1312 = vmatpush.bf16.xpose.msrb.mxu3 %v1290_v34  ;;  %v6006_v3 = vmul.f32 0.25, %v588_v13  ;;  %v1287_v59 = vsel %vm518_vm0, %v5699_v50, 0 }
 0x25b   : > { %933 = vmatpush.bf16.xpose.msrb.mxu1 %v915_v31 }
 0x25c   : > { %642 = vmax.xlane.f32.xlu2 %v6006_v3 }
 0x25d   : > { %1555 = vmatpush.bf16.msra.mxu0 %v5683_v45  ;;  %v1284_v45 = vsel %vm518_vm0, %v5644_v28, 0 }
 0x25e   : > { %1183 = vmatpush.bf16.msrb.mxu2 %v5748_v7  ;;  %v2045_v7 = vsel %vm518_vm0, %v5971_v56, 0  ;;  %v906_v56 = vsel %vm518_vm0, %v5616_v15, 0 }
 0x25f   : > { %632 = vmax.xlane.f32.xlu0 %v6012_v47 }
 0x261   : > { %v591_v17 = vpop.f32.mrf.mxu3 }
 0x262   : > { %1184 = vmatpush.bf16.msrb.mxu2 %v5746_v6  ;;  %1313 = vmatpush.bf16.xpose.msrb.mxu3 %v1287_v59  ;;  %v909_v6 = vsel %vm518_vm0, %v5736_v4, 0  ;;  %v6034_v11 = vmul.f32 0.25, %v591_v17  ;;  %v1675_v4 = vsel %vm518_vm0, %v5975_v24, 0  ;;  %v1672_v24 = vsel %vm518_vm0, %v5950_v2, 0 }
 0x263   : > { %934 = vmatpush.bf16.xpose.msrb.mxu1 %v912_v32  ;;  %v2036_v2 = vsel %vm518_vm0, %v5858_v5, 0  ;;  %v2364_v32 = vpop.permute.xlu1 %2363 }
 0x266   : > { %1185 = vmatpush.bf16.msrb.mxu2 %v5704_v52  ;;  %v6036_v52 = vpop.permute.xlu0 %855 }
 0x267   : > { %634 = vmax.xlane.f32.xlu0 %v6022_v37 }
 0x269   : > { %v593_v50 = vpop.f32.mrf.mxu3 }
 0x26a   : > { %1918 = vmatpush.bf16.msra.mxu2 %v1909_v49  ;;  %1314 = vmatpush.bf16.xpose.msrb.mxu3 %v1284_v45  ;;  %v6031_v29 = vmul.f32 0.25, %v593_v50  ;;  %v2409_v49 = vsel %vm518_vm0, %v2364_v32, 0 }
 0x26b   : > { %935 = vmatpush.bf16.xpose.msrb.mxu1 %v909_v6  ;;  %v8288_v6 = vld [vmem:[#allocation52_spill] sm:$0xff] }
 0x26c   : > { %646 = vmax.xlane.f32.xlu1 %v6031_v29 }
 0x26e   : > { %1919 = vmatpush.bf16.msra.mxu2 %v1907_v42  ;;  %v8287_v42 = vld [vmem:[#allocation48_spill] sm:$0xff] }
 0x26f   : > { %644 = vmax.xlane.f32.xlu0 %v6034_v11 }
 0x271   : > { %4251 = vmatmul.msk.bf16.vlgmr.msrb.gmra.mxu3 %vm518_vm0, %v5626_v19  ;;  %v596_v28 = vpop.f32.mrf.mxu3  ;;  %v6053_v19 = vpop.permute.xlu0 %1241 }
 0x272   : > { %2047 = vmatpush.bf16.xpose.msra.mxu3 %v2045_v7  ;;  %1920 = vmatpush.bf16.msra.mxu2 %v5922_v41  ;;  %v6046_v63 = vmul.f32 0.25, %v596_v28  ;;  %v2042_v41 = vsel %vm518_vm0, %v5966_v27, 0  ;;  %v2039_v27 = vsel %vm518_vm0, %v5964_v44, 0  ;;  %v1669_v44 = vsel %vm518_vm0, %v5952_v8, 0 }
 0x273   : > { %936 = vmatpush.bf16.xpose.msrb.mxu1 %v906_v56  ;;  %v8289_v56 = vld [vmem:[#allocation49_spill] sm:$0xff] }
 0x274   : > { %648 = vmax.xlane.f32.xlu2 %v6046_v63 }
 0x276   : > { %1921 = vmatpush.bf16.msra.mxu2 %v5898_v35 }
 0x279   : > { %v598_v15 = vpop.f32.mrf.mxu3 }
 0x27a   : > { %2048 = vmatpush.bf16.xpose.msra.mxu3 %v2042_v41  ;;  %1922 = vmatpush.bf16.msra.mxu2 %v5868_v14  ;;  %v6062_v35 = vmul.f32 0.25, %v598_v15  ;;  %v6068_v14 = vpop.permute.xlu0 %1611  ;;  %v8290_v15 = vld [vmem:[#allocation55_spill] sm:$0xff] }
 0x27b   : > { %1677 = vmatpush.bf16.xpose.msra.mxu1 %v1675_v4 }
 0x27c   : > { %4243 = vmatmul.msk.bf16.vlgmr.msrb.gmra.mxu1 %vm518_vm0, %v5608_v12  ;;  %650 = vmax.xlane.f32.xlu0 %v6062_v35 }
 0x27e   : > { %1923 = vmatpush.bf16.msra.mxu2 %v5764_v18 }
 0x281   : > { %4252 = vmatmul.msk.bf16.gmra.mxu3 %vm518_vm0, %v5701_v51  ;;  %v601_v12 = vpop.f32.mrf.mxu3  ;;  %v1666_v51 = vsel %vm518_vm0, %v5872_v55, 0  ;;  %v1663_v55 = vsel %vm518_vm0, %v5816_v62, 0  ;;  %v6107_v62 = vpop.permute.xlu2 %2264 }
 0x282   : > { %2049 = vmatpush.bf16.xpose.msra.mxu3 %v2039_v27  ;;  %1924 = vmatpush.bf16.msra.mxu2 %v5776_v21  ;;  %v6070_v18 = vmul.f32 0.25, %v601_v12  ;;  %v6086_v8 = vpop.permute.xlu0 %1981  ;;  %v6150_v12 = vpop.permute.xlu1 %2276 }
 0x283   : > { %1678 = vmatpush.bf16.xpose.msra.mxu1 %v1672_v24 }
 0x284   : > { %652 = vmax.xlane.f32.xlu1 %v6070_v18 }
 0x286   : > { %1925 = vmatpush.bf16.msra.mxu2 %v5722_v60  ;;  %v2033_v60 = vsel %vm518_vm0, %v5846_v39, 0  ;;  %v2030_v39 = vsel %vm518_vm0, %v5828_v10, 0 }
 0x289   : > { %v603_v21 = vpop.f32.mrf.mxu3  ;;  %v2366_v61 = vpop.permute.xlu2 %2365 }
 0x28a   : > { %2050 = vmatpush.bf16.xpose.msra.mxu3 %v2036_v2  ;;  %v6084_v54 = vmul.f32 0.25, %v603_v21  ;;  %v2412_v59 = vsel %vm518_vm0, %v2366_v61, 0 }
 0x28b   : > { %1679 = vmatpush.bf16.xpose.msra.mxu1 %v1669_v44  ;;  %v8291_v44 = vld [vmem:[#allocation56_spill] sm:$0xff] }
 0x28c   : > { %4244 = vmatmul.msk.bf16.gmra.mxu1 %vm518_vm0, %v5685_v46  ;;  %654 = vmax.xlane.f32.xlu2 %v6084_v54  ;;  %v2368_v46 = vpop.permute.xlu0 %2367 }
 0x28d   : > { %v2415_v13 = vsel %vm518_vm0, %v2368_v46, 0 }
 0x291   : > { %4253 = vmatmul.msk.bf16.gmra.mxu3 %vm518_vm0, %v5780_v25  ;;  %v606_v5 = vpop.f32.mrf.mxu3  ;;  %v1660_v25 = vsel %vm518_vm0, %v5814_v57, 0  ;;  %v8283_v57 = vld [vmem:[#allocation41_spill] sm:$0xff]  ;;  %v6129_v31 = vpop.permute.xlu2 %2272 }
 0x292   : > { %2051 = vmatpush.bf16.xpose.msra.mxu3 %v2033_v60  ;;  %v6091_v36 = vmul.f32 0.25, %v606_v5  ;;  %v1657_v9 = vsel %vm518_vm0, %v8283_v57, 0 }
 0x293   : > { %1680 = vmatpush.bf16.xpose.msra.mxu1 %v1666_v51  ;;  %v6157_v51 = vpop.permute.xlu1 %2337 }
 0x294   : > { %656 = vmax.xlane.f32.xlu0 %v6091_v36  ;;  %v6109_v10 = vpop.permute.xlu0 %2268 }
 0x299   : > { %v608_v0 = vpop.f32.mrf.mxu3  ;;  %v2362_v45 = vpop.permute.xlu2 %2361 }
 0x29a   : > { %2052 = vmatpush.bf16.xpose.msra.mxu3 %v2030_v39  ;;  %v6104_v53 = vmul.f32 0.25, %v608_v0  ;;  %v8293_v0 = vld [vmem:[#allocation30_spill] sm:$0xff] }
 0x29b   : > { %1681 = vmatpush.bf16.xpose.msra.mxu1 %v1663_v55  ;;  %v6164_v39 = vpop.permute.xlu1 %2341 }
 0x29c   : > { %4245 = vmatmul.msk.bf16.gmra.mxu1 %vm518_vm0, %v5766_v20  ;;  %658 = vmax.xlane.f32.xlu1 %v6104_v53  ;;  %v6122_v23 = vpop.permute.xlu0 %2270 }
 0x2a1   : > { %4254 = vmatmul.msk.bf16.gmra.mxu3 %vm518_vm0, %v5804_v43  ;;  %v611_v20 = vpop.f32.mrf.mxu3  ;;  %v8286_v43 = vld [vmem:[#allocation26_spill] sm:$0xff]  ;;  %v2360_v7 = vpop.permute.xlu2 %2359 }
 0x2a2   : > { %2053 = vmatpush.bf16.xpose.msra.mxu3 %v2027_v30  ;;  %v6113_v38 = vmul.f32 0.25, %v611_v20  ;;  %v1654_v34 = vsel %vm518_vm0, %v8286_v43, 0  ;;  %v2403_v4 = vsel %vm518_vm0, %v2360_v7, 0 }
 0x2a3   : > { %1682 = vmatpush.bf16.xpose.msra.mxu1 %v1660_v25  ;;  %v6168_v30 = vpop.permute.xlu1 %2345 }
 0x2a4   : > { %660 = vmax.xlane.f32.xlu2 %v6113_v38  ;;  %v6132_v17 = vpop.permute.xlu0 %2274 }
 0x2a9   : > { %v2358_v41 = vpop.permute.xlu2 %2357  ;;  %v613_v55 = vpop.f32.mrf.mxu3 }
 0x2aa   : > { %2054 = vmatpush.bf16.xpose.msra.mxu3 %v2024_v40  ;;  %v2400_v27 = vsel %vm518_vm0, %v2358_v41, 0  ;;  %v6178_v43 = vmul.f32 0.25, %v613_v55 }
 0x2ab   : > { %1683 = vmatpush.bf16.xpose.msra.mxu1 %v1657_v9  ;;  %v8294_v9 = vld [vmem:[#allocation33_spill] sm:$0xff] }
 0x2ac   : > { %4246 = vmatmul.msk.bf16.gmra.mxu1 %vm518_vm0, %v8285_v22  ;;  %v6137_v50 = vpop.permute.xlu0 %2278 }
 0x2b1   : > { %4255 = vmatmul.msk.bf16.gmra.mxu3 %vm518_vm0, %v5894_v48  ;;  %v2406_v48 = vsel %vm518_vm0, %v2362_v45, 0  ;;  %v6187_v32 = vpop.permute.xlu2 %2343 }
 0x2b3   : > { %1684 = vmatpush.bf16.xpose.msra.mxu1 %v1654_v34  ;;  %v6180_v34 = vpop.permute.xlu1 %2349 }
 0x2b4   : > { %v6142_v28 = vpop.permute.xlu0 %2339  ;;  %8295 = vst [vmem:[#allocation36_spill] sm:$0xff] %v6180_v34 }
 0x2b9   : > { %v6201_v41 = vpop.permute.xlu2 %2347 }
 0x2bb   : > { %2417 = vmatpush.bf16.xpose.msrb.mxu1 %v2415_v13  ;;  %v8296_v13 = vld [vmem:[#allocation39_spill] sm:$0xff] }
 0x2bc   : > { %4247 = vmatmul.msk.bf16.gmra.mxu1 %vm518_vm0, %v8287_v42  ;;  %v2356_v24 = vpop.permute.xlu0 %2355 }
 0x2bd   : > { %v2397_v2 = vsel %vm518_vm0, %v2356_v24, 0 }
 0x2c1   : > { %4256 = vmatmul.msk.bf16.gmra.mxu3 %vm518_vm0, %v8288_v6  ;;  %v637_v6 = vpop.xlane.xlu1 %636 }
 0x2c3   : > { %2418 = vmatpush.bf16.xpose.msrb.mxu1 %v2412_v59 }
 0x2c4   : > { %v2354_v21 = vpop.permute.xlu0 %2353 }
 0x2c5   : > { %v2394_v60 = vsel %vm518_vm0, %v2354_v21, 0 }
 0x2cb   : > { %2419 = vmatpush.bf16.xpose.msrb.mxu1 %v2409_v49 }
 0x2cc   : > { %4248 = vmatmul.msk.bf16.gmra.mxu1 %vm518_vm0, %v8289_v56  ;;  %v6160_v5 = vpop.permute.xlu0 %2351  ;;  %v8297_v56 = vld [vmem:[#allocation38_spill] sm:$0xff] }
 0x2cd   : > { %8292 = vst [vmem:[#allocation41_spill] sm:$0xff] %v6160_v5 }
 0x2d1   : > { %4257 = vmatmul.msk.bf16.gmra.mxu3 %vm518_vm0, %v8290_v15 }
 0x2d3   : > { %2420 = vmatpush.bf16.xpose.msrb.mxu1 %v2406_v48 }
 0x2d4   : > { %v633_v46 = vpop.xlane.xlu0 %632 }
 0x2d5   : > { %v664_v59 = vsub.f32 %v6012_v47, %v633_v46  ;;  %v666_v47 = vsub.f32 %v5979_v26, %v637_v6  ;;  %v639_v46 = vpop.xlane.xlu1 %638 }
 0x2d7   : > { %v680_v42 = vmul.f32 1.442695, %v664_v59  ;;  %v684_v24 = vmul.f32 1.442695, %v666_v47 }
 0x2db   : > { %2421 = vmatpush.bf16.xpose.msrb.mxu1 %v2403_v4 }
 0x2dc   : > { %4249 = vmatmul.msk.bf16.gmra.mxu1 %vm518_vm0, %v8291_v44  ;;  %v635_v57 = vpop.xlane.xlu0 %634 }
 0x2e1   : > { %4258 = vmatmul.msk.bf16.gmra.mxu3 %vm518_vm0, %v6053_v19 }
 0x2e3   : > { %2422 = vmatpush.bf16.xpose.msrb.mxu1 %v2400_v27 }
 0x2eb   : > { %2423 = vmatpush.bf16.xpose.msrb.mxu1 %v2397_v2  ;;  %v8298_v2 = vld [vmem:[#allocation44_spill] sm:$0xff] }
 0x2ec   : > { %4250 = vmatmul.msk.bf16.gmra.mxu1 %vm518_vm0, %v6036_v52  ;;  %v665_v52 = vsub.f32 %v6022_v37, %v635_v57 }
 0x2ee   : > { %v682_v61 = vmul.f32 1.442695, %v665_v52 }
 0x2f0   : > { %4665 = vpow2.f32 %v682_v61 }
 0x2f1   : > { %4267 = vmatmul.msk.bf16.vlgmr.msra.gmra.mxu3 %vm518_vm0, %v8293_v0  ;;  %4667 = vpow2.f32 %v680_v42 }
 0x2f2   : > { %4669 = vpow2.f32 %v684_v24  ;;  %v8301_v24 = vld [vmem:[#allocation46_spill] sm:$0xff] }
 0x2f3   : > { %2424 = vmatpush.bf16.xpose.msrb.mxu1 %v2394_v60  ;;  %v641_v60 = vpop.xlane.xlu2 %640 }
 0x2f4   : > { %v1316_v25 = vpop.f32.mrf.mxu3  ;;  %v668_v57 = vsub.f32 %v5995_v1, %v641_v60 }
 0x2f5   : > { %v6191_v48 = vmul.f32 0.25, %v1316_v25 }
 0x2f6   : > { %v6193_v7 = vpop.eup %4665  ;;  %v688_v52 = vmul.f32 1.442695, %v668_v57 }
 0x2f7   : > { %v6205_v44 = vpop.eup %4667 }
 0x2f8   : > { %v6215_v25 = vpop.eup %4669  ;;  %4671 = vpow2.f32 %v688_v52 }
 0x2f9   : > { %v938_v19 = vpop.f32.mrf.mxu1 }
 0x2fa   : > { %v6170_v20 = vmul.f32 0.25, %v938_v19  ;;  %v8299_v19 = vld [vmem:[#allocation40_spill] sm:$0xff] }
 0x2fb   : > { %v643_v42 = vpop.xlane.xlu2 %642 }
 0x2fc   : > { %994 = vmax.xlane.f32.xlu0 %v6170_v20  ;;  %4259 = vmatmul.msk.bf16.vlgmr.msra.gmra.mxu1 %vm518_vm0, %v8294_v9  ;;  %v1318_v58 = vpop.f32.mrf.mxu3  ;;  %v667_v9 = vsub.f32 %v5985_v16, %v639_v46  ;;  %v669_v16 = vsub.f32 %v6006_v3, %v643_v42 }
 0x2fd   : > { %v6213_v0 = vmul.f32 0.25, %v1318_v58 }
 0x2fe   : > { %v686_v61 = vmul.f32 1.442695, %v667_v9  ;;  %v6238_v47 = vpop.eup %4671 }
 0x300   : > { %4673 = vpow2.f32 %v686_v61 }
 0x301   : > { %v940_v40 = vpop.f32.mrf.mxu1  ;;  %4268 = vmatmul.msk.bf16.gmra.mxu3 %vm518_vm0, %v8296_v13 }
 0x302   : > { %v6176_v22 = vmul.f32 0.25, %v940_v40 }
 0x304   : > { %996 = vmax.xlane.f32.xlu2 %v6176_v22  ;;  %662 = vmax.xlane.f32.xlu0 %v6178_v43  ;;  %v1321_v37 = vpop.f32.mrf.mxu3 }
 0x305   : > { %v6224_v58 = vmul.f32 0.25, %v1321_v37  ;;  %v690_v37 = vmul.f32 1.442695, %v669_v16 }
 0x307   : > { %4675 = vpow2.f32 %v690_v37 }
 0x309   : > { %v943_v49 = vpop.f32.mrf.mxu1 }
 0x30a   : > { %v6189_v45 = vmul.f32 0.25, %v943_v49  ;;  %v8300_v49 = vld [vmem:[#allocation45_spill] sm:$0xff] }
 0x30c   : > { %998 = vmax.xlane.f32.xlu1 %v6189_v45  ;;  %4260 = vmatmul.msk.bf16.gmra.mxu1 %vm518_vm0, %v8297_v56  ;;  %v1323_v4 = vpop.f32.mrf.mxu3 }
 0x30d   : > { %714 = vadd.xlane.f32.xlu2 %v6193_v7  ;;  %1372 = vmax.xlane.f32.xlu0 %v6191_v48  ;;  %v6230_v6 = vmul.f32 0.25, %v1323_v4 }
 0x311   : > { %v945_v15 = vpop.f32.mrf.mxu1  ;;  %4269 = vmatmul.msk.bf16.gmra.mxu3 %vm518_vm0, %v8298_v2  ;;  %v647_v2 = vpop.xlane.xlu1 %646 }
 0x312   : > { %v6203_v27 = vmul.f32 0.25, %v945_v15  ;;  %v6240_v15 = vpop.eup %4673  ;;  %v671_v9 = vsub.f32 %v6031_v29, %v647_v2 }
 0x313   : > { %v6253_v57 = vpop.eup %4675 }
 0x314   : > { %712 = vadd.xlane.f32.xlu1 %v6205_v44  ;;  %v1326_v21 = vpop.f32.mrf.mxu3  ;;  %v694_v61 = vmul.f32 1.442695, %v671_v9 }
 0x315   : > { %1000 = vmax.xlane.f32.xlu0 %v6203_v27  ;;  %v6249_v46 = vmul.f32 0.25, %v1326_v21 }
 0x316   : > { %4677 = vpow2.f32 %v694_v61 }
 0x319   : > { %v948_v26 = vpop.f32.mrf.mxu1  ;;  %v653_v9 = vpop.xlane.xlu1 %652 }
 0x31a   : > { %v6211_v55 = vmul.f32 0.25, %v948_v26  ;;  %v645_v26 = vpop.xlane.xlu0 %644 }
 0x31b   : > { %v670_v52 = vsub.f32 %v6034_v11, %v645_v26  ;;  %v8305_v26 = vld [vmem:[#allocation54_spill] sm:$0xff] }
 0x31c   : > { %4261 = vmatmul.msk.bf16.gmra.mxu1 %vm518_vm0, %v8299_v19  ;;  %1002 = vmax.xlane.f32.xlu2 %v6211_v55  ;;  %v1328_v13 = vpop.f32.mrf.mxu3  ;;  %v8302_v19 = vld [vmem:[#allocation53_spill] sm:$0xff] }
 0x31d   : > { %1374 = vmax.xlane.f32.xlu1 %v6213_v0  ;;  %716 = vadd.xlane.f32.xlu0 %v6215_v25  ;;  %v692_v21 = vmul.f32 1.442695, %v670_v52 }
 0x31f   : > { %4679 = vpow2.f32 %v692_v21 }
 0x321   : > { %v950_v40 = vpop.f32.mrf.mxu1  ;;  %4270 = vmatmul.msk.bf16.gmra.mxu3 %vm518_vm0, %v8300_v49  ;;  %v6260_v49 = vmul.f32 0.25, %v1328_v13 }
 0x322   : > { %v6226_v59 = vmul.f32 0.25, %v950_v40 }
 0x324   : > { %1376 = vmax.xlane.f32.xlu2 %v6224_v58  ;;  %v1331_v4 = vpop.f32.mrf.mxu3 }
 0x325   : > { %1004 = vmax.xlane.f32.xlu1 %v6226_v59  ;;  %1378 = vmax.xlane.f32.xlu0 %v6230_v6  ;;  %v6264_v37 = vmul.f32 0.25, %v1331_v4  ;;  %v6274_v4 = vpop.eup %4677 }
 0x327   : > { %8303 = vst [vmem:[#allocation43_spill] sm:$0xff] %v6264_v37 }
 0x329   : > { %v953_v1 = vpop.f32.mrf.mxu1 }
 0x32a   : > { %v6236_v56 = vmul.f32 0.25, %v953_v1  ;;  %v649_v1 = vpop.xlane.xlu2 %648 }
 0x32b   : > { %v672_v29 = vsub.f32 %v6046_v63, %v649_v1 }
 0x32c   : > { %4262 = vmatmul.msk.bf16.gmra.mxu1 %vm518_vm0, %v8301_v24  ;;  %720 = vadd.xlane.f32.xlu2 %v6238_v47  ;;  %v1333_v40 = vpop.f32.mrf.mxu3  ;;  %v8304_v24 = vld [vmem:[#allocation51_spill] sm:$0xff] }
 0x32d   : > { %718 = vadd.xlane.f32.xlu1 %v6240_v15  ;;  %1006 = vmax.xlane.f32.xlu0 %v6236_v56  ;;  %v6285_v21 = vmul.f32 0.25, %v1333_v40 }
 0x331   : > { %v955_v3 = vpop.f32.mrf.mxu1  ;;  %4271 = vmatmul.msk.bf16.gmra.mxu3 %vm518_vm0, %v8302_v19  ;;  %v6278_v19 = vpop.eup %4679 }
 0x332   : > { %v6247_v60 = vmul.f32 0.25, %v955_v3  ;;  %v696_v3 = vmul.f32 1.442695, %v672_v29  ;;  %v674_v29 = vsub.f32 %v6070_v18, %v653_v9  ;;  %v655_v34 = vpop.xlane.xlu2 %654 }
 0x334   : > { %1008 = vmax.xlane.f32.xlu2 %v6247_v60  ;;  %v1336_v11 = vpop.f32.mrf.mxu3  ;;  %4681 = vpow2.f32 %v696_v3  ;;  %v700_v3 = vmul.f32 1.442695, %v674_v29 }
 0x335   : > { %1380 = vmax.xlane.f32.xlu1 %v6249_v46  ;;  %722 = vadd.xlane.f32.xlu0 %v6253_v57  ;;  %v6296_v40 = vmul.f32 0.25, %v1336_v11 }
 0x336   : > { %4683 = vpow2.f32 %v700_v3 }
 0x339   : > { %v958_v42 = vpop.f32.mrf.mxu1 }
 0x33a   : > { %v6262_v16 = vmul.f32 0.25, %v958_v42  ;;  %v651_v42 = vpop.xlane.xlu0 %650  ;;  %v6287_v1 = vpop.eup %4681 }
 0x33c   : > { %4263 = vmatmul.msk.bf16.gmra.mxu1 %vm518_vm0, %v8304_v24  ;;  %1382 = vmax.xlane.f32.xlu2 %v6260_v49  ;;  %v1338_v52 = vpop.f32.mrf.mxu3  ;;  %v8306_v24 = vld [vmem:[#allocation50_spill] sm:$0xff] }
 0x33d   : > { %1010 = vmax.xlane.f32.xlu1 %v6262_v16  ;;  %1384 = vmax.xlane.f32.xlu0 %v6264_v37  ;;  %v6300_v37 = vmul.f32 0.25, %v1338_v52  ;;  %v6310_v52 = vpop.eup %4683 }
 0x33e   : > { %8310 = vst [vmem:[#allocation52_spill] sm:$0xff] %v6310_v52 }
 0x33f   : > { %8307 = vst [vmem:[#allocation26_spill] sm:$0xff] %v6300_v37 }
 0x341   : > { %v960_v13 = vpop.f32.mrf.mxu1  ;;  %4272 = vmatmul.msk.bf16.gmra.mxu3 %vm518_vm0, %v8305_v26 }
 0x342   : > { %v6272_v2 = vmul.f32 0.25, %v960_v13  ;;  %v673_v13 = vsub.f32 %v6062_v35, %v651_v42  ;;  %v675_v35 = vsub.f32 %v6084_v54, %v655_v34  ;;  %v659_v34 = vpop.xlane.xlu1 %658 }
 0x344   : > { %726 = vadd.xlane.f32.xlu2 %v6274_v4  ;;  %v1341_v18 = vpop.f32.mrf.mxu3  ;;  %v702_v9 = vmul.f32 1.442695, %v675_v35 }
 0x345   : > { %724 = vadd.xlane.f32.xlu1 %v6278_v19  ;;  %1012 = vmax.xlane.f32.xlu0 %v6272_v2 }
 0x349   : > { %v963_v63 = vpop.f32.mrf.mxu1 }
 0x34a   : > { %v6283_v61 = vmul.f32 0.25, %v963_v63  ;;  %v698_v63 = vmul.f32 1.442695, %v673_v13  ;;  %v8311_v13 = vld [vmem:[#allocation58_spill] sm:$0xff] }
 0x34c   : > { %4264 = vmatmul.msk.bf16.gmra.mxu1 %vm518_vm0, %v8306_v24  ;;  %1014 = vmax.xlane.f32.xlu2 %v6283_v61  ;;  %v8308_v24 = vld [vmem:[#allocation57_spill] sm:$0xff]  ;;  %4685 = vpow2.f32 %v698_v63  ;;  %v1343_v3 = vpop.f32.mrf.mxu3  ;;  %v657_v63 = vpop.xlane.xlu0 %656 }
 0x34d   : > { %1386 = vmax.xlane.f32.xlu1 %v6285_v21  ;;  %728 = vadd.xlane.f32.xlu0 %v6287_v1  ;;  %4687 = vpow2.f32 %v702_v9  ;;  %v676_v9 = vsub.f32 %v6091_v36, %v657_v63  ;;  %v661_v36 = vpop.xlane.xlu2 %660 }
 0x351   : > { %v965_v26 = vpop.f32.mrf.mxu1  ;;  %4273 = vmatmul.msk.bf16.gmra.mxu3 %vm518_vm0, %v8308_v24  ;;  %v6321_v24 = vmul.f32 0.25, %v1341_v18  ;;  %v704_v18 = vmul.f32 1.442695, %v676_v9 }
 0x352   : > { %v6298_v5 = vmul.f32 0.25, %v965_v26  ;;  %v6312_v29 = vpop.eup %4685 }
 0x353   : > { %v6325_v35 = vpop.eup %4687 }
 0x354   : > { %1388 = vmax.xlane.f32.xlu2 %v6296_v40 }
 0x355   : > { %1016 = vmax.xlane.f32.xlu1 %v6298_v5  ;;  %1390 = vmax.xlane.f32.xlu0 %v6300_v37 }
 0x359   : > { %v968_v11 = vpop.f32.mrf.mxu1 }
 0x35a   : > { %v6308_v42 = vmul.f32 0.25, %v968_v11  ;;  %v677_v11 = vsub.f32 %v6104_v53, %v659_v34 }
 0x35c   : > { %8309 = vst [vmem:[#allocation48_spill] sm:$0xff] %v6308_v42  ;;  %4265 = vmatmul.msk.bf16.gmra.mxu1 %vm518_vm0, %v8311_v13  ;;  %732 = vadd.xlane.f32.xlu2 %v6310_v52  ;;  %v1346_v13 = vpop.f32.mrf.mxu3  ;;  %v6332_v52 = vmul.f32 0.25, %v1343_v3 }
 0x35d   : > { %730 = vadd.xlane.f32.xlu1 %v6312_v29  ;;  %1018 = vmax.xlane.f32.xlu0 %v6308_v42 }
 0x361   : > { %v970_v54 = vpop.f32.mrf.mxu1  ;;  %4274 = vmatmul.msk.bf16.gmra.mxu3 %vm518_vm0, %v6086_v8  ;;  %v6336_v8 = vmul.f32 0.25, %v1346_v13  ;;  %v678_v13 = vsub.f32 %v6113_v38, %v661_v36 }
 0x362   : > { %v6319_v26 = vmul.f32 0.25, %v970_v54  ;;  %v706_v54 = vmul.f32 1.442695, %v677_v11 }
 0x363   : > { %8313 = vst [vmem:[#allocation55_spill] sm:$0xff] %v6336_v8 }
 0x364   : > { %1020 = vmax.xlane.f32.xlu2 %v6319_v26  ;;  %4689 = vpow2.f32 %v706_v54 }
 0x365   : > { %1392 = vmax.xlane.f32.xlu1 %v6321_v24  ;;  %734 = vadd.xlane.f32.xlu0 %v6325_v35  ;;  %4691 = vpow2.f32 %v704_v18 }
 0x369   : > { %v973_v37 = vpop.f32.mrf.mxu1 }
 0x36a   : > { %v6334_v42 = vmul.f32 0.25, %v973_v37  ;;  %v6346_v11 = vpop.eup %4689 }
 0x36b   : > { %v6348_v9 = vpop.eup %4691 }
 0x36c   : > { %8312 = vst [vmem:[#allocation49_spill] sm:$0xff] %v6334_v42  ;;  %4266 = vmatmul.msk.bf16.gmra.mxu1 %vm518_vm0, %v6068_v14  ;;  %1394 = vmax.xlane.f32.xlu2 %v6332_v52  ;;  %v1348_v14 = vpop.f32.mrf.mxu3 }
 0x36d   : > { %1022 = vmax.xlane.f32.xlu1 %v6334_v42  ;;  %1396 = vmax.xlane.f32.xlu0 %v6336_v8 }
 0x36f   : > { %v995_v53 = vpop.xlane.xlu0 %994 }
 0x370   : > { %v1026_v3 = vsub.f32 %v6170_v20, %v995_v53 }
 0x371   : > { %v975_v34 = vpop.f32.mrf.mxu1 }
 0x372   : > { %v1042_v37 = vmul.f32 1.442695, %v1026_v3  ;;  %v6344_v63 = vmul.f32 0.25, %v975_v34  ;;  %v708_v34 = vmul.f32 1.442695, %v678_v13 }
 0x374   : > { %8314 = vst [vmem:[#allocation56_spill] sm:$0xff] %v6344_v63  ;;  %4693 = vpow2.f32 %v1042_v37  ;;  %738 = vadd.xlane.f32.xlu2 %v6346_v11  ;;  %v6359_v37 = vmul.f32 0.25, %v1348_v14 }
 0x375   : > { %736 = vadd.xlane.f32.xlu1 %v6348_v9  ;;  %1024 = vmax.xlane.f32.xlu0 %v6344_v63 }
 0x376   : > { %8317 = vst [vmem:[#allocation39_spill] sm:$0xff] %v6359_v37 }
 0x377   : > { %v997_v54 = vpop.xlane.xlu2 %996  ;;  %v663_v20 = vpop.xlane.xlu0 %662 }
 0x378   : > { %v1027_v18 = vsub.f32 %v6176_v22, %v997_v54  ;;  %v679_v38 = vsub.f32 %v6178_v43, %v663_v20  ;;  %v1351_v22 = vpop.f32.mrf.mxu3 }
 0x379   : > { %v1686_v53 = vpop.f32.mrf.mxu1 }
 0x37a   : > { %v6355_v3 = vpop.eup %4693  ;;  %v1044_v8 = vmul.f32 1.442695, %v1027_v18  ;;  %v6357_v42 = vmul.f32 0.25, %v1686_v53  ;;  %v710_v54 = vmul.f32 1.442695, %v679_v38 }
 0x37b   : > { %8315 = vst [vmem:[#allocation30_spill] sm:$0xff] %v6355_v3 }
 0x37c   : > { %8316 = vst [vmem:[#allocation33_spill] sm:$0xff] %v6357_v42  ;;  %4695 = vpow2.f32 %v1044_v8  ;;  %4275 = vmatmul.msk.bf16.vlgmr.msrb.gmra.mxu1 %vm518_vm0, %v6157_v51  ;;  %1074 = vadd.xlane.f32.xlu2 %v6355_v3  ;;  %v6369_v8 = vmul.f32 0.25, %v1351_v22 }
 0x37d   : > { %1398 = vmax.xlane.f32.xlu1 %v6359_v37  ;;  %1742 = vmax.xlane.f32.xlu0 %v6357_v42  ;;  %4697 = vpow2.f32 %v708_v34 }
 0x37e   : > { %8319 = vst [vmem:[#allocation44_spill] sm:$0xff] %v6369_v8  ;;  %4699 = vpow2.f32 %v710_v54 }
 0x37f   : > { %v999_v36 = vpop.xlane.xlu1 %998 }
 0x380   : > { %v1373_v13 = vpop.xlane.xlu0 %1372  ;;  %v715_v53 = vpop.xlane.xlu2 %714  ;;  %v1028_v43 = vsub.f32 %v6189_v45, %v999_v36 }
 0x381   : > { %v1688_v18 = vpop.f32.mrf.mxu1  ;;  %4701 = vrcp.f32 %v715_v53  ;;  %v1353_v34 = vpop.f32.mrf.mxu3 }
 0x382   : > { %v6367_v14 = vpop.eup %4695  ;;  %v1046_v37 = vmul.f32 1.442695, %v1028_v43  ;;  %v6378_v63 = vmul.f32 0.25, %v1688_v18  ;;  %v6382_v54 = vmul.f32 0.25, %v1353_v34 }
 0x383   : > { %8318 = vst [vmem:[#allocation38_spill] sm:$0xff] %v6367_v14  ;;  %v6371_v51 = vpop.eup %4697 }
 0x384   : > { %1400 = vmax.xlane.f32.xlu2 %v6369_v8  ;;  %8320 = vst [vmem:[#allocation40_spill] sm:$0xff] %v6378_v63  ;;  %v6380_v3 = vpop.eup %4699 }
 0x385   : > { %1076 = vadd.xlane.f32.xlu1 %v6367_v14  ;;  %740 = vadd.xlane.f32.xlu0 %v6371_v51  ;;  %8321 = vst [vmem:[#allocation45_spill] sm:$0xff] %v6382_v54 }
 0x387   : > { %v713_v20 = vpop.xlane.xlu1 %712  ;;  %v4702_v14 = vpop.eup %4701 }
 0x388   : > { %4703 = vrcp.f32 %v713_v20  ;;  %v1001_v38 = vpop.xlane.xlu0 %1000  ;;  %v761_v53 = vmul.f32 %v4702_v14, %v6193_v7 }
 0x389   : > { %v1029_v22 = vsub.f32 %v6203_v27, %v1001_v38  ;;  %v1691_v42 = vpop.f32.mrf.mxu1  ;;  %v1404_v27 = vsub.f32 %v6191_v48, %v1373_v13  ;;  %v2056_v48 = vpop.f32.mrf.mxu3 }
 0x38a   : > { %v6408_v14 = vmul.f32 0.25, %v2056_v48 }
 0x38b   : > { %v1048_v8 = vmul.f32 1.442695, %v1029_v22 }
 0x38c   : > { %4276 = vmatmul.msk.bf16.gmra.mxu1 %vm518_vm0, %v6142_v28  ;;  %1744 = vmax.xlane.f32.xlu2 %v6378_v63 }
 0x38d   : > { %4705 = vpow2.f32 %v1048_v8  ;;  %1402 = vmax.xlane.f32.xlu0 %v6382_v54  ;;  %742 = vadd.xlane.f32.xlu1 %v6380_v3  ;;  %v1420_v8 = vmul.f32 1.442695, %v1404_v27  ;;  %v6395_v54 = vmul.f32 0.25, %v1691_v42 }
 0x38e   : > { %v4704_v45 = vpop.eup %4703  ;;  %4707 = vpow2.f32 %v1046_v37 }
 0x38f   : > { %v1003_v36 = vpop.xlane.xlu2 %1002  ;;  %v760_v18 = vmul.f32 %v4704_v45, %v6205_v44 }
 0x390   : > { %v1375_v43 = vpop.xlane.xlu1 %1374  ;;  %v717_v20 = vpop.xlane.xlu0 %716  ;;  %v1030_v45 = vsub.f32 %v6211_v55, %v1003_v36 }
 0x391   : > { %v1405_v28 = vsub.f32 %v6213_v0, %v1375_v43  ;;  %v1693_v34 = vpop.f32.mrf.mxu1  ;;  %v776_v38 = vpack.c.bf16 %v761_v53, %v760_v18 }
 0x393   : > { %v6393_v22 = vpop.eup %4705  ;;  %v1422_v63 = vmul.f32 1.442695, %v1405_v28  ;;  %792 = vmatmul.bf16.vlgmr.msrb.gmra.mxu0 %v776_v38  ;;  %v1050_v28 = vmul.f32 1.442695, %v1030_v45  ;;  %v6423_v38 = vmul.f32 0.25, %v1693_v34 }
 0x394   : > { %v6397_v37 = vpop.eup %4707  ;;  %2288 = vmatpush.bf16.msrb.mxu0 %v6137_v50  ;;  %1080 = vadd.xlane.f32.xlu2 %v6393_v22 }
 0x395   : > { %4709 = vpow2.f32 %v1422_v63  ;;  %1078 = vadd.xlane.f32.xlu0 %v6397_v37  ;;  %1746 = vmax.xlane.f32.xlu1 %v6395_v54  ;;  %v2058_v63 = vpop.f32.mrf.mxu3 }
 0x396   : > { %4711 = vpow2.f32 %v1420_v8  ;;  %v6421_v43 = vmul.f32 0.25, %v2058_v63 }
 0x397   : > { %v1377_v7 = vpop.xlane.xlu2 %1376  ;;  %4713 = vrcp.f32 %v717_v20 }
 0x398   : > { %2289 = vmatpush.bf16.msrb.mxu0 %v6150_v12  ;;  %v1005_v44 = vpop.xlane.xlu1 %1004  ;;  %v6404_v0 = vpop.xlane.xlu0 %1378  ;;  %v1406_v12 = vsub.f32 %v6224_v58, %v1377_v7 }
 0x399   : > { %v1696_v42 = vpop.f32.mrf.mxu1  ;;  %v1031_v58 = vsub.f32 %v6226_v59, %v1005_v44 }
 0x39a   : > { %v6426_v8 = vmul.f32 0.25, %v1696_v42 }
 0x39b   : > { %v6406_v13 = vpop.eup %4709  ;;  %v1052_v34 = vmul.f32 1.442695, %v1031_v58 }
 0x39c   : > { %v6410_v50 = vpop.eup %4711  ;;  %2290 = vmatpush.bf16.msrb.mxu0 %v6132_v17  ;;  %4277 = vmatmul.msk.bf16.gmra.mxu1 %vm518_vm0, %v6164_v39  ;;  %v1424_v39 = vmul.f32 1.442695, %v1406_v12 }
 0x39d   : > { %2112 = vmax.xlane.f32.xlu0 %v6408_v14  ;;  %1452 = vadd.xlane.f32.xlu1 %v6410_v50  ;;  %v4714_v55 = vpop.eup %4713  ;;  %v2061_v44 = vpop.f32.mrf.mxu3 }
 0x39e   : > { %1454 = vadd.xlane.f32.xlu2 %v6406_v13 }
 0x39f   : > { %v721_v27 = vpop.xlane.xlu2 %720 }
 0x3a0   : > { %2291 = vmatpush.bf16.msrb.mxu0 %v6129_v31  ;;  %v719_v18 = vpop.xlane.xlu1 %718  ;;  %v1007_v17 = vpop.xlane.xlu0 %1006 }
 0x3a1   : > { %4715 = vrcp.f32 %v719_v18  ;;  %v1698_v53 = vpop.f32.mrf.mxu1  ;;  %v1032_v36 = vsub.f32 %v6236_v56, %v1007_v17  ;;  %v6440_v18 = vmul.f32 0.25, %v2061_v44 }
 0x3a2   : > { %4717 = vpow2.f32 %v1424_v39 }
 0x3a3   : > { %4719 = vpow2.f32 %v1050_v28  ;;  %v1054_v63 = vmul.f32 1.442695, %v1032_v36 }
 0x3a4   : > { %2292 = vmatpush.bf16.msrb.mxu0 %v6122_v23  ;;  %v762_v23 = vmul.f32 %v4714_v55, %v6215_v25  ;;  %4721 = vpow2.f32 %v1052_v34  ;;  %v1407_v25 = vsub.f32 %v6230_v6, %v6404_v0 }
 0x3a5   : > { %1748 = vmax.xlane.f32.xlu0 %v6423_v38  ;;  %2114 = vmax.xlane.f32.xlu1 %v6421_v43 }
 0x3a6   : > { %1750 = vmax.xlane.f32.xlu2 %v6426_v8  ;;  %v1426_v28 = vmul.f32 1.442695, %v1407_v25 }
 0x3a7   : > { %v4716_v31 = vpop.eup %4715  ;;  %v6433_v20 = vpop.xlane.xlu2 %1008 }
 0x3a8   : > { %2293 = vmatpush.bf16.msrb.mxu0 %v6109_v10  ;;  %v1381_v59 = vpop.xlane.xlu1 %1380  ;;  %v723_v48 = vpop.xlane.xlu0 %722  ;;  %v763_v7 = vmul.f32 %v4716_v31, %v6240_v15 }
 0x3a9   : > { %v1701_v42 = vpop.f32.mrf.mxu1  ;;  %v6438_v45 = vpop.eup %4717  ;;  %4723 = vrcp.f32 %v723_v48  ;;  %v1408_v56 = vsub.f32 %v6249_v46, %v1381_v59 }
 0x3aa   : > { %v777_v12 = vpack.c.bf16 %v763_v7, %v762_v23  ;;  %v6444_v10 = vpop.eup %4719  ;;  %4725 = vrcp.f32 %v721_v27  ;;  %v6458_v27 = vmul.f32 0.25, %v1698_v53  ;;  %v2063_v31 = vpop.f32.mrf.mxu3 }
 0x3ab   : > { %4727 = vpow2.f32 %v1054_v63  ;;  %v6456_v39 = vpop.eup %4721  ;;  %v1428_v6 = vmul.f32 1.442695, %v1408_v56  ;;  %v6469_v23 = vmul.f32 0.25, %v2063_v31 }
 0x3ac   : > { %797 = vmatmul.bf16.gmra.mxu0 %v777_v12  ;;  %4278 = vmatmul.msk.bf16.gmra.mxu1 %vm518_vm0, %v6187_v32  ;;  %4729 = vpow2.f32 %v1426_v28  ;;  %v1033_v12 = vsub.f32 %v6247_v60, %v6433_v20 }
 0x3ad   : > { %2294 = vmatpush.bf16.msrb.mxu0 %v6008_v33  ;;  %1456 = vadd.xlane.f32.xlu0 %v6438_v45  ;;  %4731 = vpow2.f32 %v1428_v6 }
 0x3ae   : > { %1082 = vadd.xlane.f32.xlu1 %v6444_v10  ;;  %2116 = vmax.xlane.f32.xlu2 %v6440_v18  ;;  %v1056_v6 = vmul.f32 1.442695, %v1033_v12 }
 0x3af   : > { %v1383_v15 = vpop.xlane.xlu2 %1382  ;;  %v4724_v58 = vpop.eup %4723 }
 0x3b0   : > { %v1011_v32 = vpop.xlane.xlu1 %1010  ;;  %v6453_v17 = vpop.xlane.xlu0 %1384 }
 0x3b1   : > { %2295 = vmatpush.bf16.msrb.mxu0 %v6107_v62  ;;  %v1703_v33 = vpop.f32.mrf.mxu1  ;;  %v4726_v0 = vpop.eup %4725  ;;  %v765_v62 = vmul.f32 %v4724_v58, %v6253_v57  ;;  %v1409_v57 = vsub.f32 %v6260_v49, %v1383_v15 }
 0x3b2   : > { %v6460_v55 = vpop.eup %4727  ;;  %v764_v59 = vmul.f32 %v4726_v0, %v6238_v47  ;;  %v2066_v47 = vpop.f32.mrf.mxu3  ;;  %v6485_v0 = vmul.f32 0.25, %v1701_v42  ;;  %v6491_v15 = vmul.f32 0.25, %v1703_v33 }
 0x3b3   : > { %v6471_v7 = vpop.eup %4729  ;;  %v1430_v28 = vmul.f32 1.442695, %v1409_v57  ;;  %v6489_v49 = vmul.f32 0.25, %v2066_v47 }
 0x3b4   : > { %v778_v48 = vpack.c.bf16 %v765_v62, %v764_v59  ;;  %v6475_v44 = vpop.eup %4731  ;;  %v1034_v62 = vsub.f32 %v6262_v16, %v1011_v32 }
 0x3b5   : > { %1084 = vadd.xlane.f32.xlu0 %v6456_v39 }
 0x3b6   : > { %1752 = vmax.xlane.f32.xlu1 %v6458_v27  ;;  %1086 = vadd.xlane.f32.xlu2 %v6460_v55  ;;  %v1058_v32 = vmul.f32 1.442695, %v1034_v62 }
 0x3b7   : > { %v727_v46 = vpop.xlane.xlu2 %726 }
 0x3b8   : > { %v725_v36 = vpop.xlane.xlu1 %724  ;;  %v1013_v34 = vpop.xlane.xlu0 %1012  ;;  %4733 = vrcp.f32 %v727_v46 }
 0x3b9   : > { %v6467_v53 = vpop.f32.mrf.mxu1  ;;  %4735 = vrcp.f32 %v725_v36  ;;  %v1035_v60 = vsub.f32 %v6272_v2, %v1013_v34  ;;  %v8322_v34 = vld [vmem:[#allocation43_spill] sm:$0xff] }
 0x3ba   : > { %4737 = vpow2.f32 %v1430_v28  ;;  %v2068_v16 = vpop.f32.mrf.mxu3  ;;  %v1410_v47 = vsub.f32 %v8322_v34, %v6453_v17  ;;  %v6523_v17 = vmul.f32 0.25, %v6467_v53 }
 0x3bb   : > { %4739 = vpow2.f32 %v1056_v6  ;;  %v1060_v59 = vmul.f32 1.442695, %v1035_v60  ;;  %v6506_v2 = vmul.f32 0.25, %v2068_v16 }
 0x3bc   : > { %802 = vmatmul.bf16.gmra.mxu0 %v778_v48  ;;  %4279 = vmatmul.msk.bf16.gmra.mxu1 %vm518_vm0, %v6168_v30  ;;  %4741 = vpow2.f32 %v1058_v32  ;;  %8323 = vst [vmem:[#allocation46_spill] sm:$0xff] %v6523_v17 }
 0x3bd   : > { %2118 = vmax.xlane.f32.xlu0 %v6469_v23  ;;  %4743 = vpow2.f32 %v1060_v59 }
 0x3be   : > { %1458 = vadd.xlane.f32.xlu1 %v6471_v7  ;;  %1460 = vadd.xlane.f32.xlu2 %v6475_v44  ;;  %v4734_v30 = vpop.eup %4733 }
 0x3bf   : > { %v6483_v63 = vpop.xlane.xlu2 %1014  ;;  %v4736_v58 = vpop.eup %4735  ;;  %v767_v42 = vmul.f32 %v4734_v30, %v6274_v4 }
 0x3c0   : > { %v1387_v25 = vpop.xlane.xlu1 %1386  ;;  %v729_v56 = vpop.xlane.xlu0 %728  ;;  %v766_v20 = vmul.f32 %v4736_v58, %v6278_v19  ;;  %v1432_v58 = vmul.f32 1.442695, %v1410_v47 }
 0x3c1   : > { %v6487_v31 = vpop.f32.mrf.mxu1  ;;  %v6504_v57 = vpop.eup %4737  ;;  %v1411_v12 = vsub.f32 %v6285_v21, %v1387_v25  ;;  %4745 = vrcp.f32 %v729_v56 }
 0x3c2   : > { %v779_v48 = vpack.c.bf16 %v767_v42, %v766_v20  ;;  %v6510_v19 = vpop.eup %4739  ;;  %v2071_v42 = vpop.f32.mrf.mxu3 }
 0x3c3   : > { %v6518_v6 = vpop.eup %4741  ;;  %v1434_v62 = vmul.f32 1.442695, %v1411_v12  ;;  %v6536_v34 = vmul.f32 0.25, %v2071_v42  ;;  %v8325_v12 = vld [vmem:[#allocation36_spill] sm:$0xff] }
 0x3c4   : > { %v6520_v60 = vpop.eup %4743 }
 0x3c5   : > { %1754 = vmax.xlane.f32.xlu0 %v6485_v0  ;;  %8324 = vst [vmem:[#allocation53_spill] sm:$0xff] %v6536_v34 }
 0x3c6   : > { %2120 = vmax.xlane.f32.xlu1 %v6489_v49  ;;  %1756 = vmax.xlane.f32.xlu2 %v6491_v15 }
 0x3c7   : > { %v1389_v46 = vpop.xlane.xlu2 %1388  ;;  %v4746_v20 = vpop.eup %4745 }
 0x3c8   : > { %v6500_v36 = vpop.xlane.xlu1 %1016  ;;  %v6502_v33 = vpop.xlane.xlu0 %1390  ;;  %v768_v53 = vmul.f32 %v4746_v20, %v6287_v1 }
 0x3c9   : > { %v1711_v4 = vpop.f32.mrf.mxu1 }
 0x3ca   : > { %v2073_v1 = vpop.f32.mrf.mxu3 }
 0x3cc   : > { %807 = vmatmul.bf16.gmra.mxu0 %v779_v48  ;;  %4280 = vmatmul.msk.bf16.gmra.mxu1 %vm518_vm0, %v6201_v41 }
 0x3cd   : > { %1462 = vadd.xlane.f32.xlu0 %v6504_v57 }
 0x3ce   : > { %1088 = vadd.xlane.f32.xlu1 %v6510_v19  ;;  %2122 = vmax.xlane.f32.xlu2 %v6506_v2 }
 0x3cf   : > { %v733_v30 = vpop.xlane.xlu2 %732 }
 0x3d0   : > { %v731_v28 = vpop.xlane.xlu1 %730  ;;  %v1019_v41 = vpop.xlane.xlu0 %1018 }
 0x3d1   : > { %4747 = vrcp.f32 %v731_v28  ;;  %v6528_v25 = vpop.f32.mrf.mxu1 }
 0x3d2   : > { %4749 = vpow2.f32 %v1432_v58  ;;  %v1412_v58 = vsub.f32 %v6296_v40, %v1389_v46  ;;  %v6559_v46 = vmul.f32 0.25, %v6487_v31  ;;  %v8329_v31 = vld [vmem:[#allocation48_spill] sm:$0xff] }
 0x3d3   : > { %4751 = vpow2.f32 %v1434_v62 }
 0x3d4   : > { %8327 = vst [vmem:[#allocation54_spill] sm:$0xff] %v6559_v46 }
 0x3d5   : > { %1090 = vadd.xlane.f32.xlu0 %v6518_v6 }
 0x3d6   : > { %1758 = vmax.xlane.f32.xlu1 %v6523_v17  ;;  %1092 = vadd.xlane.f32.xlu2 %v6520_v60 }
 0x3d7   : > { %v4748_v21 = vpop.eup %4747  ;;  %v6530_v56 = vpop.xlane.xlu2 %1020 }
 0x3d8   : > { %v6532_v16 = vpop.xlane.xlu1 %1392  ;;  %v735_v32 = vpop.xlane.xlu0 %734  ;;  %v769_v59 = vmul.f32 %v4748_v21, %v6312_v29  ;;  %v1036_v29 = vsub.f32 %v6283_v61, %v6483_v63  ;;  %v1037_v63 = vsub.f32 %v6298_v5, %v6500_v36 }
 0x3d9   : > { %v6538_v47 = vpop.eup %4749  ;;  %4753 = vrcp.f32 %v735_v32  ;;  %v6556_v21 = vpop.f32.mrf.mxu1  ;;  %v1436_v32 = vmul.f32 1.442695, %v1412_v58 }
 0x3da   : > { %v780_v48 = vpack.c.bf16 %v769_v59, %v768_v53  ;;  %v6542_v28 = vpop.eup %4751  ;;  %4755 = vrcp.f32 %v733_v30  ;;  %v1062_v40 = vmul.f32 1.442695, %v1036_v29  ;;  %v6561_v59 = vmul.f32 0.25, %v2073_v1  ;;  %v8330_v29 = vld [vmem:[#allocation52_spill] sm:$0xff] }
 0x3db   : > { %8326 = vst [vmem:[#allocation51_spill] sm:$0xff] %v6542_v28  ;;  %4757 = vpow2.f32 %v1436_v32  ;;  %v1064_v17 = vmul.f32 1.442695, %v1037_v63 }
 0x3dc   : > { %812 = vmatmul.bf16.gmra.mxu0 %v780_v48  ;;  %4281 = vmatmul.msk.bf16.gmra.mxu1 %vm518_vm0, %v8325_v12  ;;  %v6563_v48 = vmul.f32 0.25, %v1711_v4  ;;  %4759 = vpow2.f32 %v1062_v40  ;;  %v1038_v12 = vsub.f32 %v8329_v31, %v1019_v41 }
 0x3dd   : > { %2124 = vmax.xlane.f32.xlu0 %v6536_v34 }
 0x3de   : > { %1464 = vadd.xlane.f32.xlu1 %v6538_v47  ;;  %1466 = vadd.xlane.f32.xlu2 %v6542_v28  ;;  %8328 = vst [vmem:[#allocation50_spill] sm:$0xff] %v6563_v48  ;;  %v1066_v5 = vmul.f32 1.442695, %v1038_v12 }
 0x3df   : > { %v6550_v62 = vpop.xlane.xlu2 %1394  ;;  %v4754_v53 = vpop.eup %4753 }
 0x3e0   : > { %v6552_v20 = vpop.xlane.xlu1 %1022  ;;  %v6554_v42 = vpop.xlane.xlu0 %1396  ;;  %v771_v30 = vmul.f32 %v4754_v53, %v6325_v35  ;;  %v8331_v35 = vld [vmem:[#allocation41_spill] sm:$0xff]  ;;  %v8332_v53 = vld [vmem:[#allocation26_spill] sm:$0xff] }
 0x3e1   : > { %v4756_v61 = vpop.eup %4755  ;;  %v6575_v36 = vpop.f32.mrf.mxu1  ;;  %v1413_v40 = vsub.f32 %v8332_v53, %v6502_v33 }
 0x3e2   : > { %v770_v34 = vmul.f32 %v4756_v61, %v8330_v29  ;;  %v6577_v32 = vpop.eup %4757 }
 0x3e3   : > { %v6583_v41 = vpop.eup %4759  ;;  %v1438_v63 = vmul.f32 1.442695, %v1413_v40 }
 0x3e4   : > { %v781_v28 = vpack.c.bf16 %v771_v30, %v770_v34  ;;  %v1414_v34 = vsub.f32 %v6321_v24, %v6532_v16 }
 0x3e5   : > { %1760 = vmax.xlane.f32.xlu0 %v6559_v46  ;;  %v2076_v46 = vpop.f32.mrf.mxu3 }
 0x3e6   : > { %2126 = vmax.xlane.f32.xlu1 %v6561_v59  ;;  %1762 = vmax.xlane.f32.xlu2 %v6563_v48  ;;  %v6579_v48 = vmul.f32 0.25, %v2076_v46  ;;  %v1440_v33 = vmul.f32 1.442695, %v1414_v34 }
 0x3e7   : > { %v739_v58 = vpop.xlane.xlu2 %738 }
 0x3e8   : > { %v737_v1 = vpop.xlane.xlu1 %736  ;;  %v6572_v4 = vpop.xlane.xlu0 %1024  ;;  %4761 = vrcp.f32 %v739_v58 }
 0x3e9   : > { %4763 = vrcp.f32 %v737_v1  ;;  %v6603_v16 = vpop.f32.mrf.mxu1 }
 0x3ea   : > { %4765 = vpow2.f32 %v1064_v17  ;;  %v6599_v17 = vmul.f32 0.25, %v6528_v25 }
 0x3eb   : > { %4767 = vpow2.f32 %v1066_v5 }
 0x3ec   : > { %817 = vmatmul.bf16.gmra.mxu0 %v781_v28  ;;  %4282 = vmatmul.msk.bf16.gmra.mxu1 %vm518_vm0, %v8331_v35  ;;  %4769 = vpow2.f32 %v1438_v63 }
 0x3ed   : > { %1468 = vadd.xlane.f32.xlu0 %v6577_v32  ;;  %v2078_v12 = vpop.f32.mrf.mxu3  ;;  %4771 = vpow2.f32 %v1440_v33 }
 0x3ee   : > { %1094 = vadd.xlane.f32.xlu1 %v6583_v41  ;;  %2128 = vmax.xlane.f32.xlu2 %v6579_v48  ;;  %v4762_v30 = vpop.eup %4761  ;;  %v6614_v34 = vmul.f32 0.25, %v2078_v12 }
 0x3ef   : > { %v1075_v28 = vpop.xlane.xlu2 %1074  ;;  %v4764_v31 = vpop.eup %4763  ;;  %v773_v29 = vmul.f32 %v4762_v30, %v6346_v11  ;;  %v1415_v11 = vsub.f32 %v6332_v52, %v6550_v62 }
 0x3f0   : > { %v6592_v46 = vpop.xlane.xlu1 %1398  ;;  %v6594_v61 = vpop.xlane.xlu0 %1742  ;;  %v772_v1 = vmul.f32 %v4764_v31, %v6348_v9  ;;  %4773 = vrcp.f32 %v1075_v28  ;;  %8335 = vst [vmem:[#allocation43_spill] sm:$0xff] %v6614_v34  ;;  %v1039_v28 = vsub.f32 %v6319_v26, %v6530_v56  ;;  %v6639_v56 = vmul.f32 0.25, %v6575_v36 }
 0x3f1   : > { %v6596_v58 = vpop.eup %4765  ;;  %v6625_v30 = vpop.f32.mrf.mxu1  ;;  %v1442_v62 = vmul.f32 1.442695, %v1415_v11 }
 0x3f2   : > { %v6601_v24 = vpop.eup %4767  ;;  %v782_v53 = vpack.c.bf16 %v773_v29, %v772_v1  ;;  %v8337_v29 = vld [vmem:[#allocation30_spill] sm:$0xff] }
 0x3f3   : > { %8333 = vst [vmem:[#allocation57_spill] sm:$0xff] %v6601_v24  ;;  %v6612_v40 = vpop.eup %4769 }
 0x3f4   : > { %8334 = vst [vmem:[#allocation58_spill] sm:$0xff] %v6612_v40  ;;  %v6616_v63 = vpop.eup %4771 }
 0x3f5   : > { %1096 = vadd.xlane.f32.xlu0 %v6596_v58  ;;  %8336 = vst [vmem:[#allocation36_spill] sm:$0xff] %v6616_v63 }
 0x3f6   : > { %1764 = vmax.xlane.f32.xlu1 %v6599_v17  ;;  %1098 = vadd.xlane.f32.xlu2 %v6601_v24  ;;  %v4774_v33 = vpop.eup %4773  ;;  %v2081_v24 = vpop.f32.mrf.mxu3 }
 0x3f7   : > { %v6610_v5 = vpop.xlane.xlu2 %1400  ;;  %v6636_v26 = vmul.f32 0.25, %v2081_v24  ;;  %v8340_v24 = vld [vmem:[#allocation56_spill] sm:$0xff] }
 0x3f8   : > { %v1077_v25 = vpop.xlane.xlu1 %1076  ;;  %v741_v35 = vpop.xlane.xlu0 %740 }
 0x3f9   : > { %4775 = vrcp.f32 %v1077_v25  ;;  %v1122_v25 = vmul.f32 %v4774_v33, %v8337_v29  ;;  %v8339_v33 = vld [vmem:[#allocation49_spill] sm:$0xff] }
 0x3fa   : > { %4777 = vrcp.f32 %v741_v35  ;;  %v1040_v29 = vsub.f32 %v8339_v33, %v6552_v20 }
 0x3fc   : > { %822 = vmatmul.bf16.gmra.mxu0 %v782_v53  ;;  %v8338_v53 = vld [vmem:[#allocation38_spill] sm:$0xff] }
 0x3fd   : > { %2130 = vmax.xlane.f32.xlu0 %v6614_v34 }
 0x3fe   : > { %1470 = vadd.xlane.f32.xlu1 %v6612_v40  ;;  %1472 = vadd.xlane.f32.xlu2 %v6616_v63  ;;  %v1068_v63 = vmul.f32 1.442695, %v1039_v28  ;;  %v6634_v40 = vmul.f32 0.25, %v6556_v21  ;;  %v2083_v21 = vpop.f32.mrf.mxu3 }
 0x3ff   : > { %v4776_v9 = vpop.eup %4775  ;;  %v6627_v31 = vpop.xlane.xlu2 %1744 }
 0x400   : > { %v743_v12 = vpop.xlane.xlu1 %742  ;;  %v6629_v1 = vpop.xlane.xlu0 %1402  ;;  %v1123_v52 = vmul.f32 %v4776_v9, %v8338_v53  ;;  %v1041_v9 = vsub.f32 %v8340_v24, %v6572_v4 }
 0x401   : > { %4779 = vrcp.f32 %v743_v12  ;;  %v4778_v35 = vpop.eup %4777  ;;  %v6652_v53 = vpop.f32.mrf.mxu1 }
 0x402   : > { %v1138_v34 = vpack.c.bf16 %v1123_v52, %v1122_v25  ;;  %4781 = vpow2.f32 %v1442_v62  ;;  %v774_v12 = vmul.f32 %v4778_v35, %v6371_v51  ;;  %v1070_v25 = vmul.f32 1.442695, %v1040_v29  ;;  %v8341_v51 = vld [vmem:[#allocation55_spill] sm:$0xff] }
 0x403   : > { %4783 = vpow2.f32 %v1068_v63  ;;  %v1072_v62 = vmul.f32 1.442695, %v1041_v9  ;;  %v6656_v63 = vmul.f32 0.25, %v2083_v21  ;;  %v8342_v29 = vld [vmem:[#allocation39_spill] sm:$0xff] }
 0x404   : > { %1186 = vmatmul.bf16.vlgmr.msrb.gmra.mxu2 %v1138_v34 }
 0x405   : > { %1766 = vmax.xlane.f32.xlu0 %v6634_v40 }
 0x406   : > { %2132 = vmax.xlane.f32.xlu1 %v6636_v26  ;;  %1768 = vmax.xlane.f32.xlu2 %v6639_v56 }
 0x407   : > { %v4780_v11 = vpop.eup %4779  ;;  %v1081_v36 = vpop.xlane.xlu2 %1080 }
 0x408   : > { %v6648_v28 = vpop.xlane.xlu1 %1746  ;;  %4785 = vrcp.f32 %v1081_v36  ;;  %v1079_v34 = vpop.xlane.xlu0 %1078  ;;  %v775_v20 = vmul.f32 %v4780_v11, %v6380_v3  ;;  %v1416_v3 = vsub.f32 %v8341_v51, %v6554_v42  ;;  %v1417_v11 = vsub.f32 %v8342_v29, %v6592_v46 }
 0x409   : > { %4787 = vrcp.f32 %v1079_v34  ;;  %v6654_v33 = vpop.eup %4781  ;;  %v6676_v46 = vpop.f32.mrf.mxu1 }
 0x40a   : > { %v783_v52 = vpack.c.bf16 %v775_v20, %v774_v12  ;;  %v6658_v4 = vpop.eup %4783  ;;  %4789 = vpow2.f32 %v1070_v25  ;;  %v2086_v20 = vpop.f32.mrf.mxu3  ;;  %v1444_v42 = vmul.f32 1.442695, %v1416_v3 }
 0x40b   : > { %4791 = vpow2.f32 %v1072_v62  ;;  %v6674_v62 = vmul.f32 0.25, %v6603_v16 }
 0x40c   : > { %827 = vmatmul.bf16.gmra.mxu0 %v783_v52  ;;  %v1446_v52 = vmul.f32 1.442695, %v1417_v11 }
 0x40d   : > { %1474 = vadd.xlane.f32.xlu0 %v6654_v33 }
 0x40e   : > { %v4786_v24 = vpop.eup %4785  ;;  %1100 = vadd.xlane.f32.xlu1 %v6658_v4  ;;  %2134 = vmax.xlane.f32.xlu2 %v6656_v63 }
 0x40f   : > { %v4788_v35 = vpop.eup %4787  ;;  %v1125_v21 = vmul.f32 %v4786_v24, %v6393_v22  ;;  %v8345_v24 = vld [vmem:[#allocation33_spill] sm:$0xff] }
 0x410   : > { %v1453_v9 = vpop.xlane.xlu1 %1452  ;;  %v6668_v36 = vpop.xlane.xlu0 %2112  ;;  %v1124_v34 = vmul.f32 %v4788_v35, %v6397_v37  ;;  %v1774_v3 = vsub.f32 %v8345_v24, %v6594_v61 }
 0x411   : > { %4793 = vrcp.f32 %v1453_v9  ;;  %v1455_v12 = vpop.xlane.xlu2 %1454  ;;  %v6671_v51 = vpop.eup %4789 }
 0x412   : > { %4795 = vrcp.f32 %v1455_v12  ;;  %v1139_v25 = vpack.c.bf16 %v1125_v21, %v1124_v34  ;;  %8343 = vst [vmem:[#allocation48_spill] sm:$0xff] %v6671_v51  ;;  %v6678_v22 = vpop.eup %4791  ;;  %v6685_v35 = vpop.f32.mrf.mxu0  ;;  %v6695_v12 = vmul.f32 0.25, %v2086_v20 }
 0x413   : > { %8344 = vst [vmem:[#allocation52_spill] sm:$0xff] %v6678_v22  ;;  %4797 = vpow2.f32 %v1444_v42  ;;  %v1790_v42 = vmul.f32 1.442695, %v1774_v3  ;;  %v2088_v61 = vpop.f32.mrf.mxu3 }
 0x414   : > { %1191 = vmatmul.bf16.gmra.mxu2 %v1139_v25  ;;  %4799 = vpow2.f32 %v1446_v52  ;;  %8346 = vst [vmem:[#allocation41_spill] sm:$0xff] %v6685_v35  ;;  %v8350_v35 = vld [vmem:[#allocation44_spill] sm:$0xff] }
 0x415   : > { %1102 = vadd.xlane.f32.xlu0 %v6671_v51  ;;  %8347 = vst [vmem:[#allocation26_spill] sm:$0xff] %v6695_v12  ;;  %4801 = vpow2.f32 %v1790_v42 }
 0x416   : > { %1770 = vmax.xlane.f32.xlu1 %v6674_v62  ;;  %1104 = vadd.xlane.f32.xlu2 %v6678_v22 }
 0x417   : > { %v4794_v37 = vpop.eup %4793 }
 0x418   : > { %v4796_v16 = vpop.eup %4795  ;;  %v1500_v29 = vmul.f32 %v4794_v37, %v6410_v50  ;;  %v6688_v11 = vpop.xlane.xlu1 %2114  ;;  %v1418_v50 = vsub.f32 %v8350_v35, %v6610_v5  ;;  %v8351_v37 = vld [vmem:[#allocation40_spill] sm:$0xff]  ;;  %v6715_v35 = vmul.f32 0.25, %v6625_v30 }
 0x419   : > { %v6690_v21 = vpop.xlane.xlu0 %1748  ;;  %v1501_v9 = vmul.f32 %v4796_v16, %v6406_v13  ;;  %v6693_v34 = vpop.xlane.xlu2 %1750  ;;  %v1775_v13 = vsub.f32 %v8351_v37, %v6627_v31 }
 0x41a   : > { %v6697_v52 = vpop.eup %4797  ;;  %v6706_v16 = vpop.f32.mrf.mxu1  ;;  %v1448_v3 = vmul.f32 1.442695, %v1418_v50  ;;  %8353 = vst [vmem:[#allocation56_spill] sm:$0xff] %v6715_v35 }
 0x41b   : > { %v1516_v25 = vpack.c.bf16 %v1501_v9, %v1500_v29  ;;  %8348 = vst [vmem:[#allocation30_spill] sm:$0xff] %v6697_v52  ;;  %v6699_v24 = vpop.eup %4799  ;;  %v1792_v22 = vmul.f32 1.442695, %v1775_v13  ;;  %v6712_v5 = vpop.f32.mrf.mxu0 }
 0x41c   : > { %8349 = vst [vmem:[#allocation38_spill] sm:$0xff] %v6699_v24  ;;  %v6719_v31 = vpop.eup %4801  ;;  %4803 = vpow2.f32 %v1448_v3  ;;  %v2091_v37 = vpop.f32.mrf.mxu3 }
 0x41d   : > { %1556 = vmatmul.bf16.vlgmr.msra.gmra.mxu0 %v1516_v25  ;;  %2136 = vmax.xlane.f32.xlu0 %v6695_v12  ;;  %8352 = vst [vmem:[#allocation49_spill] sm:$0xff] %v6712_v5  ;;  %v6717_v25 = vmul.f32 0.25, %v2088_v61  ;;  %4805 = vpow2.f32 %v1792_v22  ;;  %v6735_v22 = vmul.f32 0.25, %v6652_v53 }
 0x41e   : > { %1476 = vadd.xlane.f32.xlu1 %v6697_v52  ;;  %1478 = vadd.xlane.f32.xlu2 %v6699_v24  ;;  %8355 = vst [vmem:[#allocation39_spill] sm:$0xff] %v6719_v31  ;;  %v1776_v24 = vsub.f32 %v6395_v54, %v6648_v28 }
 0x41f   : > { %8354 = vst [vmem:[#allocation55_spill] sm:$0xff] %v6717_v25 }
 0x420   : > { %8359 = vst [vmem:[#allocation59_spill] sm:$0xff] %v6735_v22  ;;  %v1794_v54 = vmul.f32 1.442695, %v1776_v24 }
 0x421   : > { %v1457_v20 = vpop.xlane.xlu0 %1456  ;;  %v1083_v29 = vpop.xlane.xlu1 %1082 }
 0x422   : > { %v6710_v9 = vpop.xlane.xlu2 %2116  ;;  %4807 = vrcp.f32 %v1083_v29  ;;  %v6724_v42 = vpop.f32.mrf.mxu1 }
 0x423   : > { %v6730_v5 = vpop.eup %4803 }
 0x424   : > { %8357 = vst [vmem:[#allocation44_spill] sm:$0xff] %v6730_v5  ;;  %v6732_v3 = vpop.eup %4805  ;;  %v2093_v52 = vpop.f32.mrf.mxu3 }
 0x425   : > { %1772 = vmax.xlane.f32.xlu0 %v6715_v35  ;;  %8358 = vst [vmem:[#allocation40_spill] sm:$0xff] %v6732_v3  ;;  %v6754_v12 = vmul.f32 0.25, %v2093_v52 }
 0x426   : > { %2138 = vmax.xlane.f32.xlu1 %v6717_v25  ;;  %1822 = vadd.xlane.f32.xlu2 %v6719_v31  ;;  %v8360_v31 = vld [vmem:[#allocation45_spill] sm:$0xff] }
 0x427   : > { %v1419_v29 = vsub.f32 %v8360_v31, %v6629_v1 }
 0x428   : > { %v4808_v25 = vpop.eup %4807 }
 0x429   : > { %v1085_v50 = vpop.xlane.xlu0 %1084  ;;  %v6726_v13 = vpop.xlane.xlu1 %1752  ;;  %v1126_v35 = vmul.f32 %v4808_v25, %v6444_v10  ;;  %v1450_v31 = vmul.f32 1.442695, %v1419_v29 }
 0x42a   : > { %v1087_v30 = vpop.xlane.xlu2 %1086  ;;  %4809 = vrcp.f32 %v1085_v50  ;;  %v6728_v61 = vpop.f32.mrf.mxu0 }
 0x42b   : > { %8356 = vst [vmem:[#allocation33_spill] sm:$0xff] %v6728_v61  ;;  %v1777_v61 = vsub.f32 %v6423_v38, %v6690_v21  ;;  %4811 = vrcp.f32 %v1457_v20  ;;  %v6750_v28 = vpop.f32.mrf.mxu1  ;;  %v6756_v21 = vmul.f32 0.25, %v2091_v37  ;;  %v6759_v20 = vmul.f32 0.25, %v6676_v46 }
 0x42d   : > { %1480 = vadd.xlane.f32.xlu0 %v6730_v5  ;;  %v1796_v38 = vmul.f32 1.442695, %v1777_v61 }
 0x42e   : > { %1824 = vadd.xlane.f32.xlu1 %v6732_v3  ;;  %2482 = vmax.xlane.f32.xlu2 %v6735_v22 }
 0x430   : > { %v4810_v50 = vpop.eup %4809 }
 0x431   : > { %v6746_v53 = vpop.xlane.xlu0 %2118  ;;  %v1127_v1 = vmul.f32 %v4810_v50, %v6456_v39  ;;  %v1459_v5 = vpop.xlane.xlu1 %1458  ;;  %v2144_v39 = vsub.f32 %v6408_v14, %v6668_v36 }
 0x432   : > { %v1461_v51 = vpop.xlane.xlu2 %1460  ;;  %4813 = vrcp.f32 %v1459_v5  ;;  %v6752_v22 = vpop.f32.mrf.mxu0 }
 0x433   : > { %8361 = vst [vmem:[#allocation45_spill] sm:$0xff] %v6752_v22  ;;  %v1140_v3 = vpack.c.bf16 %v1127_v1, %v1126_v35  ;;  %4815 = vpow2.f32 %v1450_v31  ;;  %v4812_v10 = vpop.eup %4811  ;;  %v2160_v37 = vmul.f32 1.442695, %v2144_v39  ;;  %v6780_v29 = vpop.f32.mrf.mxu1  ;;  %v2145_v1 = vsub.f32 %v6421_v43, %v6688_v11 }
 0x434   : > { %4817 = vpow2.f32 %v1794_v54  ;;  %v1502_v35 = vmul.f32 %v4812_v10, %v6438_v45  ;;  %v1778_v45 = vsub.f32 %v6426_v8, %v6693_v34  ;;  %v6796_v8 = vmul.f32 0.25, %v6706_v16 }
 0x435   : > { %1196 = vmatmul.bf16.gmra.mxu2 %v1140_v3  ;;  %2142 = vmax.xlane.f32.xlu0 %v6754_v12  ;;  %4819 = vpow2.f32 %v1796_v38 }
 0x436   : > { %2484 = vmax.xlane.f32.xlu1 %v6759_v20  ;;  %2140 = vmax.xlane.f32.xlu2 %v6756_v21  ;;  %4821 = vpow2.f32 %v2160_v37  ;;  %v1798_v10 = vmul.f32 1.442695, %v1778_v45 }
 0x437   : > { %4823 = vrcp.f32 %v1461_v51  ;;  %v2162_v51 = vmul.f32 1.442695, %v2145_v1 }
 0x438   : > { %v4814_v52 = vpop.eup %4813  ;;  %4825 = vrcp.f32 %v1087_v30 }
 0x439   : > { %v6766_v24 = vpop.xlane.xlu0 %1754  ;;  %v6768_v5 = vpop.xlane.xlu1 %2120  ;;  %v1503_v25 = vmul.f32 %v4814_v52, %v6471_v7  ;;  %v2146_v7 = vsub.f32 %v6440_v18, %v6710_v9  ;;  %v6801_v18 = vmul.f32 0.25, %v6724_v42  ;;  %v1779_v42 = vsub.f32 %v6458_v27, %v6726_v13 }
 0x43a   : > { %v6770_v46 = vpop.xlane.xlu2 %1756  ;;  %v6774_v61 = vpop.f32.mrf.mxu0  ;;  %v1780_v13 = vsub.f32 %v6485_v0, %v6766_v24  ;;  %v2148_v0 = vsub.f32 %v6489_v49, %v6768_v5 }
 0x43b   : > { %8362 = vst [vmem:[#allocation60_spill] sm:$0xff] %v6774_v61  ;;  %v6776_v14 = vpop.eup %4815  ;;  %v1517_v36 = vpack.c.bf16 %v1503_v25, %v1502_v35  ;;  %v2164_v34 = vmul.f32 1.442695, %v2146_v7  ;;  %v6806_v30 = vpop.f32.mrf.mxu1 }
 0x43c   : > { %v6778_v3 = vpop.eup %4817 }
 0x43d   : > { %v6782_v50 = vpop.eup %4819  ;;  %1561 = vmatmul.bf16.gmra.mxu0 %v1517_v36  ;;  %1826 = vadd.xlane.f32.xlu0 %v6778_v3 }
 0x43e   : > { %1482 = vadd.xlane.f32.xlu1 %v6776_v14  ;;  %1828 = vadd.xlane.f32.xlu2 %v6782_v50  ;;  %v6798_v39 = vpop.eup %4821 }
 0x43f   : > { %v4824_v43 = vpop.eup %4823 }
 0x440   : > { %v4826_v11 = vpop.eup %4825  ;;  %v1504_v25 = vmul.f32 %v4824_v43, %v6475_v44 }
 0x441   : > { %v1463_v31 = vpop.xlane.xlu0 %1462  ;;  %v1089_v54 = vpop.xlane.xlu1 %1088  ;;  %v1128_v7 = vmul.f32 %v4826_v11, %v6460_v55  ;;  %v2147_v55 = vsub.f32 %v6469_v23, %v6746_v53  ;;  %v1802_v23 = vmul.f32 1.442695, %v1780_v13  ;;  %v6865_v13 = vmul.f32 0.25, %v6806_v30 }
 0x442   : > { %v6793_v38 = vpop.xlane.xlu2 %2122  ;;  %4827 = vrcp.f32 %v1463_v31  ;;  %v6803_v9 = vpop.f32.mrf.mxu0 }
 0x443   : > { %4829 = vrcp.f32 %v1089_v54  ;;  %8363 = vst [vmem:[#allocation61_spill] sm:$0xff] %v6803_v9  ;;  %v1800_v54 = vmul.f32 1.442695, %v1779_v42  ;;  %v2166_v42 = vmul.f32 1.442695, %v2147_v55  ;;  %v2149_v24 = vsub.f32 %v6506_v2, %v6793_v38 }
 0x444   : > { %4831 = vpow2.f32 %v1798_v10  ;;  %v2168_v38 = vmul.f32 1.442695, %v2148_v0 }
 0x445   : > { %2486 = vmax.xlane.f32.xlu0 %v6796_v8  ;;  %4833 = vpow2.f32 %v2164_v34 }
 0x446   : > { %2192 = vadd.xlane.f32.xlu1 %v6798_v39  ;;  %2488 = vmax.xlane.f32.xlu2 %v6801_v18  ;;  %4835 = vpow2.f32 %v2162_v51 }
 0x448   : > { %v4828_v16 = vpop.eup %4827 }
 0x449   : > { %v4830_v52 = vpop.eup %4829  ;;  %v1091_v35 = vpop.xlane.xlu0 %1090  ;;  %v1505_v37 = vmul.f32 %v4828_v16, %v6504_v57 }
 0x44a   : > { %v6814_v36 = vpop.xlane.xlu1 %1758  ;;  %v1093_v45 = vpop.xlane.xlu2 %1092  ;;  %v1129_v1 = vmul.f32 %v4830_v52, %v6510_v19  ;;  %4837 = vrcp.f32 %v1091_v35  ;;  %v6838_v35 = vmul.f32 0.25, %v6750_v28 }
 0x44b   : > { %v1518_v31 = vpack.c.bf16 %v1505_v37, %v1504_v25  ;;  %v6818_v34 = vpop.eup %4831  ;;  %4839 = vrcp.f32 %v1093_v45  ;;  %v6824_v57 = vpop.f32.mrf.mxu0  ;;  %v6843_v25 = vmul.f32 0.25, %v6780_v29  ;;  %v1781_v29 = vsub.f32 %v6491_v15, %v6770_v46 }
 0x44c   : > { %v1141_v10 = vpack.c.bf16 %v1129_v1, %v1128_v7  ;;  %v6820_v27 = vpop.eup %4833  ;;  %8364 = vst [vmem:[#allocation62_spill] sm:$0xff] %v6824_v57  ;;  %4841 = vpow2.f32 %v1800_v54  ;;  %v6831_v19 = vpop.f32.mrf.mxu1 }
 0x44d   : > { %1566 = vmatmul.bf16.gmra.mxu0 %v1518_v31  ;;  %v6822_v44 = vpop.eup %4835  ;;  %2196 = vadd.xlane.f32.xlu0 %v6820_v27  ;;  %v1804_v15 = vmul.f32 1.442695, %v1781_v29 }
 0x44e   : > { %1201 = vmatmul.bf16.gmra.mxu2 %v1141_v10  ;;  %1830 = vadd.xlane.f32.xlu1 %v6818_v34 }
 0x44f   : > { %2194 = vadd.xlane.f32.xlu2 %v6822_v44 }
 0x450   : > { %v4838_v16 = vpop.eup %4837 }
 0x451   : > { %v6835_v51 = vpop.xlane.xlu0 %2124  ;;  %v4840_v52 = vpop.eup %4839  ;;  %v1130_v28 = vmul.f32 %v4838_v16, %v6518_v6  ;;  %v8366_v6 = vld [vmem:[#allocation51_spill] sm:$0xff]  ;;  %v8367_v16 = vld [vmem:[#allocation46_spill] sm:$0xff] }
 0x452   : > { %v1465_v43 = vpop.xlane.xlu1 %1464  ;;  %v1467_v11 = vpop.xlane.xlu2 %1466  ;;  %v1131_v37 = vmul.f32 %v4840_v52, %v6520_v60  ;;  %v2170_v60 = vmul.f32 1.442695, %v2149_v24 }
 0x453   : > { %4843 = vrcp.f32 %v1465_v43  ;;  %v6840_v53 = vpop.eup %4841  ;;  %v6856_v49 = vpop.f32.mrf.mxu0 }
 0x454   : > { %4845 = vrcp.f32 %v1467_v11  ;;  %8365 = vst [vmem:[#allocation63_spill] sm:$0xff] %v6856_v49  ;;  %v2446_v54 = vpop.f32.mrf.mxu1  ;;  %v1142_v55 = vpack.c.bf16 %v1131_v37, %v1130_v28 }
 0x455   : > { %1832 = vadd.xlane.f32.xlu0 %v6840_v53  ;;  %4847 = vpow2.f32 %v2166_v42 }
 0x456   : > { %2490 = vmax.xlane.f32.xlu1 %v6838_v35  ;;  %4849 = vpow2.f32 %v1802_v23 }
 0x457   : > { %2492 = vmax.xlane.f32.xlu2 %v6843_v25  ;;  %4851 = vpow2.f32 %v2168_v38 }
 0x458   : > { %4853 = vpow2.f32 %v2170_v60 }
 0x459   : > { %v4844_v45 = vpop.eup %4843  ;;  %v1761_v5 = vpop.xlane.xlu0 %1760  ;;  %4855 = vpow2.f32 %v1804_v15 }
 0x45a   : > { %v4846_v7 = vpop.eup %4845  ;;  %v6858_v1 = vpop.xlane.xlu1 %2126  ;;  %v1506_v2 = vmul.f32 %v4844_v45, %v6538_v47  ;;  %v1782_v47 = vsub.f32 %v8367_v16, %v6814_v36  ;;  %v8369_v45 = vld [vmem:[#allocation53_spill] sm:$0xff]  ;;  %v6895_v16 = vmul.f32 0.25, %v6831_v19  ;;  %v8372_v19 = vld [vmem:[#allocation50_spill] sm:$0xff] }
 0x45b   : > { %v6860_v31 = vpop.xlane.xlu2 %1762  ;;  %v1507_v10 = vmul.f32 %v4846_v7, %v8366_v6  ;;  %v6867_v43 = vpop.eup %4847  ;;  %v2150_v29 = vsub.f32 %v8369_v45, %v6835_v51  ;;  %v8370_v7 = vld [vmem:[#allocation54_spill] sm:$0xff] }
 0x45c   : > { %v6869_v11 = vpop.eup %4849  ;;  %v1806_v23 = vmul.f32 1.442695, %v1782_v47  ;;  %v6876_v0 = vpop.f32.mrf.mxu0 }
 0x45d   : > { %v1519_v46 = vpack.c.bf16 %v1507_v10, %v1506_v2  ;;  %2494 = vmax.xlane.f32.xlu0 %v6865_v13  ;;  %8368 = vst [vmem:[#allocation51_spill] sm:$0xff] %v6876_v0  ;;  %v6878_v24 = vpop.eup %4851  ;;  %v2448_v28 = vpop.f32.mrf.mxu1  ;;  %v1783_v2 = vsub.f32 %v8370_v7, %v1761_v5  ;;  %v2172_v60 = vmul.f32 1.442695, %v2150_v29  ;;  %v6897_v5 = vmul.f32 0.25, %v2446_v54 }
 0x45e   : > { %1206 = vmatmul.bf16.gmra.mxu2 %v1142_v55  ;;  %2198 = vadd.xlane.f32.xlu1 %v6867_v43  ;;  %v6880_v37 = vpop.eup %4853  ;;  %4857 = vpow2.f32 %v1806_v23  ;;  %v1784_v54 = vsub.f32 %v8372_v19, %v6860_v31  ;;  %v8374_v19 = vld [vmem:[#allocation58_spill] sm:$0xff] }
 0x45f   : > { %1571 = vmatmul.bf16.gmra.mxu0 %v1519_v46  ;;  %1834 = vadd.xlane.f32.xlu2 %v6869_v11  ;;  %v6882_v36 = vpop.eup %4855  ;;  %v1808_v55 = vmul.f32 1.442695, %v1783_v2 }
 0x460   : > { %v1810_v0 = vmul.f32 1.442695, %v1784_v54 }
 0x461   : > { %v1469_v30 = vpop.xlane.xlu0 %1468 }
 0x462   : > { %v1095_v42 = vpop.xlane.xlu1 %1094 }
 0x463   : > { %v2129_v52 = vpop.xlane.xlu2 %2128  ;;  %4859 = vrcp.f32 %v1095_v42  ;;  %v2151_v42 = vsub.f32 %v6561_v59, %v6858_v1 }
 0x464   : > { %v6890_v15 = vpop.eup %4857  ;;  %v6892_v46 = vpop.f32.mrf.mxu0  ;;  %v2152_v45 = vsub.f32 %v6579_v48, %v2129_v52  ;;  %v6913_v52 = vmul.f32 0.25, %v2448_v28 }
 0x465   : > { %2202 = vadd.xlane.f32.xlu0 %v6880_v37  ;;  %8371 = vst [vmem:[#allocation46_spill] sm:$0xff] %v6892_v46  ;;  %v6899_v47 = vpop.f32.mrf.mxu1 }
 0x466   : > { %1836 = vadd.xlane.f32.xlu1 %v6882_v36 }
 0x467   : > { %2200 = vadd.xlane.f32.xlu2 %v6878_v24 }
 0x469   : > { %v1097_v38 = vpop.xlane.xlu0 %1096  ;;  %v4860_v51 = vpop.eup %4859 }
 0x46a   : > { %v1765_v6 = vpop.xlane.xlu1 %1764  ;;  %4861 = vrcp.f32 %v1097_v38  ;;  %v1132_v7 = vmul.f32 %v4860_v51, %v6583_v41  ;;  %v2174_v38 = vmul.f32 1.442695, %v2151_v42 }
 0x46b   : > { %v1099_v10 = vpop.xlane.xlu2 %1098  ;;  %4863 = vpow2.f32 %v2172_v60  ;;  %v1785_v41 = vsub.f32 %v6599_v17, %v1765_v6 }
 0x46c   : > { %4865 = vpow2.f32 %v1808_v55  ;;  %v2176_v55 = vmul.f32 1.442695, %v2152_v45 }
 0x46d   : > { %1838 = vadd.xlane.f32.xlu0 %v6890_v15  ;;  %4867 = vrcp.f32 %v1469_v30  ;;  %v6918_v30 = vpop.f32.mrf.mxu0  ;;  %v2453_v28 = vpop.f32.mrf.mxu1  ;;  %v1812_v17 = vmul.f32 1.442695, %v1785_v41 }
 0x46e   : > { %2496 = vmax.xlane.f32.xlu1 %v6895_v16  ;;  %8373 = vst [vmem:[#allocation53_spill] sm:$0xff] %v6918_v30  ;;  %v8378_v30 = vld [vmem:[#allocation57_spill] sm:$0xff] }
 0x46f   : > { %2498 = vmax.xlane.f32.xlu2 %v6897_v5 }
 0x470   : > { %v4862_v23 = vpop.eup %4861 }
 0x471   : > { %v2131_v29 = vpop.xlane.xlu0 %2130  ;;  %v1133_v2 = vmul.f32 %v4862_v23, %v6596_v58  ;;  %v6911_v48 = vpop.eup %4863 }
 0x472   : > { %v1471_v59 = vpop.xlane.xlu1 %1470  ;;  %v6915_v46 = vpop.eup %4865 }
 0x473   : > { %v1473_v1 = vpop.xlane.xlu2 %1472  ;;  %4869 = vrcp.f32 %v1471_v59  ;;  %v1143_v60 = vpack.c.bf16 %v1133_v2, %v1132_v7  ;;  %v4868_v31 = vpop.eup %4867 }
 0x474   : > { %4871 = vpow2.f32 %v2174_v38  ;;  %v1508_v45 = vmul.f32 %v4868_v31, %v6577_v32 }
 0x475   : > { %1211 = vmatmul.bf16.gmra.mxu2 %v1143_v60  ;;  %2500 = vmax.xlane.f32.xlu0 %v6913_v52  ;;  %4873 = vpow2.f32 %v2176_v55  ;;  %v6935_v32 = vpop.f32.mrf.mxu0 }
 0x476   : > { %2204 = vadd.xlane.f32.xlu1 %v6911_v48  ;;  %4875 = vpow2.f32 %v1810_v0  ;;  %v8375_v0 = vld [vmem:[#allocation43_spill] sm:$0xff]  ;;  %8376 = vst [vmem:[#allocation54_spill] sm:$0xff] %v6935_v32 }
 0x477   : > { %1840 = vadd.xlane.f32.xlu2 %v6915_v46  ;;  %4877 = vpow2.f32 %v1812_v17  ;;  %v2153_v38 = vsub.f32 %v8375_v0, %v2131_v29  ;;  %v6942_v17 = vmul.f32 0.25, %v6899_v47 }
 0x478   : > { %4879 = vrcp.f32 %v1473_v1 }
 0x479   : > { %v4870_v58 = vpop.eup %4869  ;;  %v1767_v51 = vpop.xlane.xlu0 %1766  ;;  %4881 = vrcp.f32 %v1099_v10  ;;  %v6944_v10 = vmul.f32 0.25, %v2453_v28 }
 0x47a   : > { %v2133_v42 = vpop.xlane.xlu1 %2132  ;;  %v1509_v54 = vmul.f32 %v4870_v58, %v8374_v19  ;;  %v6925_v7 = vpop.eup %4871  ;;  %v1786_v60 = vsub.f32 %v6634_v40, %v1767_v51 }
 0x47b   : > { %v1769_v23 = vpop.xlane.xlu2 %1768  ;;  %v6927_v2 = vpop.eup %4873  ;;  %v2154_v29 = vsub.f32 %v6636_v26, %v2133_v42 }
 0x47c   : > { %v1520_v6 = vpack.c.bf16 %v1509_v54, %v1508_v45  ;;  %v6929_v59 = vpop.eup %4875  ;;  %v2456_v58 = vpop.f32.mrf.mxu1  ;;  %v2178_v45 = vmul.f32 1.442695, %v2153_v38  ;;  %v1814_v1 = vmul.f32 1.442695, %v1786_v60  ;;  %v1787_v51 = vsub.f32 %v6639_v56, %v1769_v23  ;;  %v8377_v38 = vld [vmem:[#allocation36_spill] sm:$0xff] }
 0x47d   : > { %2208 = vadd.xlane.f32.xlu0 %v6927_v2  ;;  %v6938_v19 = vpop.eup %4877  ;;  %v2180_v42 = vmul.f32 1.442695, %v2154_v29  ;;  %v6955_v23 = vpop.f32.mrf.mxu0  ;;  %v6957_v57 = vmul.f32 0.25, %v2456_v58 }
 0x47e   : > { %1576 = vmatmul.bf16.gmra.mxu0 %v1520_v6  ;;  %1842 = vadd.xlane.f32.xlu1 %v6929_v59  ;;  %v4880_v54 = vpop.eup %4879  ;;  %8379 = vst [vmem:[#allocation50_spill] sm:$0xff] %v6955_v23 }
 0x47f   : > { %2206 = vadd.xlane.f32.xlu2 %v6925_v7  ;;  %v4882_v6 = vpop.eup %4881  ;;  %v1510_v28 = vmul.f32 %v4880_v54, %v8377_v38 }
 0x481   : > { %v1475_v55 = vpop.xlane.xlu0 %1474 }
 0x482   : > { %v1101_v31 = vpop.xlane.xlu1 %1100  ;;  %4883 = vrcp.f32 %v1475_v55 }
 0x483   : > { %v2135_v41 = vpop.xlane.xlu2 %2134  ;;  %4885 = vrcp.f32 %v1101_v31 }
 0x484   : > { %4887 = vpow2.f32 %v2178_v45  ;;  %v2155_v0 = vsub.f32 %v6656_v63, %v2135_v41  ;;  %v1134_v45 = vmul.f32 %v4882_v6, %v8378_v30  ;;  %v2458_v29 = vpop.f32.mrf.mxu1 }
 0x485   : > { %1844 = vadd.xlane.f32.xlu0 %v6938_v19  ;;  %4889 = vpow2.f32 %v1814_v1  ;;  %v1816_v1 = vmul.f32 1.442695, %v1787_v51 }
 0x486   : > { %2502 = vmax.xlane.f32.xlu1 %v6942_v17  ;;  %v2182_v41 = vmul.f32 1.442695, %v2155_v0  ;;  %4891 = vpow2.f32 %v2180_v42  ;;  %v6969_v0 = vpop.f32.mrf.mxu0 }
 0x487   : > { %2504 = vmax.xlane.f32.xlu2 %v6944_v10  ;;  %8380 = vst [vmem:[#allocation58_spill] sm:$0xff] %v6969_v0 }
 0x488   : > { %v4884_v40 = vpop.eup %4883 }
 0x489   : > { %v4886_v26 = vpop.eup %4885  ;;  %v1103_v47 = vpop.xlane.xlu0 %1102  ;;  %v1511_v60 = vmul.f32 %v4884_v40, %v6654_v33 }
 0x48a   : > { %v1771_v55 = vpop.xlane.xlu1 %1770  ;;  %v1135_v56 = vmul.f32 %v4886_v26, %v6658_v4  ;;  %v6959_v49 = vpop.eup %4887  ;;  %4893 = vrcp.f32 %v1103_v47  ;;  %v8381_v47 = vld [vmem:[#allocation26_spill] sm:$0xff] }
 0x48b   : > { %v1105_v31 = vpop.xlane.xlu2 %1104  ;;  %v1521_v63 = vpack.c.bf16 %v1511_v60, %v1510_v28  ;;  %v6961_v33 = vpop.eup %4889  ;;  %v1788_v4 = vsub.f32 %v6674_v62, %v1771_v55  ;;  %v8382_v28 = vld [vmem:[#allocation48_spill] sm:$0xff] }
 0x48c   : > { %v1144_v32 = vpack.c.bf16 %v1135_v56, %v1134_v45  ;;  %4895 = vrcp.f32 %v1105_v31  ;;  %v6967_v6 = vpop.eup %4891  ;;  %v2461_v42 = vpop.f32.mrf.mxu1  ;;  %v8383_v55 = vld [vmem:[#allocation52_spill] sm:$0xff] }
 0x48d   : > { %2506 = vmax.xlane.f32.xlu0 %v6957_v57  ;;  %4897 = vpow2.f32 %v2182_v41  ;;  %v1818_v40 = vmul.f32 1.442695, %v1788_v4  ;;  %v8384_v4 = vld [vmem:[#allocation56_spill] sm:$0xff] }
 0x48e   : > { %1216 = vmatmul.bf16.gmra.mxu2 %v1144_v32  ;;  %1581 = vmatmul.bf16.gmra.mxu0 %v1521_v63  ;;  %4899 = vpow2.f32 %v1816_v1 }
 0x48f   : > { %2210 = vadd.xlane.f32.xlu1 %v6959_v49  ;;  %1846 = vadd.xlane.f32.xlu2 %v6961_v33 }
 0x490   : > { %v4894_v32 = vpop.eup %4893 }
 0x491   : > { %v2137_v30 = vpop.xlane.xlu0 %2136  ;;  %v1136_v60 = vmul.f32 %v4894_v32, %v8382_v28  ;;  %v6986_v32 = vmul.f32 0.25, %v2458_v29  ;;  %v6990_v28 = vpop.f32.mrf.mxu0 }
 0x492   : > { %v1477_v58 = vpop.xlane.xlu1 %1476  ;;  %v4896_v51 = vpop.eup %4895  ;;  %v2156_v38 = vsub.f32 %v8381_v47, %v2137_v30  ;;  %8388 = vst [vmem:[#allocation36_spill] sm:$0xff] %v6990_v28 }
 0x493   : > { %v1479_v54 = vpop.xlane.xlu2 %1478  ;;  %4901 = vrcp.f32 %v1477_v58  ;;  %v6971_v26 = vpop.eup %4897  ;;  %v1137_v31 = vmul.f32 %v4896_v51, %v8383_v55  ;;  %8387 = vst [vmem:[#allocation43_spill] sm:$0xff] %v6986_v32  ;;  %v6988_v51 = vmul.f32 0.25, %v2461_v42 }
 0x494   : > { %4903 = vrcp.f32 %v1479_v54  ;;  %v6973_v62 = vpop.eup %4899  ;;  %v8385_v54 = vld [vmem:[#allocation30_spill] sm:$0xff]  ;;  %v2184_v30 = vmul.f32 1.442695, %v2156_v38  ;;  %v2463_v38 = vpop.f32.mrf.mxu1 }
 0x495   : > { %2214 = vadd.xlane.f32.xlu0 %v6971_v26  ;;  %4905 = vpow2.f32 %v1818_v40  ;;  %v8386_v40 = vld [vmem:[#allocation38_spill] sm:$0xff]  ;;  %v1145_v61 = vpack.c.bf16 %v1137_v31, %v1136_v60  ;;  %v7000_v55 = vmul.f32 0.25, %v2463_v38 }
 0x497   : > { %1848 = vadd.xlane.f32.xlu1 %v6973_v62  ;;  %2212 = vadd.xlane.f32.xlu2 %v6967_v6  ;;  %8390 = vst [vmem:[#allocation57_spill] sm:$0xff] %v7000_v55 }
 0x499   : > { %v4902_v45 = vpop.eup %4901  ;;  %v1773_v56 = vpop.xlane.xlu0 %1772 }
 0x49a   : > { %v4904_v63 = vpop.eup %4903  ;;  %v2139_v41 = vpop.xlane.xlu1 %2138  ;;  %v1789_v58 = vsub.f32 %v8384_v4, %v1773_v56  ;;  %v1512_v23 = vmul.f32 %v4902_v45, %v8385_v54 }
 0x49b   : > { %v1823_v1 = vpop.xlane.xlu2 %1822  ;;  %v1513_v0 = vmul.f32 %v4904_v63, %v8386_v40  ;;  %v6984_v22 = vpop.eup %4905 }
 0x49c   : > { %v1820_v47 = vmul.f32 1.442695, %v1789_v58  ;;  %v7007_v63 = vpop.f32.mrf.mxu0  ;;  %v8393_v58 = vld [vmem:[#allocation40_spill] sm:$0xff] }
 0x49d   : > { %v1522_v9 = vpack.c.bf16 %v1513_v0, %v1512_v23  ;;  %1850 = vadd.xlane.f32.xlu0 %v6984_v22  ;;  %v8389_v23 = vld [vmem:[#allocation55_spill] sm:$0xff]  ;;  %8391 = vst [vmem:[#allocation26_spill] sm:$0xff] %v7007_v63 }
 0x49e   : > { %1221 = vmatmul.bf16.gmra.mxu2 %v1145_v61  ;;  %4907 = vpow2.f32 %v1820_v47  ;;  %v2157_v0 = vsub.f32 %v8389_v23, %v2139_v41 }
 0x49f   : > { %1586 = vmatmul.bf16.gmra.mxu0 %v1522_v9  ;;  %4909 = vpow2.f32 %v2184_v30  ;;  %2508 = vmax.xlane.f32.xlu1 %v6986_v32 }
 0x4a0   : > { %2510 = vmax.xlane.f32.xlu2 %v6988_v51  ;;  %4911 = vrcp.f32 %v1823_v1  ;;  %v2186_v9 = vmul.f32 1.442695, %v2157_v0  ;;  %v8392_v1 = vld [vmem:[#allocation39_spill] sm:$0xff] }
 0x4a1   : > { %v1481_v29 = vpop.xlane.xlu0 %1480 }
 0x4a2   : > { %v1825_v60 = vpop.xlane.xlu1 %1824 }
 0x4a3   : > { %v6996_v42 = vpop.xlane.xlu2 %2482  ;;  %4913 = vrcp.f32 %v1825_v60 }
 0x4a4   : > { %v6998_v61 = vpop.eup %4907  ;;  %4915 = vpow2.f32 %v2186_v9 }
 0x4a5   : > { %v7002_v31 = vpop.eup %4909  ;;  %2512 = vmax.xlane.f32.xlu0 %v7000_v55 }
 0x4a6   : > { %v4912_v45 = vpop.eup %4911 }
 0x4a7   : > { %2216 = vadd.xlane.f32.xlu1 %v7002_v31  ;;  %v1870_v4 = vmul.f32 %v4912_v45, %v8392_v1 }
 0x4a8   : > { %1852 = vadd.xlane.f32.xlu2 %v6998_v61 }
 0x4a9   : > { %v4914_v56 = vpop.eup %4913  ;;  %v2143_v41 = vpop.xlane.xlu0 %2142 }
 0x4aa   : > { %v1871_v54 = vmul.f32 %v4914_v56, %v8393_v58  ;;  %v7011_v40 = vpop.xlane.xlu1 %2484  ;;  %v2159_v47 = vsub.f32 %v6754_v12, %v2143_v41  ;;  %v7015_v28 = vpop.eup %4915 }
 0x4ab   : > { %v2141_v30 = vpop.xlane.xlu2 %2140  ;;  %v7020_v12 = vpop.f32.mrf.mxu0 }
 0x4ac   : > { %v2158_v38 = vsub.f32 %v6756_v21, %v2141_v30  ;;  %v1886_v23 = vpack.c.bf16 %v1871_v54, %v1870_v4  ;;  %v2190_v0 = vmul.f32 1.442695, %v2159_v47  ;;  %8394 = vst [vmem:[#allocation48_spill] sm:$0xff] %v7020_v12 }
 0x4ae   : > { %v2188_v60 = vmul.f32 1.442695, %v2158_v38  ;;  %4917 = vpow2.f32 %v2190_v0  ;;  %1926 = vmatmul.bf16.vlgmr.msra.gmra.mxu2 %v1886_v23  ;;  %v8395_v23 = vld [vmem:[#allocation44_spill] sm:$0xff] }
 0x4b0   : > { %4919 = vpow2.f32 %v2188_v60  ;;  %2218 = vadd.xlane.f32.xlu2 %v7015_v28 }
 0x4b1   : > { %4921 = vrcp.f32 %v1481_v29  ;;  %v1827_v9 = vpop.xlane.xlu0 %1826 }
 0x4b2   : > { %v1483_v45 = vpop.xlane.xlu1 %1482  ;;  %4923 = vrcp.f32 %v1827_v9 }
 0x4b3   : > { %v1829_v56 = vpop.xlane.xlu2 %1828  ;;  %4925 = vrcp.f32 %v1483_v45  ;;  %v7034_v63 = vpop.f32.mrf.mxu0 }
 0x4b4   : > { %v7018_v1 = vpop.eup %4917  ;;  %4927 = vrcp.f32 %v1829_v56 }
 0x4b5   : > { %2222 = vadd.xlane.f32.xlu1 %v7018_v1 }
 0x4b6   : > { %v7023_v21 = vpop.eup %4919 }
 0x4b7   : > { %v4922_v41 = vpop.eup %4921  ;;  %2220 = vadd.xlane.f32.xlu0 %v7023_v21 }
 0x4b8   : > { %v4924_v4 = vpop.eup %4923  ;;  %v1514_v0 = vmul.f32 %v4922_v41, %v8395_v23  ;;  %v8396_v41 = vld [vmem:[#allocation25_spill] sm:$0xff] }
 0x4b9   : > { %v4926_v58 = vpop.eup %4925  ;;  %v7026_v29 = vpop.xlane.xlu0 %2486  ;;  %v1872_v54 = vmul.f32 %v4924_v4, %v6778_v3 }
 0x4ba   : > { %v4928_v30 = vpop.eup %4927  ;;  %v2193_v47 = vpop.xlane.xlu1 %2192  ;;  %v1515_v60 = vmul.f32 %v4926_v58, %v6776_v14 }
 0x4bb   : > { %v7029_v38 = vpop.xlane.xlu2 %2488  ;;  %v1873_v9 = vmul.f32 %v4928_v30, %v6782_v50  ;;  %4929 = vrcp.f32 %v2193_v47  ;;  %v7036_v4 = vpop.f32.mrf.mxu0  ;;  %v8397_v47 = vld [vmem:[#allocation27_spill] sm:$0xff] }
 0x4bc   : > { %v1523_v45 = vpack.c.bf16 %v1515_v60, %v1514_v0 }
 0x4bd   : > { %v1887_v56 = vpack.c.bf16 %v1873_v9, %v1872_v54  ;;  %v8398_v9 = vld [vmem:[#allocation31_spill] sm:$0xff] }
 0x4be   : > { %1591 = vmatmul.bf16.gmra.mxu0 %v1523_v45 }
 0x4bf   : > { %1931 = vmatmul.bf16.gmra.mxu2 %v1887_v56 }
 0x4c1   : > { %v2197_v55 = vpop.xlane.xlu0 %2196  ;;  %v4930_v32 = vpop.eup %4929 }
 0x4c2   : > { %v1831_v12 = vpop.xlane.xlu1 %1830  ;;  %v2240_v54 = vmul.f32 %v4930_v32, %v6798_v39 }
 0x4c3   : > { %v2195_v3 = vpop.xlane.xlu2 %2194  ;;  %v7050_v60 = vpop.f32.mrf.mxu0 }
 0x4c4   : > { %4931 = vrcp.f32 %v2195_v3 }
 0x4c5   : > { %4933 = vrcp.f32 %v1831_v12 }
 0x4c8   : > { %3107 = vrot.lane.b32.xlu2 %v8396_v41, %s5348_s5 }
 0x4c9   : > { %v1833_v58 = vpop.xlane.xlu0 %1832 }
 0x4ca   : > { %v4932_v14 = vpop.eup %4931  ;;  %v7040_v50 = vpop.xlane.xlu1 %2490  ;;  %4935 = vrcp.f32 %v1833_v58 }
 0x4cb   : > { %v2241_v30 = vmul.f32 %v4932_v14, %v6822_v44  ;;  %2735 = vrot.lane.b32.xlu0 %v8397_v47, %s5349_s8  ;;  %v7046_v23 = vpop.xlane.xlu2 %2492  ;;  %v4934_v12 = vpop.eup %4933  ;;  %4937 = vrcp.f32 %v2197_v55  ;;  %v8399_v55 = vld [vmem:[#allocation24_spill] sm:$0xff] }
 0x4cc   : > { %v1874_v32 = vmul.f32 %v4934_v12, %v6818_v34 }
 0x4cd   : > { %v2256_v0 = vpack.c.bf16 %v2241_v30, %v2240_v54  ;;  %v7064_v54 = vpop.f32.mrf.mxu0 }
 0x4ce   : > { %2737 = vrot.lane.b32.xlu1 %v8396_v41, %s5349_s8  ;;  %8400 = vst [vmem:[#allocation52_spill] sm:$0xff] %v7064_v54 }
 0x4cf   : > { %2296 = vmatmul.bf16.vlgmr.msrb.gmra.mxu0 %v2256_v0 }
 0x4d0   : > { %3103 = vrot.lane.b32.xlu2 %v8398_v9, %s5348_s5  ;;  %v4936_v39 = vpop.eup %4935 }
 0x4d1   : > { %v7054_v44 = vpop.xlane.xlu0 %2494  ;;  %v1875_v45 = vmul.f32 %v4936_v39, %v6840_v53  ;;  %v4938_v14 = vpop.eup %4937  ;;  %v8401_v39 = vld [vmem:[#allocation22_spill] sm:$0xff] }
 0x4d2   : > { %v2199_v56 = vpop.xlane.xlu1 %2198  ;;  %v2242_v0 = vmul.f32 %v4938_v14, %v6820_v27 }
 0x4d3   : > { %2733 = vrot.lane.b32.xlu0 %v8398_v9, %s5349_s8  ;;  %v1835_v3 = vpop.xlane.xlu2 %1834  ;;  %4939 = vrcp.f32 %v2199_v56  ;;  %v1888_v41 = vpack.c.bf16 %v1875_v45, %v1874_v32 }
 0x4d4   : > { %4941 = vrcp.f32 %v1835_v3 }
 0x4d5   : > { %1936 = vmatmul.bf16.gmra.mxu2 %v1888_v41  ;;  %v7080_v41 = vpop.f32.mrf.mxu0 }
 0x4d6   : > { %3105 = vrot.lane.b32.xlu1 %v8397_v47, %s5348_s5  ;;  %8402 = vst [vmem:[#allocation56_spill] sm:$0xff] %v7080_v41 }
 0x4d8   : > { %3101 = vrot.lane.b32.xlu2 %v8399_v55, %s5348_s5 }
 0x4d9   : > { %v4940_v58 = vpop.eup %4939  ;;  %v2203_v34 = vpop.xlane.xlu0 %2202 }
 0x4da   : > { %v1837_v53 = vpop.xlane.xlu1 %1836  ;;  %v2243_v12 = vmul.f32 %v4940_v58, %v6867_v43  ;;  %v4942_v9 = vpop.eup %4941 }
 0x4db   : > { %2731 = vrot.lane.b32.xlu0 %v8399_v55, %s5349_s8  ;;  %v2201_v30 = vpop.xlane.xlu2 %2200  ;;  %4943 = vrcp.f32 %v1837_v53  ;;  %v1876_v27 = vmul.f32 %v4942_v9, %v6869_v11  ;;  %v8403_v53 = vld [vmem:[#allocation20_spill] sm:$0xff] }
 0x4dc   : > { %v2257_v47 = vpack.c.bf16 %v2243_v12, %v2242_v0  ;;  %4945 = vrcp.f32 %v2203_v34  ;;  %v7082_v34 = vpop.f32.mrf.mxu2 }
 0x4dd   : > { %4947 = vrcp.f32 %v2201_v30  ;;  %v7092_v9 = vpop.f32.mrf.mxu0 }
 0x4de   : > { %8404 = vst [vmem:[#allocation30_spill] sm:$0xff] %v7092_v9 }
 0x4df   : > { %2301 = vmatmul.bf16.gmra.mxu0 %v2257_v47 }
 0x4e0   : > { %3099 = vrot.lane.b32.xlu2 %v8401_v39, %s5348_s5 }
 0x4e1   : > { %v4944_v32 = vpop.eup %4943  ;;  %v1839_v45 = vpop.xlane.xlu0 %1838 }
 0x4e2   : > { %v7074_v56 = vpop.xlane.xlu1 %2496  ;;  %v1877_v43 = vmul.f32 %v4944_v32, %v6882_v36  ;;  %v4946_v14 = vpop.eup %4945  ;;  %4949 = vrcp.f32 %v1839_v45  ;;  %v8405_v32 = vld [vmem:[#allocation59_spill] sm:$0xff] }
 0x4e3   : > { %2729 = vrot.lane.b32.xlu0 %v8401_v39, %s5349_s8  ;;  %v7076_v3 = vpop.xlane.xlu2 %2498  ;;  %v4948_v58 = vpop.eup %4947  ;;  %v2245_v0 = vmul.f32 %v4946_v14, %v6880_v37  ;;  %v8406_v37 = vld [vmem:[#allocation16_spill] sm:$0xff] }
 0x4e4   : > { %v1889_v55 = vpack.c.bf16 %v1877_v43, %v1876_v27  ;;  %v2244_v30 = vmul.f32 %v4948_v58, %v6878_v24  ;;  %v7094_v39 = vpop.f32.mrf.mxu2  ;;  %v2514_v24 = vsub.f32 %v8405_v32, %v6996_v42 }
 0x4e5   : > { %v7104_v42 = vpop.f32.mrf.mxu0 }
 0x4e6   : > { %1941 = vmatmul.bf16.gmra.mxu2 %v1889_v55  ;;  %v2258_v47 = vpack.c.bf16 %v2245_v0, %v2244_v30  ;;  %v2530_v58 = vmul.f32 1.442695, %v2514_v24  ;;  %8407 = vst [vmem:[#allocation38_spill] sm:$0xff] %v7104_v42 }
 0x4e8   : > { %3097 = vrot.lane.b32.xlu2 %v8403_v53, %s5348_s5  ;;  %v4950_v27 = vpop.eup %4949 }
 0x4e9   : > { %v7088_v12 = vpop.xlane.xlu0 %2500 }
 0x4ea   : > { %v2205_v11 = vpop.xlane.xlu1 %2204 }
 0x4eb   : > { %2727 = vrot.lane.b32.xlu0 %v8403_v53, %s5349_s8  ;;  %v1841_v36 = vpop.xlane.xlu2 %1840  ;;  %v1878_v53 = vmul.f32 %v4950_v27, %v6890_v15 }
 0x4ec   : > { %4951 = vrcp.f32 %v1841_v36  ;;  %v8408_v36 = vld [vmem:[#allocation13_spill] sm:$0xff] }
 0x4ed   : > { %4953 = vrcp.f32 %v2205_v11 }
 0x4ef   : > { %2306 = vmatmul.bf16.gmra.mxu0 %v2258_v47  ;;  %v7108_v47 = vpop.f32.mrf.mxu2 }
 0x4f0   : > { %3095 = vrot.lane.b32.xlu2 %v8406_v37, %s5348_s5  ;;  %8409 = vst [vmem:[#allocation55_spill] sm:$0xff] %v7108_v47 }
 0x4f1   : > { %v2209_v45 = vpop.xlane.xlu0 %2208 }
 0x4f2   : > { %v4952_v43 = vpop.eup %4951  ;;  %v1843_v14 = vpop.xlane.xlu1 %1842 }
 0x4f3   : > { %2725 = vrot.lane.b32.xlu0 %v8406_v37, %s5349_s8  ;;  %v2207_v55 = vpop.xlane.xlu2 %2206  ;;  %v1879_v30 = vmul.f32 %v4952_v43, %v6915_v46  ;;  %v4954_v11 = vpop.eup %4953 }
 0x4f4   : > { %4955 = vrcp.f32 %v2207_v55  ;;  %v2246_v24 = vmul.f32 %v4954_v11, %v6911_v48  ;;  %v8411_v48 = vld [vmem:[#allocation12_spill] sm:$0xff] }
 0x4f5   : > { %v1890_v0 = vpack.c.bf16 %v1879_v30, %v1878_v53  ;;  %4957 = vpow2.f32 %v2530_v58 }
 0x4f6   : > { %4959 = vrcp.f32 %v1843_v14 }
 0x4f7   : > { %1946 = vmatmul.bf16.gmra.mxu2 %v1890_v0 }
 0x4f8   : > { %3093 = vrot.lane.b32.xlu2 %v8408_v36, %s5348_s5 }
 0x4f9   : > { %v1845_v32 = vpop.xlane.xlu0 %1844 }
 0x4fa   : > { %v4956_v37 = vpop.eup %4955  ;;  %v7112_v15 = vpop.xlane.xlu1 %2502  ;;  %4961 = vrcp.f32 %v1845_v32 }
 0x4fb   : > { %2723 = vrot.lane.b32.xlu0 %v8408_v36, %s5349_s8  ;;  %v7114_v46 = vpop.xlane.xlu2 %2504  ;;  %v2247_v27 = vmul.f32 %v4956_v37, %v6925_v7  ;;  %v7118_v43 = vpop.eup %4957  ;;  %4963 = vrcp.f32 %v2209_v45 }
 0x4fc   : > { %v4960_v14 = vpop.eup %4959  ;;  %v7120_v58 = vpop.f32.mrf.mxu0 }
 0x4fd   : > { %v2259_v55 = vpack.c.bf16 %v2247_v27, %v2246_v24  ;;  %8410 = vst [vmem:[#allocation39_spill] sm:$0xff] %v7120_v58  ;;  %v1880_v0 = vmul.f32 %v4960_v14, %v6929_v59  ;;  %v7129_v32 = vpop.f32.mrf.mxu2 }
 0x4fe   : > { %8412 = vst [vmem:[#allocation40_spill] sm:$0xff] %v7129_v32 }
 0x4ff   : > { %2311 = vmatmul.bf16.gmra.mxu0 %v2259_v55  ;;  %v8414_v55 = vld [vmem:[#allocation14_spill] sm:$0xff] }
 0x500   : > { %2562 = vadd.xlane.f32.xlu1 %v7118_v43  ;;  %v4962_v53 = vpop.eup %4961 }
 0x501   : > { %v7123_v30 = vpop.xlane.xlu0 %2506  ;;  %v1881_v36 = vmul.f32 %v4962_v53, %v6938_v19  ;;  %v4964_v24 = vpop.eup %4963 }
 0x502   : > { %v2211_v7 = vpop.xlane.xlu1 %2210  ;;  %v2248_v14 = vmul.f32 %v4964_v24, %v6927_v2 }
 0x503   : > { %2707 = vrot.lane.b32.xlu0 %v8411_v48, %s5349_s8  ;;  %v1847_v11 = vpop.xlane.xlu2 %1846  ;;  %4965 = vrcp.f32 %v2211_v7  ;;  %v1891_v37 = vpack.c.bf16 %v1881_v36, %v1880_v0 }
 0x504   : > { %4967 = vrcp.f32 %v1847_v11  ;;  %v7131_v45 = vpop.f32.mrf.mxu0 }
 0x505   : > { %8413 = vst [vmem:[#allocation44_spill] sm:$0xff] %v7131_v45  ;;  %v7137_v58 = vpop.f32.mrf.mxu2 }
 0x507   : > { %1951 = vmatmul.bf16.gmra.mxu2 %v1891_v37  ;;  %v2515_v37 = vsub.f32 %v6759_v20, %v7011_v40  ;;  %v8416_v40 = vld [vmem:[#allocation18_spill] sm:$0xff] }
 0x509   : > { %v4966_v27 = vpop.eup %4965  ;;  %v2215_v7 = vpop.xlane.xlu0 %2214 }
 0x50a   : > { %v1849_v59 = vpop.xlane.xlu1 %1848  ;;  %v2249_v53 = vmul.f32 %v4966_v27, %v6959_v49  ;;  %v4968_v36 = vpop.eup %4967 }
 0x50b   : > { %2709 = vrot.lane.b32.xlu0 %v8414_v55, %s5349_s8  ;;  %v2213_v19 = vpop.xlane.xlu2 %2212  ;;  %4969 = vrcp.f32 %v1849_v59  ;;  %v1882_v49 = vmul.f32 %v4968_v36, %v6961_v33 }
 0x50c   : > { %v2260_v0 = vpack.c.bf16 %v2249_v53, %v2248_v14  ;;  %4971 = vrcp.f32 %v2215_v7  ;;  %v7147_v24 = vpop.f32.mrf.mxu0 }
 0x50d   : > { %4973 = vrcp.f32 %v2213_v19  ;;  %8415 = vst [vmem:[#allocation25_spill] sm:$0xff] %v7147_v24  ;;  %v2532_v19 = vmul.f32 1.442695, %v2515_v37  ;;  %v7151_v53 = vpop.f32.mrf.mxu2  ;;  %v8438_v24 = vld [vmem:[#allocation23_spill] sm:$0xff] }
 0x50f   : > { %2316 = vmatmul.bf16.gmra.mxu0 %v2260_v0  ;;  %4975 = vpow2.f32 %v2532_v19 }
 0x511   : > { %v4970_v11 = vpop.eup %4969  ;;  %v1851_v20 = vpop.xlane.xlu0 %1850 }
 0x512   : > { %v1883_v2 = vmul.f32 %v4970_v11, %v6973_v62  ;;  %v7149_v27 = vpop.xlane.xlu1 %2508  ;;  %v4972_v14 = vpop.eup %4971  ;;  %4977 = vrcp.f32 %v1851_v20 }
 0x513   : > { %3079 = vrot.lane.b32.xlu0 %v8414_v55, %s5348_s5  ;;  %v7143_v45 = vpop.xlane.xlu2 %2510  ;;  %v4974_v7 = vpop.eup %4973  ;;  %v2251_v62 = vmul.f32 %v4972_v14, %v6971_v26 }
 0x514   : > { %v1892_v59 = vpack.c.bf16 %v1883_v2, %v1882_v49  ;;  %v2250_v33 = vmul.f32 %v4974_v7, %v6967_v6  ;;  %v7161_v11 = vpop.f32.mrf.mxu0 }
 0x515   : > { %v7159_v0 = vpop.f32.mrf.mxu2  ;;  %8418 = vst [vmem:[#allocation31_spill] sm:$0xff] %v7161_v11  ;;  %v7163_v49 = vpop.eup %4975 }
 0x516   : > { %8417 = vst [vmem:[#allocation27_spill] sm:$0xff] %v7159_v0  ;;  %v2261_v36 = vpack.c.bf16 %v2251_v62, %v2250_v33  ;;  %v8421_v62 = vld [vmem:[#allocation21_spill] sm:$0xff] }
 0x517   : > { %1956 = vmatmul.bf16.gmra.mxu2 %v1892_v59 }
 0x519   : > { %3077 = vrot.lane.b32.xlu1 %v8411_v48, %s5348_s5  ;;  %v4978_v48 = vpop.eup %4977  ;;  %v7170_v14 = vpop.xlane.xlu0 %2512 }
 0x51a   : > { %v2217_v37 = vpop.xlane.xlu1 %2216  ;;  %v1884_v2 = vmul.f32 %v4978_v48, %v6984_v22 }
 0x51b   : > { %2711 = vrot.lane.b32.xlu0 %v8416_v40, %s5349_s8  ;;  %v1853_v55 = vpop.xlane.xlu2 %1852 }
 0x51c   : > { %4979 = vrcp.f32 %v1853_v55  ;;  %v7174_v33 = vpop.f32.mrf.mxu0 }
 0x51d   : > { %4981 = vrcp.f32 %v2217_v37  ;;  %v7172_v20 = vpop.f32.mrf.mxu2  ;;  %8420 = vst [vmem:[#allocation22_spill] sm:$0xff] %v7174_v33 }
 0x51e   : > { %8419 = vst [vmem:[#allocation24_spill] sm:$0xff] %v7172_v20 }
 0x51f   : > { %2321 = vmatmul.bf16.gmra.mxu0 %v2261_v36 }
 0x521   : > { %2564 = vadd.xlane.f32.xlu2 %v7163_v49  ;;  %3081 = vrot.lane.b32.xlu1 %v8416_v40, %s5348_s5 }
 0x522   : > { %v4980_v6 = vpop.eup %4979 }
 0x523   : > { %v2219_v26 = vpop.xlane.xlu2 %2218  ;;  %v1885_v59 = vmul.f32 %v4980_v6, %v6998_v61  ;;  %v4982_v7 = vpop.eup %4981 }
 0x524   : > { %4983 = vrcp.f32 %v2219_v26  ;;  %v2252_v36 = vmul.f32 %v4982_v7, %v7002_v31  ;;  %v7183_v26 = vpop.f32.mrf.mxu0  ;;  %v2516_v31 = vsub.f32 %v6796_v8, %v7026_v29  ;;  %v8425_v8 = vld [vmem:[#allocation28_spill] sm:$0xff] }
 0x525   : > { %v1893_v19 = vpack.c.bf16 %v1885_v59, %v1884_v2  ;;  %8422 = vst [vmem:[#allocation20_spill] sm:$0xff] %v7183_v26 }
 0x527   : > { %1961 = vmatmul.bf16.gmra.mxu2 %v1893_v19  ;;  %v2534_v19 = vmul.f32 1.442695, %v2516_v31 }
 0x528   : > { %v2223_v37 = vpop.xlane.xlu1 %2222 }
 0x529   : > { %2713 = vrot.lane.b32.xlu1 %v8421_v62, %s5349_s8  ;;  %4985 = vrcp.f32 %v2223_v37 }
 0x52a   : > { %v4984_v40 = vpop.eup %4983  ;;  %v2221_v6 = vpop.xlane.xlu0 %2220 }
 0x52b   : > { %v3108_v55 = vpop.permute.xlu2 %3107  ;;  %v2253_v22 = vmul.f32 %v4984_v40, %v7015_v28  ;;  %4987 = vrcp.f32 %v2221_v6  ;;  %v8423_v28 = vld [vmem:[#allocation34_spill] sm:$0xff]  ;;  %v8427_v6 = vld [vmem:[#allocation37_spill] sm:$0xff] }
 0x52c   : > { %v3155_v61 = vsel %vm518_vm0, %v3108_v55, 0  ;;  %4989 = vpow2.f32 %v2534_v19 }
 0x52d   : > { %3157 = vmatpush.bf16.xpose.msra.mxu1 %v3155_v61  ;;  %v2262_v48 = vpack.c.bf16 %v2253_v22, %v2252_v36 }
 0x52f   : > { %2326 = vmatmul.bf16.gmra.mxu0 %v2262_v48  ;;  %v4986_v2 = vpop.eup %4985 }
 0x530   : > { %v2255_v40 = vmul.f32 %v4986_v2, %v7018_v1 }
 0x531   : > { %3083 = vrot.lane.b32.xlu1 %v8421_v62, %s5348_s5  ;;  %v4988_v59 = vpop.eup %4987 }
 0x532   : > { %v2254_v7 = vmul.f32 %v4988_v59, %v7023_v21  ;;  %v7200_v48 = vpop.eup %4989 }
 0x533   : > { %v3104_v61 = vpop.permute.xlu2 %3103 }
 0x534   : > { %v2263_v36 = vpack.c.bf16 %v2255_v40, %v2254_v7  ;;  %v8428_v7 = vld [vmem:[#allocation29_spill] sm:$0xff] }
 0x539   : > { %2715 = vrot.lane.b32.xlu2 %v8423_v28, %s5349_s8  ;;  %3085 = vrot.lane.b32.xlu1 %v8423_v28, %s5348_s5 }
 0x53b   : > { %v7193_v55 = vpop.f32.mrf.mxu0  ;;  %v3102_v28 = vpop.permute.xlu2 %3101 }
 0x53c   : > { %8424 = vst [vmem:[#allocation59_spill] sm:$0xff] %v7193_v55  ;;  %v8436_v55 = vld [vmem:[#allocation17_spill] sm:$0xff] }
 0x53d   : > { %v2736_v62 = vpop.permute.xlu0 %2735 }
 0x53e   : > { %v2782_v2 = vsel %vm518_vm0, %v2736_v62, 0  ;;  %v2517_v62 = vsub.f32 %v6801_v18, %v7029_v38  ;;  %v8431_v38 = vld [vmem:[#allocation42_spill] sm:$0xff] }
 0x53f   : > { %2331 = vmatmul.bf16.gmra.mxu0 %v2263_v36  ;;  %v3149_v36 = vsel %vm518_vm0, %v3104_v61, 0  ;;  %v3146_v61 = vsel %vm518_vm0, %v3102_v28, 0 }
 0x540   : > { %v2738_v22 = vpop.permute.xlu1 %2737 }
 0x541   : > { %2648 = vrot.lane.b32.xlu2 %v8425_v8, %s5347_s30  ;;  %v2785_v29 = vsel %vm518_vm0, %v2738_v22, 0 }
 0x542   : > { %2787 = vmatpush.bf16.xpose.msrb.mxu3 %v2785_v29 }
 0x543   : > { %v7198_v37 = vpop.f32.mrf.mxu0  ;;  %v3100_v29 = vpop.permute.xlu2 %3099 }
 0x544   : > { %8426 = vst [vmem:[#allocation16_spill] sm:$0xff] %v7198_v37 }
 0x545   : > { %2566 = vadd.xlane.f32.xlu0 %v7200_v48  ;;  %v2734_v1 = vpop.permute.xlu0 %2733 }
 0x546   : > { %v2779_v40 = vsel %vm518_vm0, %v2734_v1, 0 }
 0x548   : > { %v3106_v21 = vpop.permute.xlu1 %3105 }
 0x549   : > { %3087 = vrot.lane.b32.xlu2 %v8427_v6, %s5348_s5  ;;  %v3152_v31 = vsel %vm518_vm0, %v3106_v21, 0  ;;  %v2536_v21 = vmul.f32 1.442695, %v2517_v62 }
 0x54a   : > { %2788 = vmatpush.bf16.xpose.msrb.mxu3 %v2782_v2  ;;  %3158 = vmatpush.bf16.xpose.msra.mxu1 %v3152_v31  ;;  %v8429_v31 = vld [vmem:[#allocation32_spill] sm:$0xff] }
 0x54b   : > { %4991 = vpow2.f32 %v2536_v21  ;;  %v3098_v18 = vpop.permute.xlu2 %3097  ;;  %v8434_v21 = vld [vmem:[#allocation19_spill] sm:$0xff] }
 0x54c   : > { %v7207_v59 = vpop.f32.mrf.mxu0 }
 0x54d   : > { %v2732_v19 = vpop.permute.xlu0 %2731 }
 0x54e   : > { %v2776_v1 = vsel %vm518_vm0, %v2732_v19, 0 }
 0x551   : > { %2646 = vrot.lane.b32.xlu2 %v8428_v7, %s5347_s30  ;;  %v7231_v37 = vpop.eup %4991 }
 0x552   : > { %2789 = vmatpush.bf16.xpose.msrb.mxu3 %v2779_v40  ;;  %3159 = vmatpush.bf16.xpose.msra.mxu1 %v3149_v36  ;;  %v8432_v36 = vld [vmem:[#allocation35_spill] sm:$0xff] }
 0x554   : > { %v7215_v22 = vpop.f32.mrf.mxu0 }
 0x555   : > { %v2730_v2 = vpop.permute.xlu0 %2729 }
 0x556   : > { %v2773_v62 = vsel %vm518_vm0, %v2730_v2, 0  ;;  %v3140_v2 = vsel %vm518_vm0, %v3098_v18, 0 }
 0x559   : > { %2644 = vrot.lane.b32.xlu2 %v8429_v31, %s5347_s30  ;;  %2717 = vrot.lane.b32.xlu0 %v8427_v6, %s5349_s8  ;;  %v3143_v6 = vsel %vm518_vm0, %v3100_v29, 0  ;;  %v3096_v29 = vpop.permute.xlu2 %3095 }
 0x55a   : > { %2790 = vmatpush.bf16.xpose.msrb.mxu3 %v2776_v1  ;;  %3160 = vmatpush.bf16.xpose.msra.mxu1 %v3146_v61 }
 0x55c   : > { %v7223_v40 = vpop.f32.mrf.mxu0 }
 0x55d   : > { %8430 = vst [vmem:[#allocation13_spill] sm:$0xff] %v7223_v40  ;;  %v2728_v19 = vpop.permute.xlu0 %2727 }
 0x55e   : > { %v2770_v1 = vsel %vm518_vm0, %v2728_v19, 0 }
 0x561   : > { %2719 = vrot.lane.b32.xlu2 %v8431_v38, %s5349_s8  ;;  %2642 = vrot.lane.b32.xlu0 %v8432_v36, %s5347_s30  ;;  %v3094_v18 = vpop.permute.xlu2 %3093 }
 0x562   : > { %2791 = vmatpush.bf16.xpose.msrb.mxu3 %v2773_v62  ;;  %3161 = vmatpush.bf16.xpose.msra.mxu1 %v3143_v6  ;;  %v8435_v6 = vld [vmem:[#allocation15_spill] sm:$0xff]  ;;  %v3134_v11 = vsel %vm518_vm0, %v3094_v18, 0  ;;  %v2518_v18 = vsub.f32 %v6838_v35, %v7040_v50 }
 0x563   : > { %2568 = vadd.xlane.f32.xlu1 %v7231_v37 }
 0x564   : > { %v7234_v28 = vpop.f32.mrf.mxu0  ;;  %v2538_v42 = vmul.f32 1.442695, %v2518_v18 }
 0x565   : > { %8433 = vst [vmem:[#allocation12_spill] sm:$0xff] %v7234_v28  ;;  %v2726_v61 = vpop.permute.xlu0 %2725 }
 0x566   : > { %v2767_v26 = vsel %vm518_vm0, %v2726_v61, 0  ;;  %4993 = vpow2.f32 %v2538_v42  ;;  %v2520_v42 = vsub.f32 %v6865_v13, %v7054_v44  ;;  %v2525_v13 = vsub.f32 %v6944_v10, %v7114_v46 }
 0x569   : > { %2638 = vrot.lane.b32.xlu2 %v8434_v21, %s5347_s30  ;;  %3089 = vrot.lane.b32.xlu0 %v8431_v38, %s5348_s5  ;;  %v3137_v38 = vsel %vm518_vm0, %v3096_v29, 0 }
 0x56a   : > { %2792 = vmatpush.bf16.xpose.msrb.mxu3 %v2770_v1  ;;  %3162 = vmatpush.bf16.xpose.msra.mxu1 %v3140_v2  ;;  %v8437_v2 = vld [vmem:[#allocation47_spill] sm:$0xff] }
 0x56c   : > { %v7242_v62 = vpop.f32.mrf.mxu0  ;;  %v7283_v18 = vpop.eup %4993 }
 0x56d   : > { %v2724_v1 = vpop.permute.xlu0 %2723 }
 0x56e   : > { %v2764_v33 = vsel %vm518_vm0, %v2724_v1, 0 }
 0x571   : > { %2634 = vrot.lane.b32.xlu2 %v8435_v6, %s5347_s30  ;;  %2636 = vrot.lane.b32.xlu0 %v8436_v55, %s5347_s30 }
 0x572   : > { %2793 = vmatpush.bf16.xpose.msrb.mxu3 %v2767_v26  ;;  %3163 = vmatpush.bf16.xpose.msra.mxu1 %v3137_v38 }
 0x573   : > { %v7261_v29 = vpop.xlane.xlu1 %2562 }
 0x574   : > { %v7250_v19 = vpop.f32.mrf.mxu0 }
 0x575   : > { %v2708_v26 = vpop.permute.xlu0 %2707 }
 0x579   : > { %2721 = vrot.lane.b32.xlu0 %v8437_v2, %s5349_s8 }
 0x57a   : > { %2794 = vmatpush.bf16.xpose.msrb.mxu3 %v2764_v33  ;;  %3164 = vmatpush.bf16.xpose.msra.mxu1 %v3134_v11 }
 0x57c   : > { %2640 = vrot.lane.b32.xlu1 %v8438_v24, %s5347_s30  ;;  %v7258_v61 = vpop.f32.mrf.mxu0 }
 0x57d   : > { %8439 = vst [vmem:[#allocation14_spill] sm:$0xff] %v7258_v61  ;;  %v2710_v11 = vpop.permute.xlu0 %2709 }
 0x581   : > { %4283 = vmatmul.msk.bf16.vlgmr.msrb.gmra.mxu3 %vm518_vm0, %v2708_v26  ;;  %v2521_v26 = vsub.f32 %v6895_v16, %v7074_v56  ;;  %v2522_v16 = vsub.f32 %v6897_v5, %v7076_v3  ;;  %v2542_v5 = vmul.f32 1.442695, %v2520_v42 }
 0x584   : > { %3091 = vrot.lane.b32.xlu1 %v8437_v2, %s5348_s5  ;;  %v7265_v38 = vpop.f32.mrf.mxu0  ;;  %v2519_v2 = vsub.f32 %v6843_v25, %v7046_v23  ;;  %v2523_v25 = vsub.f32 %v6913_v52, %v7088_v12  ;;  %v2526_v12 = vsub.f32 %v6957_v57, %v7123_v30  ;;  %v2552_v57 = vmul.f32 1.442695, %v2525_v13 }
 0x585   : > { %8440 = vst [vmem:[#allocation18_spill] sm:$0xff] %v7265_v38  ;;  %v3080_v35 = vpop.permute.xlu0 %3079 }
 0x586   : > { %v2540_v61 = vmul.f32 1.442695, %v2519_v2  ;;  %v2546_v2 = vmul.f32 1.442695, %v2522_v16  ;;  %v2554_v16 = vmul.f32 1.442695, %v2526_v12 }
 0x58b   : > { %v3078_v33 = vpop.permute.xlu1 %3077 }
 0x58c   : > { %4291 = vmatmul.msk.bf16.vlgmr.msra.gmra.mxu1 %vm518_vm0, %v3078_v33  ;;  %v7270_v1 = vpop.f32.mrf.mxu0  ;;  %v2544_v33 = vmul.f32 1.442695, %v2521_v26  ;;  %v2548_v26 = vmul.f32 1.442695, %v2523_v25  ;;  %v2524_v25 = vsub.f32 %v6942_v17, %v7112_v15 }
 0x58d   : > { %8441 = vst [vmem:[#allocation21_spill] sm:$0xff] %v7270_v1  ;;  %v2712_v50 = vpop.permute.xlu0 %2711 }
 0x58e   : > { %4995 = vpow2.f32 %v2544_v33  ;;  %v2550_v46 = vmul.f32 1.442695, %v2524_v25 }
 0x58f   : > { %4997 = vpow2.f32 %v2540_v61 }
 0x590   : > { %4999 = vpow2.f32 %v2548_v26  ;;  %v2528_v26 = vsub.f32 %v6988_v51, %v7143_v45 }
 0x591   : > { %4284 = vmatmul.msk.bf16.gmra.mxu3 %vm518_vm0, %v2710_v11  ;;  %v7285_v11 = vpop.f32.mrf.mxu2  ;;  %5001 = vpow2.f32 %v2546_v2 }
 0x592   : > { %8443 = vst [vmem:[#allocation28_spill] sm:$0xff] %v7285_v11  ;;  %5003 = vpow2.f32 %v2542_v5  ;;  %v8449_v5 = vld [vmem:[#allocation43_spill] sm:$0xff]  ;;  %v2558_v13 = vmul.f32 1.442695, %v2528_v26 }
 0x593   : > { %5005 = vpow2.f32 %v2554_v16  ;;  %v2527_v12 = vsub.f32 %v8449_v5, %v7149_v27 }
 0x594   : > { %v7277_v9 = vpop.xlane.xlu2 %2564  ;;  %v7279_v38 = vpop.f32.mrf.mxu0  ;;  %5007 = vpow2.f32 %v2552_v57 }
 0x595   : > { %8442 = vst [vmem:[#allocation34_spill] sm:$0xff] %v7279_v38  ;;  %v7299_v33 = vpop.eup %4995  ;;  %5009 = vpow2.f32 %v2550_v46  ;;  %v2556_v45 = vmul.f32 1.442695, %v2527_v12 }
 0x596   : > { %v7302_v52 = vpop.eup %4997  ;;  %5011 = vpow2.f32 %v2558_v13 }
 0x597   : > { %v7318_v30 = vpop.eup %4999  ;;  %5013 = vpow2.f32 %v2556_v45 }
 0x598   : > { %v7320_v42 = vpop.eup %5001  ;;  %5015 = vrcp.f32 %v7277_v9 }
 0x599   : > { %v7305_v3 = vpop.f32.mrf.mxu2  ;;  %v7329_v17 = vpop.eup %5003  ;;  %5017 = vrcp.f32 %v7261_v29 }
 0x59a   : > { %2570 = vadd.xlane.f32.xlu2 %v7283_v18  ;;  %8445 = vst [vmem:[#allocation29_spill] sm:$0xff] %v7305_v3  ;;  %v7336_v25 = vpop.eup %5005 }
 0x59b   : > { %v7339_v51 = vpop.eup %5007 }
 0x59c   : > { %v7292_v23 = vpop.permute.xlu2 %2715  ;;  %4292 = vmatmul.msk.bf16.gmra.mxu1 %vm518_vm0, %v3080_v35  ;;  %v7295_v56 = vpop.f32.mrf.mxu0 }
 0x59d   : > { %8444 = vst [vmem:[#allocation37_spill] sm:$0xff] %v7295_v56  ;;  %v3082_v35 = vpop.permute.xlu1 %3081  ;;  %v7343_v16 = vpop.eup %5009 }
 0x59e   : > { %v7352_v26 = vpop.eup %5011 }
 0x59f   : > { %v7356_v13 = vpop.eup %5013 }
 0x5a1   : > { %4285 = vmatmul.msk.bf16.gmra.mxu3 %vm518_vm0, %v2712_v50  ;;  %v7323_v10 = vpop.f32.mrf.mxu2 }
 0x5a2   : > { %2576 = vadd.xlane.f32.xlu2 %v7299_v33  ;;  %8447 = vst [vmem:[#allocation42_spill] sm:$0xff] %v7323_v10 }
 0x5a3   : > { %2572 = vadd.xlane.f32.xlu0 %v7302_v52 }
 0x5a4   : > { %v2649_v44 = vpop.permute.xlu2 %2648  ;;  %v7312_v61 = vpop.f32.mrf.mxu0 }
 0x5a5   : > { %8446 = vst [vmem:[#allocation32_spill] sm:$0xff] %v7312_v61  ;;  %2658 = vmatpush.bf16.msrb.mxu2 %v2649_v44  ;;  %v2714_v44 = vpop.permute.xlu1 %2713 }
 0x5a9   : > { %v7345_v57 = vpop.f32.mrf.mxu2 }
 0x5aa   : > { %2580 = vadd.xlane.f32.xlu2 %v7318_v30  ;;  %8450 = vst [vmem:[#allocation19_spill] sm:$0xff] %v7345_v57 }
 0x5ab   : > { %2578 = vadd.xlane.f32.xlu0 %v7320_v42 }
 0x5ac   : > { %v3088_v2 = vpop.permute.xlu2 %3087  ;;  %4293 = vmatmul.msk.bf16.gmra.mxu1 %vm518_vm0, %v3082_v35  ;;  %v7331_v15 = vpop.f32.mrf.mxu0 }
 0x5ad   : > { %8448 = vst [vmem:[#allocation35_spill] sm:$0xff] %v7331_v15  ;;  %v3084_v5 = vpop.permute.xlu1 %3083 }
 0x5ae   : > { %2574 = vadd.xlane.f32.xlu1 %v7329_v17 }
 0x5b1   : > { %4286 = vmatmul.msk.bf16.gmra.mxu3 %vm518_vm0, %v2714_v44  ;;  %v7358_v44 = vpop.f32.mrf.mxu2 }
 0x5b2   : > { %2586 = vadd.xlane.f32.xlu2 %v7336_v25  ;;  %8452 = vst [vmem:[#allocation17_spill] sm:$0xff] %v7358_v44 }
 0x5b3   : > { %2584 = vadd.xlane.f32.xlu0 %v7339_v51 }
 0x5b4   : > { %v2647_v35 = vpop.permute.xlu2 %2646  ;;  %v7347_v27 = vpop.f32.mrf.mxu0 }
 0x5b5   : > { %8451 = vst [vmem:[#allocation15_spill] sm:$0xff] %v7347_v27  ;;  %2659 = vmatpush.bf16.msrb.mxu2 %v2647_v35  ;;  %v3086_v46 = vpop.permute.xlu1 %3085 }
 0x5b6   : > { %2582 = vadd.xlane.f32.xlu1 %v7343_v16 }
 0x5b8   : > { %v2567_v35 = vpop.xlane.xlu0 %2566 }
 0x5b9   : > { %v7363_v45 = vpop.f32.mrf.mxu2 }
 0x5ba   : > { %8453 = vst [vmem:[#allocation47_spill] sm:$0xff] %v7363_v45 }
 0x5bb   : > { %2590 = vadd.xlane.f32.xlu0 %v7352_v26 }
 0x5bc   : > { %v2645_v12 = vpop.permute.xlu2 %2644  ;;  %4294 = vmatmul.msk.bf16.gmra.mxu1 %vm518_vm0, %v3084_v5 }
 0x5bd   : > { %2660 = vmatpush.bf16.msrb.mxu2 %v2645_v12 }
 0x5be   : > { %2588 = vadd.xlane.f32.xlu1 %v7356_v13 }
 0x5c1   : > { %4287 = vmatmul.msk.bf16.gmra.mxu3 %vm518_vm0, %v7292_v23  ;;  %v7366_v15 = vpop.f32.mrf.mxu2 }
 0x5c2   : > { %8454 = vst [vmem:[#allocation23_spill] sm:$0xff] %v7366_v15 }
 0x5c4   : > { %v2720_v44 = vpop.permute.xlu2 %2719 }
 0x5c9   : > { %v7369_v27 = vpop.f32.mrf.mxu2 }
 0x5ca   : > { %8455 = vst [vmem:[#allocation43_spill] sm:$0xff] %v7369_v27 }
 0x5cb   : > { %v2718_v50 = vpop.permute.xlu0 %2717 }
 0x5cc   : > { %4295 = vmatmul.msk.bf16.gmra.mxu1 %vm518_vm0, %v3086_v46 }
 0x5d1   : > { %4288 = vmatmul.msk.bf16.gmra.mxu3 %vm518_vm0, %v2718_v50  ;;  %v7373_v23 = vpop.f32.mrf.mxu2  ;;  %v2639_v50 = vpop.permute.xlu2 %2638 }
 0x5d3   : > { %v2643_v5 = vpop.permute.xlu0 %2642 }
 0x5d4   : > { %2661 = vmatpush.bf16.msrb.mxu2 %v2643_v5 }
 0x5d6   : > { %v2569_v45 = vpop.xlane.xlu1 %2568 }
 0x5d7   : > { %5019 = vrcp.f32 %v2569_v45 }
 0x5d8   : > { %5021 = vrcp.f32 %v2567_v35 }
 0x5d9   : > { %v7376_v15 = vpop.f32.mrf.mxu2  ;;  %v2635_v57 = vpop.permute.xlu2 %2634 }
 0x5db   : > { %v3090_v12 = vpop.permute.xlu0 %3089 }
 0x5dc   : > { %4296 = vmatmul.msk.bf16.gmra.mxu1 %vm518_vm0, %v3088_v2  ;;  %v5016_v2 = vpop.eup %5015 }
 0x5dd   : > { %v2611_v27 = vmul.f32 %v5016_v2, %v7163_v49 }
 0x5e1   : > { %4289 = vmatmul.msk.bf16.gmra.mxu3 %vm518_vm0, %v2720_v44  ;;  %v5018_v44 = vpop.eup %5017  ;;  %v7382_v61 = vpop.f32.mrf.mxu2 }
 0x5e3   : > { %v2637_v56 = vpop.permute.xlu0 %2636 }
 0x5e9   : > { %v7386_v29 = vpop.f32.mrf.mxu2 }
 0x5eb   : > { %v2722_v5 = vpop.permute.xlu0 %2721 }
 0x5ec   : > { %4297 = vmatmul.msk.bf16.gmra.mxu1 %vm518_vm0, %v3090_v12  ;;  %v2610_v12 = vmul.f32 %v5018_v44, %v7118_v43 }
 0x5ee   : > { %v2641_v46 = vpop.permute.xlu1 %2640  ;;  %v2626_v9 = vpack.c.bf16 %v2611_v27, %v2610_v12  ;;  %v8457_v27 = vld [vmem:[#allocation57_spill] sm:$0xff] }
 0x5ef   : > { %2662 = vmatpush.bf16.msrb.mxu2 %v2641_v46  ;;  %v2529_v35 = vsub.f32 %v8457_v27, %v7170_v14 }
 0x5f1   : > { %4290 = vmatmul.msk.bf16.gmra.mxu3 %vm518_vm0, %v2722_v5  ;;  %v2560_v12 = vmul.f32 1.442695, %v2529_v35 }
 0x5f3   : > { %2663 = vmatpush.bf16.msrb.mxu2 %v2639_v50  ;;  %v5020_v50 = vpop.eup %5019  ;;  %5023 = vpow2.f32 %v2560_v12 }
 0x5f4   : > { %v5022_v49 = vpop.eup %5021  ;;  %v2613_v43 = vmul.f32 %v5020_v50, %v7231_v37 }
 0x5f6   : > { %v3092_v10 = vpop.permute.xlu1 %3091 }
 0x5f7   : > { %2664 = vmatpush.bf16.msrb.mxu2 %v2637_v56 }
 0x5fb   : > { %2665 = vmatpush.bf16.msrb.mxu2 %v2635_v57  ;;  %v2612_v57 = vmul.f32 %v5022_v49, %v7200_v48 }
 0x5fc   : > { %4298 = vmatmul.msk.bf16.gmra.mxu1 %vm518_vm0, %v3092_v10  ;;  %v7395_v10 = vpop.f32.mrf.mxu2 }
 0x5fd   : > { %8456 = vst [vmem:[#allocation64_spill] sm:$0xff] %v7395_v10  ;;  %v2627_v44 = vpack.c.bf16 %v2613_v43, %v2612_v57  ;;  %v7408_v43 = vpop.eup %5023 }
 0x5fe   : > { %2666 = vmatmul.bf16.vlgmr.msrb.gmra.mxu2 %v2626_v9 }
 0x604   : > { %v2796_v46 = vpop.f32.mrf.mxu3  ;;  %v7406_v50 = vpop.f32.mrf.mxu2 }
 0x605   : > { %v7388_v56 = vmul.f32 0.25, %v2796_v46  ;;  %8458 = vst [vmem:[#allocation57_spill] sm:$0xff] %v7406_v50 }
 0x607   : > { %2852 = vmax.xlane.f32.xlu0 %v7388_v56 }
 0x609   : > { %v3166_v5 = vpop.f32.mrf.mxu1 }
 0x60a   : > { %v7392_v2 = vmul.f32 0.25, %v3166_v5 }
 0x60c   : > { %3222 = vmax.xlane.f32.xlu2 %v7392_v2  ;;  %v2798_v45 = vpop.f32.mrf.mxu3  ;;  %v7416_v12 = vpop.f32.mrf.mxu2 }
 0x60d   : > { %v2571_v46 = vpop.xlane.xlu2 %2570  ;;  %v7400_v1 = vmul.f32 0.25, %v2798_v45  ;;  %8459 = vst [vmem:[#allocation65_spill] sm:$0xff] %v7416_v12 }
 0x60e   : > { %2671 = vmatmul.bf16.gmra.mxu2 %v2627_v44  ;;  %5025 = vrcp.f32 %v2571_v46 }
 0x611   : > { %v3168_v9 = vpop.f32.mrf.mxu1 }
 0x612   : > { %v7402_v37 = vmul.f32 0.25, %v3168_v9 }
 0x614   : > { %3224 = vmax.xlane.f32.xlu1 %v7402_v37  ;;  %2854 = vmax.xlane.f32.xlu2 %v7400_v1  ;;  %v2801_v48 = vpop.f32.mrf.mxu3  ;;  %v5026_v57 = vpop.eup %5025 }
 0x615   : > { %v2614_v45 = vmul.f32 %v5026_v57, %v7283_v18  ;;  %v2577_v38 = vpop.xlane.xlu2 %2576  ;;  %v7418_v3 = vmul.f32 0.25, %v2801_v48  ;;  %v7427_v57 = vpop.f32.mrf.mxu2 }
 0x616   : > { %v2573_v14 = vpop.xlane.xlu0 %2572  ;;  %8460 = vst [vmem:[#allocation66_spill] sm:$0xff] %v7427_v57 }
 0x617   : > { %5027 = vrcp.f32 %v2573_v14 }
 0x619   : > { %v3171_v49 = vpop.f32.mrf.mxu1 }
 0x61a   : > { %v7410_v5 = vmul.f32 0.25, %v3171_v49 }
 0x61c   : > { %2592 = vadd.xlane.f32.xlu1 %v7408_v43  ;;  %v2803_v27 = vpop.f32.mrf.mxu3  ;;  %3226 = vmax.xlane.f32.xlu0 %v7410_v5 }
 0x61d   : > { %v5028_v35 = vpop.eup %5027  ;;  %v7420_v49 = vmul.f32 0.25, %v2803_v27  ;;  %v7442_v20 = vpop.f32.mrf.mxu2 }
 0x61e   : > { %v2615_v44 = vmul.f32 %v5028_v35, %v7302_v52  ;;  %v2579_v57 = vpop.xlane.xlu0 %2578  ;;  %8461 = vst [vmem:[#allocation67_spill] sm:$0xff] %v7442_v20 }
 0x620   : > { %v2628_v9 = vpack.c.bf16 %v2615_v44, %v2614_v45 }
 0x621   : > { %v2575_v46 = vpop.xlane.xlu1 %2574  ;;  %v3173_v14 = vpop.f32.mrf.mxu1 }
 0x622   : > { %2676 = vmatmul.bf16.gmra.mxu2 %v2628_v9  ;;  %v7422_v11 = vmul.f32 0.25, %v3173_v14  ;;  %5029 = vrcp.f32 %v2575_v46  ;;  %v2581_v14 = vpop.xlane.xlu2 %2580 }
 0x623   : > { %5031 = vrcp.f32 %v2577_v38 }
 0x624   : > { %2856 = vmax.xlane.f32.xlu1 %v7418_v3  ;;  %2858 = vmax.xlane.f32.xlu0 %v7420_v49  ;;  %v2806_v18 = vpop.f32.mrf.mxu3  ;;  %5033 = vrcp.f32 %v2581_v14 }
 0x625   : > { %3228 = vmax.xlane.f32.xlu2 %v7422_v11  ;;  %v7431_v45 = vmul.f32 0.25, %v2806_v18  ;;  %5035 = vrcp.f32 %v2579_v57 }
 0x628   : > { %v5030_v52 = vpop.eup %5029 }
 0x629   : > { %v3176_v35 = vpop.f32.mrf.mxu1  ;;  %v5032_v27 = vpop.eup %5031  ;;  %v2616_v9 = vmul.f32 %v5030_v52, %v7329_v17 }
 0x62a   : > { %v7429_v48 = vmul.f32 0.25, %v3176_v35  ;;  %v2617_v38 = vmul.f32 %v5032_v27, %v7299_v33  ;;  %v5034_v17 = vpop.eup %5033  ;;  %v7447_v27 = vpop.f32.mrf.mxu2 }
 0x62b   : > { %v5036_v52 = vpop.eup %5035  ;;  %v2619_v33 = vmul.f32 %v5034_v17, %v7318_v30  ;;  %8462 = vst [vmem:[#allocation68_spill] sm:$0xff] %v7447_v27  ;;  %v2583_v0 = vpop.xlane.xlu1 %2582 }
 0x62c   : > { %3230 = vmax.xlane.f32.xlu0 %v7429_v48  ;;  %v2808_v44 = vpop.f32.mrf.mxu3  ;;  %v2629_v35 = vpack.c.bf16 %v2617_v38, %v2616_v9  ;;  %5037 = vrcp.f32 %v2583_v0 }
 0x62d   : > { %2860 = vmax.xlane.f32.xlu2 %v7431_v45  ;;  %v7436_v46 = vmul.f32 0.25, %v2808_v44  ;;  %v2618_v44 = vmul.f32 %v5036_v52, %v7320_v42  ;;  %v2587_v52 = vpop.xlane.xlu2 %2586 }
 0x62f   : > { %2862 = vmax.xlane.f32.xlu1 %v7436_v46  ;;  %v2630_v9 = vpack.c.bf16 %v2619_v33, %v2618_v44 }
 0x631   : > { %v3178_v12 = vpop.f32.mrf.mxu1 }
 0x632   : > { %2681 = vmatmul.bf16.gmra.mxu2 %v2629_v35  ;;  %v7440_v18 = vmul.f32 0.25, %v3178_v12  ;;  %v2585_v12 = vpop.xlane.xlu0 %2584  ;;  %v7451_v57 = vpop.f32.mrf.mxu2 }
 0x633   : > { %5039 = vrcp.f32 %v2585_v12  ;;  %8463 = vst [vmem:[#allocation69_spill] sm:$0xff] %v7451_v57  ;;  %v5038_v30 = vpop.eup %5037  ;;  %v2589_v35 = vpop.xlane.xlu1 %2588 }
 0x634   : > { %v2620_v38 = vmul.f32 %v5038_v30, %v7343_v16  ;;  %5041 = vrcp.f32 %v2589_v35 }
 0x635   : > { %3232 = vmax.xlane.f32.xlu2 %v7440_v18  ;;  %5043 = vrcp.f32 %v2587_v52 }
 0x639   : > { %v5040_v42 = vpop.eup %5039  ;;  %v3181_v12 = vpop.f32.mrf.mxu1 }
 0x63a   : > { %v2621_v14 = vmul.f32 %v5040_v42, %v7339_v51  ;;  %v7465_v17 = vpop.f32.mrf.mxu2  ;;  %v7481_v42 = vmul.f32 0.25, %v3181_v12 }
 0x63b   : > { %8464 = vst [vmem:[#allocation70_spill] sm:$0xff] %v7465_v17 }
 0x63c   : > { %v2631_v0 = vpack.c.bf16 %v2621_v14, %v2620_v38 }
 0x640   : > { %3386 = vrot.lane.b32.xlu0 %v8428_v7, %s5348_s5 }
 0x641   : > { %v3183_v30 = vpop.f32.mrf.mxu1 }
 0x642   : > { %2686 = vmatmul.bf16.gmra.mxu2 %v2630_v9  ;;  %v7469_v51 = vpop.f32.mrf.mxu2  ;;  %v7483_v38 = vmul.f32 0.25, %v3183_v30 }
 0x643   : > { %8465 = vst [vmem:[#allocation71_spill] sm:$0xff] %v7469_v51 }
 0x648   : > { %3384 = vrot.lane.b32.xlu0 %v8429_v31, %s5348_s5  ;;  %3388 = vrot.lane.b32.xlu1 %v8425_v8, %s5348_s5 }
 0x64a   : > { %v7475_v9 = vpop.f32.mrf.mxu2 }
 0x64b   : > { %8466 = vst [vmem:[#allocation72_spill] sm:$0xff] %v7475_v9 }
 0x64d   : > { %3018 = vrot.lane.b32.xlu2 %v8425_v8, %s5349_s8  ;;  %v5042_v8 = vpop.eup %5041 }
 0x64e   : > { %v5044_v16 = vpop.eup %5043  ;;  %v2623_v44 = vmul.f32 %v5042_v8, %v7356_v13 }
 0x650   : > { %3382 = vrot.lane.b32.xlu0 %v8432_v36, %s5348_s5  ;;  %3016 = vrot.lane.b32.xlu1 %v8428_v7, %s5349_s8  ;;  %v2622_v7 = vmul.f32 %v5044_v16, %v7336_v25 }
 0x652   : > { %2691 = vmatmul.bf16.gmra.mxu2 %v2631_v0  ;;  %v2632_v33 = vpack.c.bf16 %v2623_v44, %v2622_v7  ;;  %v2591_v0 = vpop.xlane.xlu0 %2590 }
 0x655   : > { %3014 = vrot.lane.b32.xlu2 %v8429_v31, %s5349_s8  ;;  %v7479_v31 = vpop.f32.mrf.mxu2 }
 0x656   : > { %8467 = vst [vmem:[#allocation73_spill] sm:$0xff] %v7479_v31 }
 0x65d   : > { %3380 = vrot.lane.b32.xlu2 %v8438_v24, %s5348_s5  ;;  %v7485_v13 = vpop.f32.mrf.mxu2 }
 0x65e   : > { %8468 = vst [vmem:[#allocation74_spill] sm:$0xff] %v7485_v13 }
 0x662   : > { %2696 = vmatmul.bf16.gmra.mxu2 %v2632_v33 }
 0x665   : > { %3012 = vrot.lane.b32.xlu2 %v8432_v36, %s5349_s8 }
 0x67a   : > { %3236 = vmax.xlane.f32.xlu0 %v7483_v38  ;;  %3234 = vmax.xlane.f32.xlu1 %v7481_v42  ;;  %v2853_v33 = vpop.xlane.xlu0 %2852 }
 0x67f   : > { %v3223_v25 = vpop.xlane.xlu2 %3222 }
 0x680   : > { %v3254_v14 = vsub.f32 %v7392_v2, %v3223_v25 }
 0x681   : > { %v7490_v35 = vpop.f32.mrf.mxu2 }
 0x682   : > { %v3270_v36 = vmul.f32 1.442695, %v3254_v14  ;;  %v2811_v14 = vpop.f32.mrf.mxu3 }
 0x683   : > { %v7509_v13 = vmul.f32 0.25, %v2811_v14 }
 0x684   : > { %5045 = vpow2.f32 %v3270_v36 }
 0x687   : > { %v3225_v52 = vpop.xlane.xlu1 %3224  ;;  %v2855_v12 = vpop.xlane.xlu2 %2854 }
 0x688   : > { %v3255_v8 = vsub.f32 %v7402_v37, %v3225_v52 }
 0x689   : > { %v7493_v16 = vpop.f32.mrf.mxu2 }
 0x68a   : > { %8469 = vst [vmem:[#allocation75_spill] sm:$0xff] %v7493_v16  ;;  %v3272_v44 = vmul.f32 1.442695, %v3255_v8  ;;  %v7495_v7 = vpop.eup %5045  ;;  %v2813_v51 = vpop.f32.mrf.mxu3 }
 0x68c   : > { %5047 = vpow2.f32 %v3272_v44 }
 0x68d   : > { %5049 = vrcp.f32 %v2591_v0 }
 0x68e   : > { %3302 = vadd.xlane.f32.xlu2 %v7495_v7  ;;  %3378 = vrot.lane.b32.xlu0 %v8434_v21, %s5348_s5 }
 0x68f   : > { %v2593_v2 = vpop.xlane.xlu1 %2592  ;;  %v7505_v52 = vpop.xlane.xlu0 %3226 }
 0x690   : > { %5051 = vrcp.f32 %v2593_v2  ;;  %v2884_v2 = vsub.f32 %v7388_v56, %v2853_v33  ;;  %v2885_v56 = vsub.f32 %v7400_v1, %v2855_v12 }
 0x691   : > { %v7502_v25 = vpop.f32.mrf.mxu2 }
 0x692   : > { %v7500_v30 = vpop.eup %5047  ;;  %v2900_v17 = vmul.f32 1.442695, %v2884_v2 }
 0x693   : > { %3304 = vadd.xlane.f32.xlu1 %v7500_v30  ;;  %v5050_v37 = vpop.eup %5049 }
 0x694   : > { %v2624_v0 = vmul.f32 %v5050_v37, %v7352_v26  ;;  %v7519_v26 = vmul.f32 0.25, %v2813_v51  ;;  %5053 = vpow2.f32 %v2900_v17  ;;  %v2902_v51 = vmul.f32 1.442695, %v2885_v56 }
 0x696   : > { %v5052_v36 = vpop.eup %5051  ;;  %5055 = vpow2.f32 %v2902_v51 }
 0x697   : > { %v2625_v8 = vmul.f32 %v5052_v36, %v7408_v43  ;;  %v7515_v57 = vpop.xlane.xlu0 %2858  ;;  %v7531_v37 = vpop.xlane.xlu1 %2856 }
 0x698   : > { %v3229_v44 = vpop.xlane.xlu2 %3228 }
 0x699   : > { %v2633_v31 = vpack.c.bf16 %v2625_v8, %v2624_v0  ;;  %v7513_v9 = vpop.f32.mrf.mxu2 }
 0x69a   : > { %v7529_v33 = vpop.eup %5053 }
 0x69b   : > { %2864 = vmax.xlane.f32.xlu1 %v7509_v13  ;;  %2701 = vmatmul.bf16.gmra.mxu2 %v2633_v31 }
 0x69c   : > { %v7546_v0 = vpop.eup %5055 }
 0x69f   : > { %v7533_v14 = vpop.xlane.xlu0 %3230 }
 0x6a0   : > { %v7517_v27 = vpop.xlane.xlu2 %2860 }
 0x6a3   : > { %2866 = vmax.xlane.f32.xlu1 %v7519_v26 }
 0x6a5   : > { %v7522_v43 = vpop.f32.mrf.mxu2 }
 0x6a6   : > { %8470 = vst [vmem:[#allocation76_spill] sm:$0xff] %v7522_v43  ;;  %3010 = vrot.lane.b32.xlu2 %v8438_v24, %s5349_s8  ;;  %v7540_v24 = vpop.xlane.xlu1 %2862 }
 0x6a8   : > { %v7526_v31 = vpop.xlane.xlu2 %3232 }
 0x6ab   : > { %2932 = vadd.xlane.f32.xlu1 %v7529_v33 }
 0x6ad   : > { %v7536_v36 = vpop.f32.mrf.mxu2 }
 0x6ae   : > { %8471 = vst [vmem:[#allocation77_spill] sm:$0xff] %v7536_v36  ;;  %3008 = vrot.lane.b32.xlu2 %v8434_v21, %s5349_s8 }
 0x6b0   : > { %v3019_v17 = vpop.permute.xlu2 %3018 }
 0x6b1   : > { %3028 = vmatpush.bf16.msra.mxu0 %v3019_v17 }
 0x6b2   : > { %v3387_v1 = vpop.permute.xlu0 %3386 }
 0x6b5   : > { %v7542_v12 = vpop.f32.mrf.mxu2 }
 0x6b6   : > { %8472 = vst [vmem:[#allocation78_spill] sm:$0xff] %v7542_v12  ;;  %3374 = vrot.lane.b32.xlu2 %v8435_v6, %s5348_s5 }
 0x6b8   : > { %v3015_v8 = vpop.permute.xlu2 %3014  ;;  %2934 = vadd.xlane.f32.xlu0 %v7546_v0 }
 0x6ba   : > { %v3389_v2 = vpop.permute.xlu1 %3388  ;;  %v3385_v56 = vpop.permute.xlu0 %3384 }
 0x6bb   : > { %3398 = vmatpush.bf16.msra.mxu2 %v3389_v2 }
 0x6bd   : > { %v7549_v21 = vpop.f32.mrf.mxu2 }
 0x6be   : > { %8473 = vst [vmem:[#allocation79_spill] sm:$0xff] %v7549_v21 }
 0x6bf   : > { %3399 = vmatpush.bf16.msra.mxu2 %v3387_v1 }
 0x6c0   : > { %v3381_v51 = vpop.permute.xlu2 %3380 }
 0x6c2   : > { %v3017_v17 = vpop.permute.xlu1 %3016  ;;  %v3383_v12 = vpop.permute.xlu0 %3382 }
 0x6c3   : > { %3029 = vmatpush.bf16.msra.mxu0 %v3017_v17  ;;  %3400 = vmatpush.bf16.msra.mxu2 %v3385_v56  ;;  %v3257_v17 = vsub.f32 %v7422_v11, %v3229_v44  ;;  %v3256_v11 = vsub.f32 %v7410_v5, %v7505_v52  ;;  %v2887_v44 = vsub.f32 %v7420_v49, %v7515_v57 }
 0x6c4   : > { %3376 = vrot.lane.b32.xlu1 %v8436_v55, %s5348_s5  ;;  %v3258_v5 = vsub.f32 %v7429_v48, %v7533_v14 }
 0x6c5   : > { %v7553_v20 = vpop.f32.mrf.mxu2 }
 0x6c6   : > { %8474 = vst [vmem:[#allocation80_spill] sm:$0xff] %v7553_v20  ;;  %v3278_v52 = vmul.f32 1.442695, %v3258_v5 }
 0x6c7   : > { %3030 = vmatpush.bf16.msra.mxu0 %v3015_v8  ;;  %3401 = vmatpush.bf16.msra.mxu2 %v3383_v12  ;;  %v3186_v8 = vpop.f32.mrf.mxu1  ;;  %v3276_v12 = vmul.f32 1.442695, %v3257_v17 }
 0x6c8   : > { %v3013_v50 = vpop.permute.xlu2 %3012  ;;  %v7566_v21 = vmul.f32 0.25, %v3186_v8  ;;  %v3274_v8 = vmul.f32 1.442695, %v3256_v11 }
 0x6c9   : > { %5057 = vpow2.f32 %v3276_v12 }
 0x6ca   : > { %5059 = vpow2.f32 %v3274_v8 }
 0x6cb   : > { %3031 = vmatpush.bf16.msra.mxu0 %v3013_v50  ;;  %3402 = vmatpush.bf16.msra.mxu2 %v3381_v51 }
 0x6cc   : > { %3004 = vrot.lane.b32.xlu0 %v8435_v6, %s5349_s8  ;;  %3006 = vrot.lane.b32.xlu1 %v8436_v55, %s5349_s8  ;;  %v2816_v55 = vpop.f32.mrf.mxu3  ;;  %v2906_v6 = vmul.f32 1.442695, %v2887_v44 }
 0x6cd   : > { %v7559_v1 = vpop.f32.mrf.mxu2 }
 0x6ce   : > { %8475 = vst [vmem:[#allocation81_spill] sm:$0xff] %v7559_v1  ;;  %5061 = vpow2.f32 %v2906_v6 }
 0x6cf   : > { %v3188_v51 = vpop.f32.mrf.mxu1  ;;  %v7575_v2 = vpop.eup %5057  ;;  %5063 = vpow2.f32 %v3278_v52 }
 0x6d0   : > { %v7591_v49 = vmul.f32 0.25, %v3188_v51  ;;  %v7593_v57 = vpop.eup %5059  ;;  %v7602_v51 = vmul.f32 0.25, %v2816_v55 }
 0x6d4   : > { %v2818_v17 = vpop.f32.mrf.mxu3  ;;  %v7595_v11 = vpop.eup %5061 }
 0x6d5   : > { %v7563_v56 = vpop.f32.mrf.mxu2  ;;  %v7604_v8 = vpop.eup %5063 }
 0x6d6   : > { %8476 = vst [vmem:[#allocation82_spill] sm:$0xff] %v7563_v56  ;;  %v7582_v56 = vmul.f32 0.25, %v2818_v17  ;;  %v2886_v17 = vsub.f32 %v7418_v3, %v7531_v37  ;;  %v2889_v3 = vsub.f32 %v7436_v46, %v7540_v24 }
 0x6d7   : > { %v3191_v20 = vpop.f32.mrf.mxu1 }
 0x6d8   : > { %v2904_v6 = vmul.f32 1.442695, %v2886_v17 }
 0x6da   : > { %5065 = vpow2.f32 %v2904_v6  ;;  %v3259_v6 = vsub.f32 %v7440_v18, %v7526_v31 }
 0x6dc   : > { %v2821_v44 = vpop.f32.mrf.mxu3 }
 0x6dd   : > { %v7568_v50 = vpop.f32.mrf.mxu2  ;;  %v7619_v1 = vmul.f32 0.25, %v2821_v44 }
 0x6de   : > { %8477 = vst [vmem:[#allocation83_spill] sm:$0xff] %v7568_v50 }
 0x6df   : > { %3238 = vmax.xlane.f32.xlu2 %v7566_v21  ;;  %v3193_v14 = vpop.f32.mrf.mxu1 }
 0x6e0   : > { %v7606_v5 = vmul.f32 0.25, %v3193_v14  ;;  %v2910_v14 = vmul.f32 1.442695, %v2889_v3 }
 0x6e2   : > { %5067 = vpow2.f32 %v2910_v14 }
 0x6e4   : > { %v2823_v52 = vpop.f32.mrf.mxu3 }
 0x6e5   : > { %v7573_v10 = vpop.f32.mrf.mxu2 }
 0x6e6   : > { %8478 = vst [vmem:[#allocation84_spill] sm:$0xff] %v7573_v10  ;;  %v7615_v10 = vmul.f32 0.25, %v2823_v52  ;;  %v7628_v52 = vmul.f32 0.25, %v3191_v20 }
 0x6e7   : > { %3308 = vadd.xlane.f32.xlu2 %v7575_v2  ;;  %v3196_v55 = vpop.f32.mrf.mxu1 }
 0x6e8   : > { %v7630_v43 = vmul.f32 0.25, %v3196_v55 }
 0x6ec   : > { %v2826_v20 = vpop.f32.mrf.mxu3 }
 0x6ed   : > { %v7584_v50 = vpop.f32.mrf.mxu2  ;;  %v3237_v48 = vpop.xlane.xlu0 %3236 }
 0x6ee   : > { %8479 = vst [vmem:[#allocation85_spill] sm:$0xff] %v7584_v50  ;;  %v3235_v12 = vpop.xlane.xlu1 %3234  ;;  %v7617_v50 = vpop.eup %5065  ;;  %v3261_v46 = vsub.f32 %v7483_v38, %v3237_v48  ;;  %v2888_v38 = vsub.f32 %v7431_v45, %v7517_v27 }
 0x6ef   : > { %2870 = vmax.xlane.f32.xlu2 %v7582_v56  ;;  %v3260_v24 = vsub.f32 %v7481_v42, %v3235_v12  ;;  %v3198_v31 = vpop.f32.mrf.mxu1  ;;  %v7632_v41 = vpop.eup %5067 }
 0x6f0   : > { %v3284_v44 = vmul.f32 1.442695, %v3261_v46  ;;  %v2908_v55 = vmul.f32 1.442695, %v2888_v38 }
 0x6f1   : > { %v3282_v18 = vmul.f32 1.442695, %v3260_v24 }
 0x6f4   : > { %v2828_v46 = vpop.f32.mrf.mxu3 }
 0x6f6   : > { %3240 = vmax.xlane.f32.xlu1 %v7591_v49  ;;  %3306 = vadd.xlane.f32.xlu0 %v7593_v57 }
 0x6f7   : > { %2938 = vadd.xlane.f32.xlu2 %v7595_v11 }
 0x6fe   : > { %2868 = vmax.xlane.f32.xlu1 %v7602_v51  ;;  %3310 = vadd.xlane.f32.xlu0 %v7604_v8 }
 0x6ff   : > { %3244 = vmax.xlane.f32.xlu2 %v7606_v5 }
 0x700   : > { %v3379_v37 = vpop.permute.xlu0 %3378 }
 0x701   : > { %v7613_v17 = vpop.xlane.xlu2 %3302  ;;  %3403 = vmatpush.bf16.msra.mxu2 %v3379_v37  ;;  %v3280_v37 = vmul.f32 1.442695, %v3259_v6 }
 0x703   : > { %5069 = vpow2.f32 %v3280_v37  ;;  %v7653_v37 = vmul.f32 0.25, %v2828_v46  ;;  %v7668_v46 = vmul.f32 0.25, %v2826_v20 }
 0x704   : > { %5071 = vpow2.f32 %v3284_v44 }
 0x705   : > { %5073 = vpow2.f32 %v3282_v18  ;;  %v7658_v18 = vmul.f32 0.25, %v3198_v31 }
 0x706   : > { %v3305_v36 = vpop.xlane.xlu1 %3304  ;;  %2936 = vadd.xlane.f32.xlu1 %v7617_v50  ;;  %2874 = vmax.xlane.f32.xlu0 %v7615_v10  ;;  %5075 = vpow2.f32 %v2908_v55  ;;  %v2831_v55 = vpop.f32.mrf.mxu3 }
 0x707   : > { %2872 = vmax.xlane.f32.xlu2 %v7619_v1  ;;  %v7670_v54 = vmul.f32 0.25, %v2831_v55 }
 0x709   : > { %v3011_v3 = vpop.permute.xlu2 %3010  ;;  %v7640_v6 = vpop.eup %5069 }
 0x70a   : > { %3032 = vmatpush.bf16.msra.mxu0 %v3011_v3  ;;  %v7642_v45 = vpop.eup %5071 }
 0x70b   : > { %v7644_v27 = vpop.eup %5073 }
 0x70c   : > { %v7649_v24 = vpop.eup %5075 }
 0x70e   : > { %v2865_v48 = vpop.xlane.xlu1 %2864  ;;  %3242 = vmax.xlane.f32.xlu1 %v7628_v52  ;;  %3246 = vmax.xlane.f32.xlu0 %v7630_v43 }
 0x70f   : > { %v2890_v42 = vsub.f32 %v7509_v13, %v2865_v48  ;;  %2942 = vadd.xlane.f32.xlu2 %v7632_v41  ;;  %v3201_v13 = vpop.f32.mrf.mxu1 }
 0x711   : > { %v3009_v12 = vpop.permute.xlu2 %3008  ;;  %v2912_v14 = vmul.f32 1.442695, %v2890_v42  ;;  %v7662_v42 = vmul.f32 0.25, %v3201_v13 }
 0x712   : > { %3033 = vmatpush.bf16.msra.mxu0 %v3009_v12 }
 0x713   : > { %5077 = vpow2.f32 %v2912_v14 }
 0x714   : > { %5079 = vrcp.f32 %v3305_v36 }
 0x716   : > { %3312 = vadd.xlane.f32.xlu1 %v7640_v6  ;;  %3316 = vadd.xlane.f32.xlu0 %v7642_v45  ;;  %v2867_v48 = vpop.xlane.xlu1 %2866 }
 0x717   : > { %3314 = vadd.xlane.f32.xlu2 %v7644_v27  ;;  %v3203_v44 = vpop.f32.mrf.mxu1  ;;  %v2891_v12 = vsub.f32 %v7519_v26, %v2867_v48 }
 0x718   : > { %v7660_v38 = vmul.f32 0.25, %v3203_v44 }
 0x719   : > { %v7651_v3 = vpop.eup %5077  ;;  %v2914_v14 = vmul.f32 1.442695, %v2891_v12  ;;  %v3375_v55 = vpop.permute.xlu2 %3374 }
 0x71a   : > { %v5080_v13 = vpop.eup %5079 }
 0x71b   : > { %5081 = vpow2.f32 %v2914_v14  ;;  %v3351_v36 = vmul.f32 %v5080_v13, %v7500_v30 }
 0x71c   : > { %5083 = vrcp.f32 %v7613_v17 }
 0x71e   : > { %2940 = vadd.xlane.f32.xlu1 %v7649_v24  ;;  %2944 = vadd.xlane.f32.xlu0 %v7651_v3  ;;  %v2933_v31 = vpop.xlane.xlu1 %2932 }
 0x71f   : > { %2878 = vmax.xlane.f32.xlu2 %v7653_v37 }
 0x721   : > { %v7675_v26 = vpop.eup %5081 }
 0x722   : > { %v5084_v20 = vpop.eup %5083 }
 0x723   : > { %v3350_v12 = vmul.f32 %v5084_v20, %v7495_v7  ;;  %v2833_v20 = vpop.f32.mrf.mxu3 }
 0x725   : > { %v3366_v14 = vpack.c.bf16 %v3351_v36, %v3350_v12 }
 0x726   : > { %3248 = vmax.xlane.f32.xlu1 %v7658_v18  ;;  %3252 = vmax.xlane.f32.xlu0 %v7660_v38 }
 0x727   : > { %3250 = vmax.xlane.f32.xlu2 %v7662_v42 }
 0x72b   : > { %v2935_v44 = vpop.xlane.xlu0 %2934 }
 0x72c   : > { %5085 = vrcp.f32 %v2935_v44 }
 0x72d   : > { %5087 = vrcp.f32 %v2933_v31 }
 0x72e   : > { %2876 = vmax.xlane.f32.xlu1 %v7668_v46  ;;  %2880 = vmax.xlane.f32.xlu0 %v7670_v54 }
 0x732   : > { %v5086_v28 = vpop.eup %5085 }
 0x733   : > { %v5088_v40 = vpop.eup %5087  ;;  %v2981_v32 = vmul.f32 %v5086_v28, %v7546_v0  ;;  %v7687_v0 = vmul.f32 0.25, %v2833_v20 }
 0x734   : > { %v2980_v47 = vmul.f32 %v5088_v40, %v7529_v33 }
 0x736   : > { %2946 = vadd.xlane.f32.xlu1 %v7675_v26  ;;  %v3377_v48 = vpop.permute.xlu1 %3376  ;;  %v2996_v44 = vpack.c.bf16 %v2981_v32, %v2980_v47 }
 0x737   : > { %3404 = vmatpush.bf16.msra.mxu2 %v3377_v48 }
 0x73b   : > { %3405 = vmatpush.bf16.msra.mxu2 %v3375_v55 }
 0x73e   : > { %v3007_v17 = vpop.permute.xlu1 %3006  ;;  %3406 = vmatmul.bf16.vlgmr.msra.gmra.mxu2 %v3366_v14  ;;  %v3005_v16 = vpop.permute.xlu0 %3004 }
 0x73f   : > { %3034 = vmatpush.bf16.msra.mxu0 %v3007_v17 }
 0x743   : > { %3035 = vmatpush.bf16.msra.mxu0 %v3005_v16 }
 0x746   : > { %3036 = vmatmul.bf16.vlgmr.msra.gmra.mxu0 %v2996_v44 }
 0x752   : > { %v3239_v30 = vpop.xlane.xlu2 %3238 }
 0x753   : > { %v3262_v31 = vsub.f32 %v7566_v21, %v3239_v30 }
 0x755   : > { %v3286_v7 = vmul.f32 1.442695, %v3262_v31 }
 0x757   : > { %5089 = vpow2.f32 %v3286_v7 }
 0x75a   : > { %v3309_v13 = vpop.xlane.xlu2 %3308 }
 0x75d   : > { %v7683_v48 = vpop.eup %5089 }
 0x75e   : > { %3318 = vadd.xlane.f32.xlu1 %v7683_v48 }
 0x762   : > { %v2871_v36 = vpop.xlane.xlu2 %2870 }
 0x763   : > { %v2893_v28 = vsub.f32 %v7582_v56, %v2871_v36 }
 0x765   : > { %v2918_v40 = vmul.f32 1.442695, %v2893_v28 }
 0x766   : > { %2882 = vmax.xlane.f32.xlu1 %v7687_v0 }
 0x767   : > { %5091 = vpow2.f32 %v2918_v40 }
 0x768   : > { %5093 = vrcp.f32 %v3309_v13 }
 0x769   : > { %v3241_v47 = vpop.xlane.xlu1 %3240  ;;  %v3307_v32 = vpop.xlane.xlu0 %3306 }
 0x76a   : > { %v3263_v16 = vsub.f32 %v7591_v49, %v3241_v47  ;;  %v2939_v33 = vpop.xlane.xlu2 %2938  ;;  %5095 = vrcp.f32 %v3307_v32 }
 0x76c   : > { %v3288_v21 = vmul.f32 1.442695, %v3263_v16 }
 0x76d   : > { %v7691_v12 = vpop.eup %5091 }
 0x76e   : > { %v5094_v55 = vpop.eup %5093  ;;  %5097 = vpow2.f32 %v3288_v21  ;;  %2950 = vadd.xlane.f32.xlu0 %v7691_v12 }
 0x76f   : > { %v3353_v30 = vmul.f32 %v5094_v55, %v7575_v2 }
 0x770   : > { %v5096_v56 = vpop.eup %5095 }
 0x771   : > { %v2869_v14 = vpop.xlane.xlu1 %2868  ;;  %v3311_v17 = vpop.xlane.xlu0 %3310  ;;  %v3352_v44 = vmul.f32 %v5096_v56, %v7593_v57 }
 0x772   : > { %v2892_v31 = vsub.f32 %v7602_v51, %v2869_v14  ;;  %v3245_v7 = vpop.xlane.xlu2 %3244 }
 0x773   : > { %v3367_v49 = vpack.c.bf16 %v3353_v30, %v3352_v44  ;;  %v3265_v36 = vsub.f32 %v7606_v5, %v3245_v7 }
 0x774   : > { %v7697_v13 = vpop.eup %5097  ;;  %v2916_v20 = vmul.f32 1.442695, %v2892_v31 }
 0x775   : > { %3320 = vadd.xlane.f32.xlu2 %v7697_v13  ;;  %3411 = vmatmul.bf16.gmra.mxu2 %v3367_v49  ;;  %v3292_v47 = vmul.f32 1.442695, %v3265_v36 }
 0x776   : > { %5099 = vpow2.f32 %v2916_v20 }
 0x777   : > { %5101 = vrcp.f32 %v2939_v33 }
 0x779   : > { %v2937_v28 = vpop.xlane.xlu1 %2936  ;;  %v2875_v40 = vpop.xlane.xlu0 %2874 }
 0x77a   : > { %5103 = vrcp.f32 %v2937_v28  ;;  %v2873_v57 = vpop.xlane.xlu2 %2872  ;;  %v2895_v36 = vsub.f32 %v7615_v10, %v2875_v40 }
 0x77b   : > { %v2894_v2 = vsub.f32 %v7619_v1, %v2873_v57  ;;  %5105 = vpow2.f32 %v3292_v47 }
 0x77c   : > { %v7702_v51 = vpop.eup %5099 }
 0x77d   : > { %v2920_v32 = vmul.f32 1.442695, %v2894_v2  ;;  %2948 = vadd.xlane.f32.xlu2 %v7702_v51  ;;  %v5102_v16 = vpop.eup %5101 }
 0x77e   : > { %v2983_v33 = vmul.f32 %v5102_v16, %v7595_v11 }
 0x77f   : > { %5107 = vpow2.f32 %v2920_v32 }
 0x780   : > { %v5104_v21 = vpop.eup %5103 }
 0x781   : > { %v3243_v55 = vpop.xlane.xlu1 %3242  ;;  %v3247_v56 = vpop.xlane.xlu0 %3246  ;;  %v2982_v5 = vmul.f32 %v5104_v21, %v7617_v50 }
 0x782   : > { %v3264_v14 = vsub.f32 %v7628_v52, %v3243_v55  ;;  %v2943_v44 = vpop.xlane.xlu2 %2942  ;;  %v3266_v1 = vsub.f32 %v7630_v43, %v3247_v56  ;;  %v7709_v31 = vpop.eup %5105  ;;  %v2922_v43 = vmul.f32 1.442695, %v2895_v36 }
 0x783   : > { %v2997_v30 = vpack.c.bf16 %v2983_v33, %v2982_v5 }
 0x784   : > { %v3290_v7 = vmul.f32 1.442695, %v3264_v14  ;;  %v3294_v49 = vmul.f32 1.442695, %v3266_v1 }
 0x785   : > { %v7711_v20 = vpop.eup %5107  ;;  %3324 = vadd.xlane.f32.xlu2 %v7709_v31  ;;  %3041 = vmatmul.bf16.gmra.mxu0 %v2997_v30 }
 0x786   : > { %5109 = vpow2.f32 %v3290_v7  ;;  %2952 = vadd.xlane.f32.xlu0 %v7711_v20 }
 0x787   : > { %5111 = vpow2.f32 %v3294_v49 }
 0x788   : > { %5113 = vrcp.f32 %v3311_v17 }
 0x789   : > { %v3313_v50 = vpop.xlane.xlu1 %3312  ;;  %v3317_v11 = vpop.xlane.xlu0 %3316 }
 0x78a   : > { %5115 = vrcp.f32 %v3313_v50  ;;  %v3315_v52 = vpop.xlane.xlu2 %3314 }
 0x78b   : > { %5117 = vpow2.f32 %v2922_v43 }
 0x78c   : > { %v7716_v28 = vpop.eup %5109  ;;  %5119 = vrcp.f32 %v2943_v44 }
 0x78d   : > { %v7718_v47 = vpop.eup %5111  ;;  %3322 = vadd.xlane.f32.xlu1 %v7716_v28 }
 0x78e   : > { %v5114_v57 = vpop.eup %5113  ;;  %3326 = vadd.xlane.f32.xlu2 %v7718_v47 }
 0x78f   : > { %v3354_v17 = vmul.f32 %v5114_v57, %v7604_v8 }
 0x790   : > { %v5116_v10 = vpop.eup %5115 }
 0x791   : > { %v2941_v40 = vpop.xlane.xlu1 %2940  ;;  %v2945_v2 = vpop.xlane.xlu0 %2944  ;;  %v3355_v32 = vmul.f32 %v5116_v10, %v7640_v6 }
 0x792   : > { %5121 = vrcp.f32 %v2941_v40  ;;  %v2879_v16 = vpop.xlane.xlu2 %2878  ;;  %v7725_v56 = vpop.eup %5117 }
 0x793   : > { %v2897_v21 = vsub.f32 %v7653_v37, %v2879_v16  ;;  %v3368_v55 = vpack.c.bf16 %v3355_v32, %v3354_v17  ;;  %5123 = vrcp.f32 %v3315_v52  ;;  %v5120_v33 = vpop.eup %5119 }
 0x794   : > { %5125 = vrcp.f32 %v3317_v11  ;;  %v2985_v1 = vmul.f32 %v5120_v33, %v7632_v41  ;;  %v7752_v33 = vpop.f32.mrf.mxu0 }
 0x795   : > { %v2926_v5 = vmul.f32 1.442695, %v2897_v21  ;;  %3416 = vmatmul.bf16.gmra.mxu2 %v3368_v55  ;;  %2954 = vadd.xlane.f32.xlu1 %v7725_v56 }
 0x797   : > { %5127 = vpow2.f32 %v2926_v5 }
 0x798   : > { %v5122_v14 = vpop.eup %5121 }
 0x799   : > { %v3249_v44 = vpop.xlane.xlu1 %3248  ;;  %v3253_v8 = vpop.xlane.xlu0 %3252  ;;  %v2984_v6 = vmul.f32 %v5122_v14, %v7649_v24 }
 0x79a   : > { %v3267_v37 = vsub.f32 %v7658_v18, %v3249_v44  ;;  %v3251_v30 = vpop.xlane.xlu2 %3250  ;;  %v5124_v7 = vpop.eup %5123 }
 0x79b   : > { %v2998_v49 = vpack.c.bf16 %v2985_v1, %v2984_v6  ;;  %v5126_v36 = vpop.eup %5125  ;;  %v3268_v52 = vsub.f32 %v7662_v42, %v3251_v30  ;;  %v3356_v11 = vmul.f32 %v5124_v7, %v7644_v27  ;;  %v3269_v27 = vsub.f32 %v7660_v38, %v3253_v8  ;;  %v7761_v1 = vpop.f32.mrf.mxu2  ;;  %v8480_v30 = vld [vmem:[#allocation48_spill] sm:$0xff] }
 0x79c   : > { %v3296_v50 = vmul.f32 1.442695, %v3267_v37  ;;  %v3357_v24 = vmul.f32 %v5126_v36, %v7642_v45  ;;  %v7759_v6 = vpop.f32.mrf.mxu0  ;;  %v4389_v7 = vpack.i.bf16 %v7034_v63, %v8480_v30  ;;  %v4399_v63 = vpack.i.bf16 %v7215_v22, %v7207_v59 }
 0x79d   : > { %v7731_v43 = vpop.eup %5127  ;;  %3046 = vmatmul.bf16.gmra.mxu0 %v2998_v49  ;;  %v3298_v41 = vmul.f32 1.442695, %v3268_v52  ;;  %v3300_v21 = vmul.f32 1.442695, %v3269_v27  ;;  %v4429_v59 = vpack.i.bf16 %v7386_v29, %v7382_v61 }
 0x79e   : > { %5129 = vpow2.f32 %v3296_v50  ;;  %2958 = vadd.xlane.f32.xlu2 %v7731_v43  ;;  %v3369_v17 = vpack.c.bf16 %v3357_v24, %v3356_v11  ;;  %v4424_v11 = vpack.i.bf16 %v7050_v60, %v7036_v4  ;;  %v4454_v60 = vpack.i.bf16 %v7151_v53, %v7137_v58 }
 0x79f   : > { %5131 = vpow2.f32 %v3298_v41 }
 0x7a1   : > { %v2877_v57 = vpop.xlane.xlu1 %2876  ;;  %v2881_v18 = vpop.xlane.xlu0 %2880 }
 0x7a2   : > { %v2896_v10 = vsub.f32 %v7668_v46, %v2877_v57  ;;  %v2898_v40 = vsub.f32 %v7670_v54, %v2881_v18 }
 0x7a3   : > { %v7766_v49 = vpop.f32.mrf.mxu2 }
 0x7a4   : > { %v7739_v32 = vpop.eup %5129  ;;  %v2924_v16 = vmul.f32 1.442695, %v2896_v10  ;;  %v2928_v42 = vmul.f32 1.442695, %v2898_v40 }
 0x7a5   : > { %3328 = vadd.xlane.f32.xlu0 %v7739_v32  ;;  %3421 = vmatmul.bf16.gmra.mxu2 %v3369_v17  ;;  %v7743_v46 = vpop.eup %5131 }
 0x7a6   : > { %5133 = vpow2.f32 %v2924_v16  ;;  %v4394_v16 = vpack.i.bf16 %v7376_v15, %v7373_v23 }
 0x7a7   : > { %5135 = vpow2.f32 %v2928_v42 }
 0x7a8   : > { %5137 = vrcp.f32 %v2945_v2 }
 0x7a9   : > { %v2947_v45 = vpop.xlane.xlu1 %2946 }
 0x7aa   : > { %5139 = vrcp.f32 %v2947_v45 }
 0x7ab   : > { %5141 = vpow2.f32 %v3300_v21 }
 0x7ac   : > { %v7745_v54 = vpop.eup %5133 }
 0x7ad   : > { %v7747_v55 = vpop.eup %5135  ;;  %3330 = vadd.xlane.f32.xlu0 %v7743_v46  ;;  %2956 = vadd.xlane.f32.xlu1 %v7745_v54 }
 0x7ae   : > { %v5138_v5 = vpop.eup %5137  ;;  %2960 = vadd.xlane.f32.xlu2 %v7747_v55 }
 0x7af   : > { %v2986_v2 = vmul.f32 %v5138_v5, %v7651_v3 }
 0x7b0   : > { %v5140_v38 = vpop.eup %5139 }
 0x7b1   : > { %v2987_v14 = vmul.f32 %v5140_v38, %v7675_v26  ;;  %v7756_v8 = vpop.eup %5141  ;;  %v4384_v26 = vpack.i.bf16 %v7094_v39, %v7082_v34  ;;  %v4439_v39 = vpack.i.bf16 %v7513_v9, %v7502_v25  ;;  %v4469_v9 = vpack.i.bf16 %v7250_v19, %v7242_v62  ;;  %v8482_v38 = vld [vmem:[#allocation55_spill] sm:$0xff] }
 0x7b3   : > { %v2999_v44 = vpack.c.bf16 %v2987_v14, %v2986_v2 }
 0x7b5   : > { %3051 = vmatmul.bf16.gmra.mxu0 %v2999_v44  ;;  %3332 = vadd.xlane.f32.xlu1 %v7756_v8 }
 0x7c1   : > { %v3407_v50 = vpop.f32.mrf.mxu2 }
 0x7c3   : > { %v3037_v37 = vpop.f32.mrf.mxu0 }
 0x7c6   : > { %4390 = vrot.lane.b32.xlu2 %v4389_v7, %s5349_s8 }
 0x7c9   : > { %v3409_v24 = vpop.f32.mrf.mxu2 }
 0x7ca   : > { %v4414_v57 = vpack.i.bf16 %v3409_v24, %v3407_v50  ;;  %v8485_v50 = vld [vmem:[#allocation12_spill] sm:$0xff] }
 0x7cb   : > { %v3039_v3 = vpop.f32.mrf.mxu0  ;;  %v8486_v24 = vld [vmem:[#allocation52_spill] sm:$0xff] }
 0x7cc   : > { %v4409_v36 = vpack.i.bf16 %v3039_v3, %v3037_v37 }
 0x7ce   : > { %4385 = vrot.lane.b32.xlu1 %v4384_v26, %s5348_s5  ;;  %4410 = vrot.lane.b32.xlu2 %v4409_v36, %s5344_s26  ;;  %v8484_v36 = vld [vmem:[#allocation13_spill] sm:$0xff] }
 0x7d1   : > { %v3319_v52 = vpop.xlane.xlu1 %3318 }
 0x7d6   : > { %4400 = vrot.lane.b32.xlu1 %v4399_v63, %s5346_s7  ;;  %4425 = vrot.lane.b32.xlu2 %v4424_v11, %s5349_s8 }
 0x7d9   : > { %v2883_v41 = vpop.xlane.xlu1 %2882 }
 0x7da   : > { %v2899_v34 = vsub.f32 %v7687_v0, %v2883_v41  ;;  %v8487_v41 = vld [vmem:[#allocation56_spill] sm:$0xff] }
 0x7dc   : > { %v2930_v18 = vmul.f32 1.442695, %v2899_v34  ;;  %v4459_v34 = vpack.i.bf16 %v8487_v41, %v8486_v24 }
 0x7de   : > { %5143 = vpow2.f32 %v2930_v18  ;;  %4415 = vrot.lane.b32.xlu1 %v4414_v57, %s5343_s21  ;;  %4440 = vrot.lane.b32.xlu2 %v4439_v39, %s5345_s6 }
 0x7df   : > { %5145 = vrcp.f32 %v3319_v52  ;;  %v4434_v52 = vpack.i.bf16 %v8485_v50, %v8484_v36  ;;  %v4031_v50 = vld [vmem:[#allocation7 + $0x50] sm:$0xff] }
 0x7e1   : > { %v2951_v25 = vpop.xlane.xlu0 %2950 }
 0x7e4   : > { %v7783_v4 = vpop.eup %5143 }
 0x7e5   : > { %2962 = vadd.xlane.f32.xlu0 %v7783_v4  ;;  %v5146_v0 = vpop.eup %5145 }
 0x7e6   : > { %4430 = vrot.lane.b32.xlu1 %v4429_v59, %s5347_s30  ;;  %4455 = vrot.lane.b32.xlu2 %v4454_v60, %s5348_s5  ;;  %v3358_v61 = vmul.f32 %v5146_v0, %v7683_v48  ;;  %v8481_v48 = vld [vmem:[#allocation75_spill] sm:$0xff]  ;;  %v8488_v59 = vld [vmem:[#allocation76_spill] sm:$0xff] }
 0x7e8   : > { %v3321_v22 = vpop.xlane.xlu2 %3320 }
 0x7e9   : > { %5147 = vrcp.f32 %v3321_v22 }
 0x7ea   : > { %5149 = vrcp.f32 %v2951_v25  ;;  %v4036_v25 = vld [vmem:[#allocation7 + $0x78] sm:$0xff] }
 0x7ee   : > { %4470 = vrot.lane.b32.xlu2 %v4469_v9, %s5346_s7  ;;  %v4035_v9 = vld [vmem:[#allocation7 + $0x70] sm:$0xff] }
 0x7ef   : > { %v5148_v58 = vpop.eup %5147 }
 0x7f0   : > { %v2949_v53 = vpop.xlane.xlu2 %2948  ;;  %v3359_v29 = vmul.f32 %v5148_v58, %v7697_v13  ;;  %v5150_v40 = vpop.eup %5149  ;;  %v4404_v13 = vpack.i.bf16 %v8481_v48, %v7490_v35  ;;  %v4044_v58 = vpack.c.bf16 %v4036_v25, %v4035_v9  ;;  %v8492_v48 = vld [vmem:[#allocation27_spill] sm:$0xff] }
 0x7f1   : > { %5151 = vrcp.f32 %v2949_v53  ;;  %v2989_v19 = vmul.f32 %v5150_v40, %v7691_v12  ;;  %v8483_v12 = vld [vmem:[#allocation40_spill] sm:$0xff]  ;;  %v4028_v25 = vld [vmem:[#allocation7 + $0x38] sm:$0xff] }
 0x7f2   : > { %v3370_v10 = vpack.c.bf16 %v3359_v29, %v3358_v61  ;;  %v4419_v2 = vpack.i.bf16 %v8483_v12, %v8482_v38  ;;  %4049 = vmatpush.bf16.xpose.msra.mxu3 %v4044_v58  ;;  %v8490_v29 = vld [vmem:[#allocation64_spill] sm:$0xff]  ;;  %v8502_v58 = vld [vmem:[#allocation67_spill] sm:$0xff] }
 0x7f4   : > { %3426 = vmatmul.bf16.gmra.mxu2 %v3370_v10  ;;  %v8491_v10 = vld [vmem:[#allocation57_spill] sm:$0xff] }
 0x7f5   : > { %v4464_v40 = vpack.i.bf16 %v8491_v10, %v8490_v29  ;;  %v8504_v10 = vld [vmem:[#allocation28_spill] sm:$0xff] }
 0x7f7   : > { %v5152_v17 = vpop.eup %5151 }
 0x7f8   : > { %v2988_v62 = vmul.f32 %v5152_v17, %v7702_v51  ;;  %v3325_v27 = vpop.xlane.xlu2 %3324  ;;  %v3412_v23 = vpop.f32.mrf.mxu2 }
 0x7f9   : > { %4395 = vrot.lane.b32.xlu0 %v4394_v16, %s5347_s30  ;;  %5153 = vrcp.f32 %v3325_v27  ;;  %v2953_v5 = vpop.xlane.xlu0 %2952 }
 0x7fa   : > { %v3000_v42 = vpack.c.bf16 %v2989_v19, %v2988_v62 }
 0x7fc   : > { %3056 = vmatmul.bf16.gmra.mxu0 %v3000_v42 }
 0x7ff   : > { %v5154_v15 = vpop.eup %5153 }
 0x800   : > { %v3323_v45 = vpop.xlane.xlu1 %3322  ;;  %v3361_v37 = vmul.f32 %v5154_v15, %v7709_v31  ;;  %v3414_v11 = vpop.f32.mrf.mxu2 }
 0x801   : > { %5155 = vrcp.f32 %v3323_v45  ;;  %4405 = vrot.lane.b32.xlu0 %v4404_v13, %s5345_s6  ;;  %v3327_v39 = vpop.xlane.xlu2 %3326  ;;  %v4449_v57 = vpack.i.bf16 %v3414_v11, %v3412_v23  ;;  %v8493_v13 = vld [vmem:[#allocation24_spill] sm:$0xff] }
 0x802   : > { %v3042_v21 = vpop.f32.mrf.mxu0  ;;  %5157 = vrcp.f32 %v2953_v5  ;;  %v4489_v45 = vpack.i.bf16 %v8493_v13, %v8492_v48  ;;  %v4034_v5 = vld [vmem:[#allocation7 + $0x68] sm:$0xff]  ;;  %v8508_v13 = vld [vmem:[#allocation34_spill] sm:$0xff] }
 0x807   : > { %v5156_v51 = vpop.eup %5155 }
 0x808   : > { %v2955_v14 = vpop.xlane.xlu1 %2954  ;;  %v3360_v44 = vmul.f32 %v5156_v51, %v7716_v28  ;;  %v5158_v3 = vpop.eup %5157 }
 0x809   : > { %4420 = vrot.lane.b32.xlu0 %v4419_v2, %s5348_s5  ;;  %5159 = vrcp.f32 %v2955_v14  ;;  %v2990_v63 = vmul.f32 %v5158_v3, %v7711_v20  ;;  %v8496_v3 = vld [vmem:[#allocation14_spill] sm:$0xff] }
 0x80a   : > { %v3044_v35 = vpop.f32.mrf.mxu0  ;;  %v3371_v30 = vpack.c.bf16 %v3361_v37, %v3360_v44  ;;  %5161 = vrcp.f32 %v3327_v39  ;;  %v8494_v37 = vld [vmem:[#allocation65_spill] sm:$0xff] }
 0x80b   : > { %v4444_v7 = vpack.i.bf16 %v3044_v35, %v3042_v21  ;;  %v4033_v21 = vld [vmem:[#allocation7 + $0x60] sm:$0xff]  ;;  %v8495_v35 = vld [vmem:[#allocation66_spill] sm:$0xff] }
 0x80c   : > { %3431 = vmatmul.bf16.gmra.mxu2 %v3371_v30  ;;  %v4043_v51 = vpack.c.bf16 %v4034_v5, %v4033_v21  ;;  %v4499_v30 = vpack.i.bf16 %v8495_v35, %v8494_v37  ;;  %v4023_v5 = vld [vmem:[#allocation7 + $0x10] sm:$0xff] }
 0x80d   : > { %4445 = vrot.lane.b32.xlu1 %v4444_v7, %s5344_s26 }
 0x80e   : > { %4050 = vmatpush.bf16.xpose.msra.mxu3 %v4043_v51  ;;  %v8511_v51 = vld [vmem:[#allocation81_spill] sm:$0xff] }
 0x80f   : > { %v5160_v26 = vpop.eup %5159 }
 0x810   : > { %v2991_v28 = vmul.f32 %v5160_v26, %v7725_v56  ;;  %v8489_v56 = vld [vmem:[#allocation77_spill] sm:$0xff]  ;;  %v5162_v53 = vpop.eup %5161  ;;  %v8497_v26 = vld [vmem:[#allocation18_spill] sm:$0xff] }
 0x811   : > { %4435 = vrot.lane.b32.xlu0 %v4434_v52, %s5346_s7  ;;  %v4474_v22 = vpack.i.bf16 %v8489_v56, %v8488_v59  ;;  %v2959_v0 = vpop.xlane.xlu2 %2958  ;;  %v3362_v62 = vmul.f32 %v5162_v53, %v7718_v47  ;;  %v4504_v36 = vpack.i.bf16 %v8497_v26, %v8496_v3  ;;  %v4032_v52 = vld [vmem:[#allocation7 + $0x58] sm:$0xff]  ;;  %v8500_v56 = vld [vmem:[#allocation78_spill] sm:$0xff]  ;;  %v8503_v53 = vld [vmem:[#allocation68_spill] sm:$0xff] }
 0x812   : > { %v3001_v31 = vpack.c.bf16 %v2991_v28, %v2990_v63  ;;  %v4042_v11 = vpack.c.bf16 %v4032_v52, %v4031_v50  ;;  %v8499_v28 = vld [vmem:[#allocation38_spill] sm:$0xff]  ;;  %v8516_v26 = vld [vmem:[#allocation32_spill] sm:$0xff] }
 0x814   : > { %3061 = vmatmul.bf16.gmra.mxu0 %v3001_v31 }
 0x815   : > { %4460 = vrot.lane.b32.xlu1 %v4459_v34, %s5349_s8 }
 0x816   : > { %4051 = vmatpush.bf16.xpose.msra.mxu3 %v4042_v11 }
 0x818   : > { %v3417_v18 = vpop.f32.mrf.mxu2  ;;  %v3329_v60 = vpop.xlane.xlu0 %3328 }
 0x819   : > { %4450 = vrot.lane.b32.xlu0 %v4449_v57, %s5343_s21  ;;  %5163 = vrcp.f32 %v3329_v60  ;;  %v4030_v60 = vld [vmem:[#allocation7 + $0x48] sm:$0xff] }
 0x81a   : > { %v3047_v20 = vpop.f32.mrf.mxu0  ;;  %5165 = vrcp.f32 %v2959_v0 }
 0x81d   : > { %4475 = vrot.lane.b32.xlu1 %v4474_v22, %s5345_s6  ;;  %v8501_v22 = vld [vmem:[#allocation79_spill] sm:$0xff] }
 0x81e   : > { %v4509_v9 = vpack.i.bf16 %v8501_v22, %v8500_v56 }
 0x81f   : > { %v5164_v61 = vpop.eup %5163 }
 0x820   : > { %v3419_v17 = vpop.f32.mrf.mxu2  ;;  %v2957_v16 = vpop.xlane.xlu1 %2956  ;;  %v3363_v19 = vmul.f32 %v5164_v61, %v7739_v32  ;;  %v4534_v61 = vpack.i.bf16 %v8503_v53, %v8502_v58 }
 0x821   : > { %4465 = vrot.lane.b32.xlu0 %v4464_v40, %s5347_s30  ;;  %v4484_v42 = vpack.i.bf16 %v3419_v17, %v3417_v18  ;;  %5167 = vrcp.f32 %v2957_v16  ;;  %v3331_v15 = vpop.xlane.xlu0 %3330  ;;  %v5166_v38 = vpop.eup %5165  ;;  %v4029_v18 = vld [vmem:[#allocation7 + $0x40] sm:$0xff]  ;;  %v8505_v40 = vld [vmem:[#allocation29_spill] sm:$0xff]  ;;  %v8506_v16 = vld [vmem:[#allocation39_spill] sm:$0xff] }
 0x822   : > { %v3372_v27 = vpack.c.bf16 %v3363_v19, %v3362_v62  ;;  %v3049_v23 = vpop.f32.mrf.mxu0  ;;  %5169 = vrcp.f32 %v3331_v15  ;;  %v2993_v44 = vmul.f32 %v5166_v38, %v7731_v43  ;;  %v4041_v59 = vpack.c.bf16 %v4030_v60, %v4029_v18  ;;  %v8507_v62 = vld [vmem:[#allocation44_spill] sm:$0xff]  ;;  %v4024_v15 = vld [vmem:[#allocation7 + $0x18] sm:$0xff]  ;;  %v2961_v37 = vpop.xlane.xlu2 %2960  ;;  %v8520_v60 = vld [vmem:[#allocation41_spill] sm:$0xff] }
 0x823   : > { %4485 = vrot.lane.b32.xlu2 %v4484_v42, %s5343_s21  ;;  %v4479_v32 = vpack.i.bf16 %v3049_v23, %v3047_v20  ;;  %v4524_v17 = vpack.i.bf16 %v8505_v40, %v8504_v10  ;;  %v4529_v19 = vpack.i.bf16 %v8507_v62, %v8506_v16  ;;  %v4025_v42 = vld [vmem:[#allocation7 + $0x20] sm:$0xff]  ;;  %v4038_v23 = vpack.c.bf16 %v4024_v15, %v4023_v5 }
 0x824   : > { %3436 = vmatmul.bf16.gmra.mxu2 %v3372_v27  ;;  %4052 = vmatpush.bf16.xpose.msra.mxu3 %v4041_v59  ;;  %v4026_v27 = vld [vmem:[#allocation7 + $0x28] sm:$0xff]  ;;  %v8512_v38 = vld [vmem:[#allocation80_spill] sm:$0xff] }
 0x825   : > { %4490 = vrot.lane.b32.xlu1 %v4489_v45, %s5348_s5  ;;  %v4039_v48 = vpack.c.bf16 %v4026_v27, %v4025_v42  ;;  %v8509_v45 = vld [vmem:[#allocation21_spill] sm:$0xff] }
 0x826   : > { %v8510_v21 = vpack.i.bf16 %v8508_v13, %v8509_v45 }
 0x827   : > { %v5168_v47 = vpop.eup %5167 }
 0x828   : > { %v3422_v12 = vpop.f32.mrf.mxu2  ;;  %v3333_v2 = vpop.xlane.xlu1 %3332  ;;  %v2992_v14 = vmul.f32 %v5168_v47, %v7745_v54  ;;  %v8498_v54 = vld [vmem:[#allocation30_spill] sm:$0xff]  ;;  %v8513_v47 = vpack.i.bf16 %v8511_v51, %v8512_v38 }
 0x829   : > { %4480 = vrot.lane.b32.xlu0 %v4479_v32, %s5344_s26  ;;  %5171 = vrcp.f32 %v3333_v2  ;;  %v5170_v63 = vpop.eup %5169  ;;  %v4494_v31 = vpack.i.bf16 %v8499_v28, %v8498_v54  ;;  %v8514_v32 = vld [vmem:[#allocation42_spill] sm:$0xff] }
 0x82a   : > { %v3002_v7 = vpack.c.bf16 %v2993_v44, %v2992_v14  ;;  %v3364_v41 = vmul.f32 %v5170_v63, %v7743_v46  ;;  %v4027_v46 = vld [vmem:[#allocation7 + $0x30] sm:$0xff]  ;;  %v4021_v14 = vld [vmem:[#allocation7] sm:$0xff]  ;;  %v4022_v44 = vld [vmem:[#allocation7 + $0x8] sm:$0xff]  ;;  %5173 = vrcp.f32 %v2961_v37  ;;  %v4391_v52 = vpop.permute.xlu2 %4390 }
 0x82b   : > { %4500 = vrot.lane.b32.xlu2 %v4499_v30, %s5347_s30  ;;  %v4040_v0 = vpack.c.bf16 %v4028_v25, %v4027_v46  ;;  %v4037_v35 = vpack.c.bf16 %v4022_v44, %v4021_v14  ;;  %v4392_v22 = vunpack.i.l.bf16 %v4391_v52  ;;  %v8521_v44 = vld [vmem:[#allocation45_spill] sm:$0xff] }
 0x82c   : > { %3066 = vmatmul.bf16.gmra.mxu0 %v3002_v7 }
 0x82d   : > { %4505 = vrot.lane.b32.xlu1 %v4504_v36, %s5346_s7  ;;  %4053 = vmatpush.bf16.xpose.msra.mxu3 %v4040_v0  ;;  %v8517_v36 = vld [vmem:[#allocation37_spill] sm:$0xff] }
 0x82e   : > { %v8518_v50 = vpack.i.bf16 %v8516_v26, %v8517_v36 }
 0x82f   : > { %v5172_v43 = vpop.eup %5171 }
 0x830   : > { %v3424_v24 = vpop.f32.mrf.mxu2  ;;  %v3365_v34 = vmul.f32 %v5172_v43, %v7756_v8  ;;  %v5174_v3 = vpop.eup %5173 }
 0x831   : > { %4495 = vrot.lane.b32.xlu0 %v4494_v31, %s5349_s8  ;;  %v4519_v20 = vpack.i.bf16 %v3424_v24, %v3422_v12  ;;  %v8515_v12 = vld [vmem:[#allocation19_spill] sm:$0xff]  ;;  %v2994_v63 = vmul.f32 %v5174_v3, %v7747_v55  ;;  %v4393_v55 = vunpack.i.h.bf16 %v4391_v52 }
 0x832   : > { %v3052_v39 = vpop.f32.mrf.mxu0  ;;  %v3373_v57 = vpack.c.bf16 %v3365_v34, %v3364_v41  ;;  %v4559_v2 = vpack.i.bf16 %v8515_v12, %v8514_v32  ;;  %v4411_v31 = vpop.permute.xlu2 %4410 }
 0x833   : > { %v4412_v40 = vunpack.i.l.bf16 %v4411_v31 }
 0x834   : > { %3441 = vmatmul.bf16.gmra.mxu2 %v3373_v57  ;;  %v8519_v57 = vld [vmem:[#allocation49_spill] sm:$0xff] }
 0x835   : > { %4520 = vrot.lane.b32.xlu1 %v4519_v20, %s5343_s21  ;;  %4054 = vmatpush.bf16.xpose.msra.mxu3 %v4039_v48 }
 0x839   : > { %4510 = vrot.lane.b32.xlu0 %v4509_v9, %s5345_s6 }
 0x83a   : > { %v3054_v8 = vpop.f32.mrf.mxu0  ;;  %v4426_v46 = vpop.permute.xlu2 %4425 }
 0x83b   : > { %v4514_v29 = vpack.i.bf16 %v3054_v8, %v3052_v39  ;;  %v4428_v3 = vunpack.i.h.bf16 %v4426_v46  ;;  %v4427_v26 = vunpack.i.l.bf16 %v4426_v46 }
 0x83d   : > { %4535 = vrot.lane.b32.xlu1 %v4534_v61, %s5347_s30  ;;  %4515 = vrot.lane.b32.xlu2 %v4514_v29, %s5344_s26  ;;  %v4413_v61 = vunpack.i.h.bf16 %v4411_v31 }
 0x83e   : > { %4055 = vmatpush.bf16.xpose.msra.mxu3 %v4038_v23 }
 0x840   : > { %v4386_v7 = vpop.permute.xlu1 %4385 }
 0x841   : > { %4525 = vrot.lane.b32.xlu0 %v4524_v17, %s5348_s5  ;;  %v4388_v24 = vunpack.i.h.bf16 %v4386_v7  ;;  %v4387_v41 = vunpack.i.l.bf16 %v4386_v7 }
 0x843   : > { %v3896_v18 = vsel %vm518_vm0, %v8519_v57, %v4388_v24  ;;  %v3895_v20 = vsel %vm518_vm0, %v8520_v60, %v4387_v41  ;;  %v8523_v60 = vld [vmem:[#allocation69_spill] sm:$0xff] }
 0x844   : > { %v3913_v9 = vsel %vm3911_vm1, %v3896_v18, %v4393_v55 }
 0x845   : > { %4530 = vrot.lane.b32.xlu2 %v4529_v19, %s5349_s8 }
 0x846   : > { %4056 = vmatpush.bf16.xpose.msra.mxu3 %v4037_v35  ;;  %v8522_v35 = vld [vmem:[#allocation33_spill] sm:$0xff] }
 0x848   : > { %v4401_v28 = vpop.permute.xlu1 %4400 }
 0x849   : > { %4540 = vrot.lane.b32.xlu0 %v8510_v21, %s5346_s7  ;;  %v4403_v0 = vunpack.i.h.bf16 %v4401_v28  ;;  %v4402_v58 = vunpack.i.l.bf16 %v4401_v28 }
 0x84d   : > { %4545 = vrot.lane.b32.xlu2 %v8513_v47, %s5345_s6  ;;  %v4441_v47 = vpop.permute.xlu2 %4440 }
 0x84e   : > { %v4442_v55 = vunpack.i.l.bf16 %v4441_v47 }
 0x850   : > { %v4416_v39 = vpop.permute.xlu1 %4415 }
 0x851   : > { %v4418_v62 = vunpack.i.h.bf16 %v4416_v39  ;;  %v4417_v19 = vunpack.i.l.bf16 %v4416_v39 }
 0x855   : > { %4560 = vrot.lane.b32.xlu2 %v4559_v2, %s5348_s5  ;;  %v4456_v24 = vpop.permute.xlu2 %4455 }
 0x858   : > { %v2963_v30 = vpop.xlane.xlu0 %2962  ;;  %v4431_v48 = vpop.permute.xlu1 %4430 }
 0x859   : > { %5175 = vrcp.f32 %v2963_v30 }
 0x85d   : > { %4575 = vrot.lane.b32.xlu2 %v8518_v50, %s5346_s7 }
 0x85f   : > { %v5176_v11 = vpop.eup %5175 }
 0x860   : > { %v2995_v43 = vmul.f32 %v5176_v11, %v7783_v4  ;;  %v3912_v4 = vsel %vm3911_vm1, %v3895_v20, %v4392_v22  ;;  %v8524_v20 = vld [vmem:[#allocation70_spill] sm:$0xff]  ;;  %v8525_v22 = vld [vmem:[#allocation25_spill] sm:$0xff] }
 0x862   : > { %v3003_v54 = vpack.c.bf16 %v2995_v43, %v2994_v63  ;;  %v4433_v43 = vunpack.i.h.bf16 %v4431_v48 }
 0x864   : > { %3071 = vmatmul.bf16.gmra.mxu0 %v3003_v54  ;;  %v4432_v54 = vunpack.i.l.bf16 %v4431_v48  ;;  %v4457_v48 = vunpack.i.l.bf16 %v4456_v24 }
 0x86b   : > { %v4396_v34 = vpop.permute.xlu0 %4395 }
 0x86c   : > { %v4398_v59 = vunpack.i.h.bf16 %v4396_v34  ;;  %v4397_v56 = vunpack.i.l.bf16 %v4396_v34 }
 0x86e   : > { %v3930_v25 = vsel %vm3928_vm2, %v3913_v9, %v4398_v59  ;;  %v3929_v8 = vsel %vm3928_vm2, %v3912_v4, %v4397_v56  ;;  %v4569_v59 = vpack.i.bf16 %v8524_v20, %v8523_v60  ;;  %v4443_v56 = vunpack.i.h.bf16 %v4441_v47  ;;  %v8526_v4 = vld [vmem:[#allocation31_spill] sm:$0xff] }
 0x86f   : > { %v3946_v17 = vsel %vm3945_vm3, %v3929_v8, %v4402_v58  ;;  %v3947_v16 = vsel %vm3945_vm3, %v3930_v25, %v4403_v0  ;;  %v4564_v9 = vpack.i.bf16 %v8526_v4, %v8525_v22 }
 0x873   : > { %v4406_v53 = vpop.permute.xlu0 %4405 }
 0x874   : > { %v4408_v29 = vunpack.i.h.bf16 %v4406_v53  ;;  %v4407_v10 = vunpack.i.l.bf16 %v4406_v53 }
 0x876   : > { %v3963_v42 = vsel %vm3962_vm4, %v3946_v17, %v4407_v10  ;;  %v3964_v27 = vsel %vm3962_vm4, %v3947_v16, %v4408_v29 }
 0x877   : > { %v3980_v13 = vsel %vm3979_vm5, %v3963_v42, %v4412_v40  ;;  %v3981_v45 = vsel %vm3979_vm5, %v3964_v27, %v4413_v61  ;;  %v3427_v21 = vpop.f32.mrf.mxu2  ;;  %v4471_v42 = vpop.permute.xlu2 %4470  ;;  %v4458_v27 = vunpack.i.h.bf16 %v4456_v24 }
 0x878   : > { %v3997_v5 = vsel %vm3996_vm6, %v3980_v13, %v4417_v19  ;;  %v3998_v15 = vsel %vm3996_vm6, %v3981_v45, %v4418_v62 }
 0x879   : > { %v4013_v23 = vpack.c.bf16 %v3998_v15, %v3997_v5  ;;  %v3057_v51 = vpop.f32.mrf.mxu0 }
 0x87b   : > { %v4421_v38 = vpop.permute.xlu0 %4420  ;;  %4057 = vmatmul.bf16.vlgmr.msra.gmra.mxu3 %v4013_v23 }
 0x87c   : > { %v4423_v32 = vunpack.i.h.bf16 %v4421_v38  ;;  %v4422_v12 = vunpack.i.l.bf16 %v4421_v38  ;;  %v8528_v38 = vld [vmem:[#allocation82_spill] sm:$0xff] }
 0x87e   : > { %v3898_v37 = vsel %vm518_vm0, %v8521_v44, %v4423_v32  ;;  %v3897_v30 = vsel %vm518_vm0, %v8522_v35, %v4422_v12  ;;  %v8530_v32 = vld [vmem:[#allocation61_spill] sm:$0xff] }
 0x87f   : > { %v3429_v2 = vpop.f32.mrf.mxu2  ;;  %v4446_v14 = vpop.permute.xlu1 %4445  ;;  %v3915_v52 = vsel %vm3911_vm1, %v3898_v37, %v4428_v3  ;;  %v3914_v11 = vsel %vm3911_vm1, %v3897_v30, %v4427_v26  ;;  %v3900_v12 = vsel %vm518_vm0, %v8530_v32, %v4458_v27  ;;  %v4473_v26 = vunpack.i.h.bf16 %v4471_v42  ;;  %v8539_v27 = vld [vmem:[#allocation35_spill] sm:$0xff] }
 0x880   : > { %v4554_v7 = vpack.i.bf16 %v3429_v2, %v3427_v21  ;;  %v3931_v41 = vsel %vm3928_vm2, %v3914_v11, %v4432_v54  ;;  %v3932_v34 = vsel %vm3928_vm2, %v3915_v52, %v4433_v43  ;;  %v4448_v8 = vunpack.i.h.bf16 %v4446_v14  ;;  %v8531_v2 = vld [vmem:[#allocation60_spill] sm:$0xff]  ;;  %v8533_v43 = vld [vmem:[#allocation47_spill] sm:$0xff] }
 0x881   : > { %v3059_v36 = vpop.f32.mrf.mxu0  ;;  %v4447_v0 = vunpack.i.l.bf16 %v4446_v14  ;;  %v3899_v14 = vsel %vm518_vm0, %v8531_v2, %v4457_v48 }
 0x882   : > { %v4549_v50 = vpack.i.bf16 %v3059_v36, %v3057_v51  ;;  %4555 = vrot.lane.b32.xlu0 %v4554_v7, %s5343_s21  ;;  %v8527_v51 = vld [vmem:[#allocation83_spill] sm:$0xff]  ;;  %v4472_v36 = vunpack.i.l.bf16 %v4471_v42 }
 0x883   : > { %v4436_v63 = vpop.permute.xlu0 %4435  ;;  %v8529_v47 = vpack.i.bf16 %v8527_v51, %v8528_v38  ;;  %v8538_v42 = vld [vmem:[#allocation15_spill] sm:$0xff] }
 0x884   : > { %v4438_v28 = vunpack.i.h.bf16 %v4436_v63  ;;  %v4437_v31 = vunpack.i.l.bf16 %v4436_v63  ;;  %4550 = vrot.lane.b32.xlu1 %v4549_v50, %s5344_s26  ;;  %v4486_v50 = vpop.permute.xlu2 %4485  ;;  %v8532_v63 = vld [vmem:[#allocation17_spill] sm:$0xff]  ;;  %v8540_v48 = vpack.i.bf16 %v8538_v42, %v8539_v27 }
 0x885   : > { %v4594_v54 = vpack.i.bf16 %v8533_v43, %v8532_v63  ;;  %v4488_v60 = vunpack.i.h.bf16 %v4486_v50  ;;  %v4487_v20 = vunpack.i.l.bf16 %v4486_v50 }
 0x886   : > { %v3948_v39 = vsel %vm3945_vm3, %v3931_v41, %v4437_v31  ;;  %v3949_v57 = vsel %vm3945_vm3, %v3932_v34, %v4438_v28 }
 0x887   : > { %v4461_v18 = vpop.permute.xlu1 %4460  ;;  %v3965_v46 = vsel %vm3962_vm4, %v3948_v39, %v4442_v55  ;;  %v3966_v25 = vsel %vm3962_vm4, %v3949_v57, %v4443_v56 }
 0x888   : > { %v3982_v29 = vsel %vm3979_vm5, %v3965_v46, %v4447_v0  ;;  %v3983_v10 = vsel %vm3979_vm5, %v3966_v25, %v4448_v8  ;;  %v4463_v45 = vunpack.i.h.bf16 %v4461_v18  ;;  %v4462_v21 = vunpack.i.l.bf16 %v4461_v18  ;;  %v8534_v46 = vld [vmem:[#allocation71_spill] sm:$0xff]  ;;  %v8535_v25 = vld [vmem:[#allocation72_spill] sm:$0xff] }
 0x889   : > { %v4604_v8 = vpack.i.bf16 %v8535_v25, %v8534_v46  ;;  %v8548_v46 = vld [vmem:[#allocation73_spill] sm:$0xff]  ;;  %v8549_v25 = vld [vmem:[#allocation74_spill] sm:$0xff] }
 0x88a   : > { %4570 = vrot.lane.b32.xlu0 %v4569_v59, %s5347_s30  ;;  %v3916_v44 = vsel %vm3911_vm1, %v3899_v14, %v4462_v21  ;;  %v3917_v37 = vsel %vm3911_vm1, %v3900_v12, %v4463_v45  ;;  %v8542_v21 = vld [vmem:[#allocation62_spill] sm:$0xff] }
 0x88b   : > { %v4451_v58 = vpop.permute.xlu0 %4450 }
 0x88c   : > { %v4453_v53 = vunpack.i.h.bf16 %v4451_v58  ;;  %v4452_v61 = vunpack.i.l.bf16 %v4451_v58  ;;  %4565 = vrot.lane.b32.xlu1 %v4564_v9, %s5349_s8 }
 0x88e   : > { %v3999_v40 = vsel %vm3996_vm6, %v3982_v29, %v4452_v61  ;;  %v4000_v17 = vsel %vm3996_vm6, %v3983_v10, %v4453_v53  ;;  %v8536_v53 = vld [vmem:[#allocation22_spill] sm:$0xff]  ;;  %v8537_v61 = vld [vmem:[#allocation20_spill] sm:$0xff]  ;;  %v4501_v10 = vpop.permute.xlu2 %4500 }
 0x88f   : > { %v3432_v16 = vpop.f32.mrf.mxu2  ;;  %v4476_v62 = vpop.permute.xlu1 %4475  ;;  %v4014_v19 = vpack.c.bf16 %v4000_v17, %v3999_v40  ;;  %v4599_v29 = vpack.i.bf16 %v8537_v61, %v8536_v53  ;;  %v4503_v38 = vunpack.i.h.bf16 %v4501_v10  ;;  %v8551_v53 = vld [vmem:[#allocation16_spill] sm:$0xff] }
 0x890   : > { %v4478_v41 = vunpack.i.h.bf16 %v4476_v62  ;;  %v4477_v34 = vunpack.i.l.bf16 %v4476_v62 }
 0x891   : > { %4062 = vmatmul.bf16.gmra.mxu3 %v4014_v19  ;;  %v3062_v13 = vpop.f32.mrf.mxu0 }
 0x893   : > { %v4466_v5 = vpop.permute.xlu0 %4465 }
 0x894   : > { %v4468_v15 = vunpack.i.h.bf16 %v4466_v5  ;;  %v4467_v23 = vunpack.i.l.bf16 %v4466_v5  ;;  %4580 = vrot.lane.b32.xlu1 %v8529_v47, %s5345_s6  ;;  %v4502_v47 = vunpack.i.l.bf16 %v4501_v10 }
 0x896   : > { %v3934_v35 = vsel %vm3928_vm2, %v3917_v37, %v4468_v15  ;;  %v3933_v30 = vsel %vm3928_vm2, %v3916_v44, %v4467_v23 }
 0x897   : > { %v3434_v7 = vpop.f32.mrf.mxu2  ;;  %v4491_v3 = vpop.permute.xlu1 %4490  ;;  %v3951_v28 = vsel %vm3945_vm3, %v3934_v35, %v4473_v26  ;;  %v3950_v31 = vsel %vm3945_vm3, %v3933_v30, %v4472_v36  ;;  %v8543_v26 = vld [vmem:[#allocation85_spill] sm:$0xff]  ;;  %v8544_v36 = vld [vmem:[#allocation84_spill] sm:$0xff] }
 0x898   : > { %v4589_v52 = vpack.i.bf16 %v3434_v7, %v3432_v16  ;;  %v3967_v59 = vsel %vm3962_vm4, %v3950_v31, %v4477_v34  ;;  %v3968_v56 = vsel %vm3962_vm4, %v3951_v28, %v4478_v41  ;;  %v4493_v40 = vunpack.i.h.bf16 %v4491_v3  ;;  %v4516_v12 = vpop.permute.xlu2 %4515 }
 0x899   : > { %v3064_v11 = vpop.f32.mrf.mxu0  ;;  %v4492_v17 = vunpack.i.l.bf16 %v4491_v3  ;;  %v8545_v50 = vpack.i.bf16 %v8543_v26, %v8544_v36 }
 0x89a   : > { %v4584_v24 = vpack.i.bf16 %v3064_v11, %v3062_v13  ;;  %4590 = vrot.lane.b32.xlu2 %v4589_v52, %s5343_s21  ;;  %v8541_v13 = vld [vmem:[#allocation63_spill] sm:$0xff]  ;;  %v4518_v52 = vunpack.i.h.bf16 %v4516_v12  ;;  %v4517_v11 = vunpack.i.l.bf16 %v4516_v12 }
 0x89b   : > { %v4481_v39 = vpop.permute.xlu0 %4480  ;;  %v3902_v45 = vsel %vm518_vm0, %v8541_v13, %v4493_v40  ;;  %v3901_v5 = vsel %vm518_vm0, %v8542_v21, %v4492_v17  ;;  %v4649_v40 = vpack.i.bf16 %v7766_v49, %v7761_v1  ;;  %v8552_v13 = vld [vmem:[#allocation46_spill] sm:$0xff]  ;;  %v8553_v21 = vld [vmem:[#allocation51_spill] sm:$0xff] }
 0x89c   : > { %v4483_v57 = vunpack.i.h.bf16 %v4481_v39  ;;  %v4482_v18 = vunpack.i.l.bf16 %v4481_v39  ;;  %4595 = vrot.lane.b32.xlu1 %v4594_v54, %s5348_s5  ;;  %4585 = vrot.lane.b32.xlu0 %v4584_v24, %s5344_s26 }
 0x89e   : > { %v3984_v55 = vsel %vm3979_vm5, %v3967_v59, %v4482_v18  ;;  %v3985_v22 = vsel %vm3979_vm5, %v3968_v56, %v4483_v57  ;;  %v8546_v59 = vld [vmem:[#allocation23_spill] sm:$0xff] }
 0x89f   : > { %v4001_v4 = vsel %vm3996_vm6, %v3984_v55, %v4487_v20  ;;  %v4002_v9 = vsel %vm3996_vm6, %v3985_v22, %v4488_v60  ;;  %v4506_v58 = vpop.permute.xlu1 %4505  ;;  %v8547_v56 = vld [vmem:[#allocation43_spill] sm:$0xff] }
 0x8a0   : > { %v4015_v0 = vpack.c.bf16 %v4002_v9, %v4001_v4  ;;  %v4508_v44 = vunpack.i.h.bf16 %v4506_v58  ;;  %v4507_v37 = vunpack.i.l.bf16 %v4506_v58  ;;  %v4629_v55 = vpack.i.bf16 %v8547_v56, %v8546_v59  ;;  %v8550_v58 = vld [vmem:[#allocation59_spill] sm:$0xff] }
 0x8a1   : > { %v4634_v61 = vpack.i.bf16 %v8551_v53, %v8550_v58 }
 0x8a2   : > { %4067 = vmatmul.bf16.gmra.mxu3 %v4015_v0  ;;  %4605 = vrot.lane.b32.xlu2 %v4604_v8, %s5347_s30  ;;  %v4639_v8 = vpack.i.bf16 %v8549_v25, %v8548_v46  ;;  %v4644_v0 = vpack.i.bf16 %v7759_v6, %v7752_v33  ;;  %v4531_v6 = vpop.permute.xlu2 %4530  ;;  %v8554_v46 = vld [vmem:[#allocation54_spill] sm:$0xff] }
 0x8a3   : > { %v4496_v16 = vpop.permute.xlu0 %4495  ;;  %v4533_v49 = vunpack.i.h.bf16 %v4531_v6 }
 0x8a4   : > { %v4498_v62 = vunpack.i.h.bf16 %v4496_v16  ;;  %v4497_v19 = vunpack.i.l.bf16 %v4496_v16  ;;  %4610 = vrot.lane.b32.xlu1 %v8540_v48, %s5346_s7  ;;  %4600 = vrot.lane.b32.xlu0 %v4599_v29, %s5349_s8 }
 0x8a6   : > { %v3919_v15 = vsel %vm3911_vm1, %v3902_v45, %v4498_v62  ;;  %v3918_v23 = vsel %vm3911_vm1, %v3901_v5, %v4497_v19  ;;  %v4532_v5 = vunpack.i.l.bf16 %v4531_v6 }
 0x8a7   : > { %v3437_v51 = vpop.f32.mrf.mxu2  ;;  %v3936_v2 = vsel %vm3928_vm2, %v3919_v15, %v4503_v38  ;;  %v3935_v14 = vsel %vm3928_vm2, %v3918_v23, %v4502_v47  ;;  %v4521_v35 = vpop.permute.xlu1 %4520 }
 0x8a8   : > { %v3952_v63 = vsel %vm3945_vm3, %v3935_v14, %v4507_v37  ;;  %v3953_v43 = vsel %vm3945_vm3, %v3936_v2, %v4508_v44  ;;  %v4522_v54 = vunpack.i.l.bf16 %v4521_v35  ;;  %v4523_v24 = vunpack.i.h.bf16 %v4521_v35 }
 0x8a9   : > { %v3067_v32 = vpop.f32.mrf.mxu0 }
 0x8aa   : > { %v4546_v15 = vpop.permute.xlu2 %4545 }
 0x8ab   : > { %v4511_v30 = vpop.permute.xlu0 %4510 }
 0x8ac   : > { %v4513_v7 = vunpack.i.h.bf16 %v4511_v30  ;;  %v4512_v3 = vunpack.i.l.bf16 %v4511_v30  ;;  %4615 = vrot.lane.b32.xlu0 %v8545_v50, %s5345_s6  ;;  %v4548_v30 = vunpack.i.h.bf16 %v4546_v15 }
 0x8ae   : > { %v3969_v28 = vsel %vm3962_vm4, %v3952_v63, %v4512_v3  ;;  %v3970_v31 = vsel %vm3962_vm4, %v3953_v43, %v4513_v7  ;;  %v4547_v7 = vunpack.i.l.bf16 %v4546_v15 }
 0x8af   : > { %v3439_v41 = vpop.f32.mrf.mxu2  ;;  %v3986_v34 = vsel %vm3979_vm5, %v3969_v28, %v4517_v11  ;;  %v3987_v39 = vsel %vm3979_vm5, %v3970_v31, %v4518_v52  ;;  %v4536_v48 = vpop.permute.xlu1 %4535 }
 0x8b0   : > { %v4624_v57 = vpack.i.bf16 %v3439_v41, %v3437_v51  ;;  %v4003_v18 = vsel %vm3996_vm6, %v3986_v34, %v4522_v54  ;;  %v4004_v20 = vsel %vm3996_vm6, %v3987_v39, %v4523_v24  ;;  %v4537_v12 = vunpack.i.l.bf16 %v4536_v48  ;;  %v8010_v41 = vld [vmem:[%s8133_s3] ss:$0 sm:$0xff] }
 0x8b1   : > { %v3069_v60 = vpop.f32.mrf.mxu0  ;;  %v4016_v4 = vpack.c.bf16 %v4004_v20, %v4003_v18 }
 0x8b2   : > { %v4619_v22 = vpack.i.bf16 %v3069_v60, %v3067_v32  ;;  %4625 = vrot.lane.b32.xlu1 %v4624_v57, %s5343_s21  ;;  %v4538_v32 = vunpack.i.h.bf16 %v4536_v48  ;;  %v4561_v24 = vpop.permute.xlu2 %4560 }
 0x8b3   : > { %4072 = vmatmul.bf16.gmra.mxu3 %v4016_v4  ;;  %v4526_v33 = vpop.permute.xlu0 %4525  ;;  %v4563_v60 = vunpack.i.h.bf16 %v4561_v24  ;;  %v4562_v20 = vunpack.i.l.bf16 %v4561_v24 }
 0x8b4   : > { %4630 = vrot.lane.b32.xlu0 %v4629_v55, %s5348_s5  ;;  %4620 = vrot.lane.b32.xlu2 %v4619_v22, %s5344_s26  ;;  %v4528_v62 = vunpack.i.h.bf16 %v4526_v33  ;;  %v4527_v19 = vunpack.i.l.bf16 %v4526_v33 }
 0x8b5   : > { %v3906_v25 = vsel %vm518_vm0, %v8554_v46, %v4563_v60 }
 0x8b6   : > { %v3904_v45 = vsel %vm518_vm0, %v8552_v13, %v4528_v62  ;;  %v3903_v1 = vsel %vm518_vm0, %v8553_v21, %v4527_v19 }
 0x8b7   : > { %v3442_v9 = vpop.f32.mrf.mxu2  ;;  %v3921_v23 = vsel %vm3911_vm1, %v3904_v45, %v4533_v49  ;;  %v3920_v51 = vsel %vm3911_vm1, %v3903_v1, %v4532_v5 }
 0x8b8   : > { %v3937_v2 = vsel %vm3928_vm2, %v3920_v51, %v4537_v12  ;;  %v3938_v14 = vsel %vm3928_vm2, %v3921_v23, %v4538_v32 }
 0x8ba   : > { %4640 = vrot.lane.b32.xlu1 %v4639_v8, %s5347_s30  ;;  %v4576_v59 = vpop.permute.xlu2 %4575  ;;  %v8555_v8 = vld [vmem:[#allocation53_spill] sm:$0xff]  ;;  %s5287_s30 = scalar_lea.hbm %s8134_s4, 256 }
 0x8bb   : > { %v4541_v27 = vpop.permute.xlu0 %4540  ;;  %v4577_v62 = vunpack.i.l.bf16 %v4576_v59 }
 0x8bc   : > { %4645 = vrot.lane.b32.xlu0 %v4644_v0, %s5346_s7  ;;  %4635 = vrot.lane.b32.xlu2 %v4634_v61, %s5349_s8  ;;  %v4543_v38 = vunpack.i.h.bf16 %v4541_v27  ;;  %v4542_v47 = vunpack.i.l.bf16 %v4541_v27  ;;  %v3905_v0 = vsel %vm518_vm0, %v8555_v8, %v4562_v20 }
 0x8be   : > { %v3954_v44 = vsel %vm3945_vm3, %v3937_v2, %v4542_v47  ;;  %v3955_v37 = vsel %vm3945_vm3, %v3938_v14, %v4543_v38 }
 0x8bf   : > { %v3444_v29 = vpop.f32.mrf.mxu2  ;;  %v3971_v11 = vsel %vm3962_vm4, %v3954_v44, %v4547_v7  ;;  %v3972_v63 = vsel %vm3962_vm4, %v3955_v37, %v4548_v30 }
 0x8c0   : > { %v4659_v10 = vpack.i.bf16 %v3444_v29, %v3442_v9 }
 0x8c4   : > { %4660 = vrot.lane.b32.xlu0 %v4659_v10, %s5343_s21  ;;  %4650 = vrot.lane.b32.xlu2 %v4649_v40, %s5345_s6  ;;  %s4115_s21 = scalar_lea.sflag [#allocation4], %s5482_s20 }
 0x8e1   : > { %v3072_v17 = vpop.f32.mrf.mxu0 }
 0x8e9   : > { %v3074_v16 = vpop.f32.mrf.mxu0 }
 0x8ea   : > { %v4654_v42 = vpack.i.bf16 %v3074_v16, %v3072_v17  ;;  %v4578_v16 = vunpack.i.h.bf16 %v4576_v59 }
 0x8ec   : > { %4655 = vrot.lane.b32.xlu1 %v4654_v42, %s5344_s26  ;;  %s5281_s26 = sshra.s32 %s4130_s12, 4  ;;  %s5282_s26 = int_to_ptr.hbm [resolvable:$true] %s5281_s26 }
 0x8ed   : > { %s5283_s19 = scalar_lea.hbm %s5282_s26, 128  ;;  %p5288_p11 = scmp.lt.s32.totalorder %s5282_s26, %s8134_s4 }
 0x8ee   : > { %p5284_p1 = scmp.ne.s32.totalorder %s5282_s26, %s5283_s19  ;;  %p5289_p2 = scmp.lt.s32.totalorder %s5287_s30, %s5283_s19 }
 0x8f0   : > { %p5285_p4 = pnand %p5284_p1, %p5449_p3  ;;  %p5290_p9 = por %p5289_p2, %p5288_p11 }
 0x8f2   : > { %p5286_p8 = pneg %p5285_p4 }
 0x8f4   : > { %v4556_v35 = vpop.permute.xlu0 %4555  ;;  %v4591_v19 = vpop.permute.xlu2 %4590  ;;  %p5291_p10 = pnand %p5290_p9, %p5286_p8 }
 0x8f5   : > { %v4558_v50 = vunpack.i.h.bf16 %v4556_v35  ;;  %v4557_v52 = vunpack.i.l.bf16 %v4556_v35  ;;  %v4593_v21 = vunpack.i.h.bf16 %v4591_v19  ;;  %v4592_v1 = vunpack.i.l.bf16 %v4591_v19 }
 0x8f6   : > { %v4551_v3 = vpop.permute.xlu1 %4550 }
 0x8f7   : > { %v4553_v26 = vunpack.i.h.bf16 %v4551_v3  ;;  %v4552_v36 = vunpack.i.l.bf16 %v4551_v3  ;;  %v8556_v3 = vld [vmem:[#allocation58_spill] sm:$0xff] }
 0x8f9   : > { %v3988_v43 = vsel %vm3979_vm5, %v3971_v11, %v4552_v36  ;;  %v3989_v54 = vsel %vm3979_vm5, %v3972_v63, %v4553_v26  ;;  %v8557_v36 = vld [vmem:[#allocation50_spill] sm:$0xff] }
 0x8fa   : > { %v4005_v28 = vsel %vm3996_vm6, %v3988_v43, %v4557_v52  ;;  %v4006_v31 = vsel %vm3996_vm6, %v3989_v54, %v4558_v50 }
 0x8fb   : > { %v4017_v34 = vpack.c.bf16 %v4006_v31, %v4005_v28 }
 0x8fc   : > { %v4571_v22 = vpop.permute.xlu0 %4570  ;;  %v4606_v7 = vpop.permute.xlu2 %4605 }
 0x8fd   : > { %4077 = vmatmul.bf16.gmra.mxu3 %v4017_v34  ;;  %v4573_v29 = vunpack.i.h.bf16 %v4571_v22  ;;  %v4572_v10 = vunpack.i.l.bf16 %v4571_v22  ;;  %v4608_v54 = vunpack.i.h.bf16 %v4606_v7  ;;  %v4607_v28 = vunpack.i.l.bf16 %v4606_v7 }
 0x8fe   : > { %v4058_v39 = vpop.f32.mrf.mxu3  ;;  %v4566_v57 = vpop.permute.xlu1 %4565 }
 0x8ff   : > { %v4059_v18 = vadd.f32 %v8010_v41, %v4058_v39  ;;  %v4568_v56 = vunpack.i.h.bf16 %v4566_v57  ;;  %v4567_v55 = vunpack.i.l.bf16 %v4566_v57 }
 0x901   : > { %4098 = vst [vmem:[%s8015_s23] sm:$0xff] %v4059_v18  ;;  %v3923_v53 = vsel %vm3911_vm1, %v3906_v25, %v4568_v56  ;;  %v3922_v61 = vsel %vm3911_vm1, %v3905_v0, %v4567_v55 }
 0x902   : > { %v3939_v40 = vsel %vm3928_vm2, %v3922_v61, %v4572_v10  ;;  %v3940_v17 = vsel %vm3928_vm2, %v3923_v53, %v4573_v29 }
 0x903   : > { %v3956_v27 = vsel %vm3945_vm3, %v3939_v40, %v4577_v62  ;;  %v3957_v48 = vsel %vm3945_vm3, %v3940_v17, %v4578_v16 }
 0x906   : > { %v4060_v4 = vpop.f32.mrf.mxu3  ;;  %v4581_v58 = vpop.permute.xlu1 %4580 }
 0x907   : > { %v4061_v9 = vadd.f32 %v8010_v41, %v4060_v4  ;;  %v4583_v33 = vunpack.i.h.bf16 %v4581_v58  ;;  %v4582_v6 = vunpack.i.l.bf16 %v4581_v58 }
 0x909   : > { %4099 = vst [vmem:[%s8015_s23 + $0x8] sm:$0xff] %v4061_v9  ;;  %v3973_v49 = vsel %vm3962_vm4, %v3956_v27, %v4582_v6  ;;  %v3974_v5 = vsel %vm3962_vm4, %v3957_v48, %v4583_v33 }
 0x90e   : > { %v4586_v42 = vpop.permute.xlu0 %4585  ;;  %v4596_v51 = vpop.permute.xlu1 %4595 }
 0x90f   : > { %v4588_v13 = vunpack.i.h.bf16 %v4586_v42  ;;  %v4587_v45 = vunpack.i.l.bf16 %v4586_v42  ;;  %v4598_v44 = vunpack.i.h.bf16 %v4596_v51  ;;  %v4597_v37 = vunpack.i.l.bf16 %v4596_v51  ;;  %v4621_v59 = vpop.permute.xlu2 %4620 }
 0x910   : > { %v4623_v9 = vunpack.i.h.bf16 %v4621_v59  ;;  %v4622_v46 = vunpack.i.l.bf16 %v4621_v59 }
 0x911   : > { %v3990_v15 = vsel %vm3979_vm5, %v3973_v49, %v4587_v45  ;;  %v3991_v23 = vsel %vm3979_vm5, %v3974_v5, %v4588_v13  ;;  %v3908_v26 = vsel %vm518_vm0, %v8556_v3, %v4598_v44  ;;  %v3907_v50 = vsel %vm518_vm0, %v8557_v36, %v4597_v37  ;;  %v8558_v49 = vld [vmem:[#allocation26_spill] sm:$0xff] }
 0x912   : > { %v4007_v38 = vsel %vm3996_vm6, %v3990_v15, %v4592_v1  ;;  %v4008_v47 = vsel %vm3996_vm6, %v3991_v23, %v4593_v21  ;;  %v8559_v15 = vld [vmem:[#allocation36_spill] sm:$0xff] }
 0x913   : > { %v4018_v32 = vpack.c.bf16 %v4008_v47, %v4007_v38 }
 0x914   : > { %v4063_v12 = vpop.f32.mrf.mxu3 }
 0x915   : > { %v4064_v2 = vadd.f32 %v8010_v41, %v4063_v12  ;;  %4082 = vmatmul.bf16.gmra.mxu3 %v4018_v32 }
 0x916   : > { %v4601_v14 = vpop.permute.xlu0 %4600  ;;  %v4611_v52 = vpop.permute.xlu1 %4610 }
 0x917   : > { %4100 = vst [vmem:[%s8015_s23 + $0x10] sm:$0xff] %v4064_v2  ;;  %v4603_v35 = vunpack.i.h.bf16 %v4601_v14  ;;  %v4602_v30 = vunpack.i.l.bf16 %v4601_v14  ;;  %v4613_v60 = vunpack.i.h.bf16 %v4611_v52  ;;  %v4612_v20 = vunpack.i.l.bf16 %v4611_v52  ;;  %v4636_v48 = vpop.permute.xlu2 %4635 }
 0x918   : > { %v4638_v47 = vunpack.i.h.bf16 %v4636_v48  ;;  %v4637_v32 = vunpack.i.l.bf16 %v4636_v48 }
 0x919   : > { %v3925_v11 = vsel %vm3911_vm1, %v3908_v26, %v4603_v35  ;;  %v3924_v63 = vsel %vm3911_vm1, %v3907_v50, %v4602_v30 }
 0x91a   : > { %v3942_v34 = vsel %vm3928_vm2, %v3925_v11, %v4608_v54  ;;  %v3941_v39 = vsel %vm3928_vm2, %v3924_v63, %v4607_v28 }
 0x91b   : > { %v3958_v56 = vsel %vm3945_vm3, %v3941_v39, %v4612_v20  ;;  %v3959_v55 = vsel %vm3945_vm3, %v3942_v34, %v4613_v60 }
 0x91c   : > { %v4065_v43 = vpop.f32.mrf.mxu3 }
 0x91d   : > { %v4066_v31 = vadd.f32 %v8010_v41, %v4065_v43 }
 0x91e   : > { %v4616_v24 = vpop.permute.xlu0 %4615 }
 0x91f   : > { %4101 = vst [vmem:[%s8015_s23 + $0x18] sm:$0xff] %v4066_v31  ;;  %v4618_v57 = vunpack.i.h.bf16 %v4616_v24  ;;  %v4617_v18 = vunpack.i.l.bf16 %v4616_v24  ;;  %v4651_v30 = vpop.permute.xlu2 %4650 }
 0x920   : > { %v4653_v36 = vunpack.i.h.bf16 %v4651_v30  ;;  %v4652_v50 = vunpack.i.l.bf16 %v4651_v30 }
 0x921   : > { %v3975_v22 = vsel %vm3962_vm4, %v3958_v56, %v4617_v18  ;;  %v3976_v4 = vsel %vm3962_vm4, %v3959_v55, %v4618_v57 }
 0x922   : > { %v3992_v61 = vsel %vm3979_vm5, %v3975_v22, %v4622_v46  ;;  %v3993_v29 = vsel %vm3979_vm5, %v3976_v4, %v4623_v9 }
 0x924   : > { %v4626_v25 = vpop.permute.xlu1 %4625 }
 0x925   : > { %v4628_v8 = vunpack.i.h.bf16 %v4626_v25  ;;  %v4627_v0 = vunpack.i.l.bf16 %v4626_v25  ;;  %v4068_v58 = vpop.f32.mrf.mxu3 }
 0x926   : > { %v4069_v53 = vadd.f32 %v8010_v41, %v4068_v58  ;;  %v4631_v27 = vpop.permute.xlu0 %4630 }
 0x927   : > { %v4009_v10 = vsel %vm3996_vm6, %v3992_v61, %v4627_v0  ;;  %v4010_v40 = vsel %vm3996_vm6, %v3993_v29, %v4628_v8  ;;  %v4633_v13 = vunpack.i.h.bf16 %v4631_v27  ;;  %v4632_v45 = vunpack.i.l.bf16 %v4631_v27 }
 0x928   : > { %4102 = vst [vmem:[%s8015_s23 + $0x20] sm:$0xff] %v4069_v53  ;;  %v4019_v17 = vpack.c.bf16 %v4010_v40, %v4009_v10 }
 0x929   : > { %v3910_v5 = vsel %vm518_vm0, %v8558_v49, %v4633_v13  ;;  %v3909_v23 = vsel %vm518_vm0, %v8559_v15, %v4632_v45 }
 0x92a   : > { %4087 = vmatmul.bf16.gmra.mxu3 %v4019_v17  ;;  %v3926_v12 = vsel %vm3911_vm1, %v3909_v23, %v4637_v32  ;;  %v3927_v2 = vsel %vm3911_vm1, %v3910_v5, %v4638_v47 }
 0x92c   : > { %v4641_v21 = vpop.permute.xlu1 %4640 }
 0x92d   : > { %v4070_v33 = vpop.f32.mrf.mxu3  ;;  %v4643_v51 = vunpack.i.h.bf16 %v4641_v21  ;;  %v4642_v38 = vunpack.i.l.bf16 %v4641_v21 }
 0x92e   : > { %v4071_v6 = vadd.f32 %v8010_v41, %v4070_v33  ;;  %v4646_v1 = vpop.permute.xlu0 %4645 }
 0x92f   : > { %v4648_v14 = vunpack.i.h.bf16 %v4646_v1  ;;  %v4647_v44 = vunpack.i.l.bf16 %v4646_v1  ;;  %v3943_v37 = vsel %vm3928_vm2, %v3926_v12, %v4642_v38  ;;  %v3944_v35 = vsel %vm3928_vm2, %v3927_v2, %v4643_v51 }
 0x930   : > { %4103 = vst [vmem:[%s8015_s23 + $0x28] sm:$0xff] %v4071_v6 }
 0x931   : > { %v3960_v7 = vsel %vm3945_vm3, %v3943_v37, %v4647_v44  ;;  %v3961_v3 = vsel %vm3945_vm3, %v3944_v35, %v4648_v14 }
 0x932   : > { %v3977_v28 = vsel %vm3962_vm4, %v3960_v7, %v4652_v50  ;;  %v3978_v31 = vsel %vm3962_vm4, %v3961_v3, %v4653_v36 }
 0x936   : > { %v4073_v16 = vpop.f32.mrf.mxu3  ;;  %v4661_v26 = vpop.permute.xlu0 %4660 }
 0x937   : > { %v4074_v62 = vadd.f32 %v8010_v41, %v4073_v16  ;;  %v4663_v43 = vunpack.i.h.bf16 %v4661_v26  ;;  %v4662_v54 = vunpack.i.l.bf16 %v4661_v26 }
 0x939   : > { %4104 = vst [vmem:[%s8015_s23 + $0x30] sm:$0xff] %v4074_v62 }
 0x93e   : > { %v4075_v19 = vpop.f32.mrf.mxu3 }
 0x93f   : > { %v4076_v42 = vadd.f32 %v8010_v41, %v4075_v19 }
 0x941   : > { %4105 = vst [vmem:[%s8015_s23 + $0x38] sm:$0xff] %v4076_v42 }
 0x95e   : > { %v4656_v52 = vpop.permute.xlu1 %4655 }
 0x95f   : > { %v4658_v11 = vunpack.i.h.bf16 %v4656_v52  ;;  %v4657_v63 = vunpack.i.l.bf16 %v4656_v52 }
 0x961   : > { %v3994_v24 = vsel %vm3979_vm5, %v3977_v28, %v4657_v63  ;;  %v3995_v34 = vsel %vm3979_vm5, %v3978_v31, %v4658_v11 }
 0x962   : > { %v4011_v39 = vsel %vm3996_vm6, %v3994_v24, %v4662_v54  ;;  %v4012_v57 = vsel %vm3996_vm6, %v3995_v34, %v4663_v43 }
 0x963   : > { %v4020_v18 = vpack.c.bf16 %v4012_v57, %v4011_v39 }
 0x965   : > { %4092 = vmatmul.bf16.gmra.mxu3 %v4020_v18 }
 0x980   : > { %v4078_v60 = vpop.f32.mrf.mxu3 }
 0x981   : > { %v4079_v20 = vadd.f32 %v8010_v41, %v4078_v60 }
 0x983   : > { %4106 = vst [vmem:[%s8015_s23 + $0x40] sm:$0xff] %v4079_v20 }
 0x988   : > { %v4080_v59 = vpop.f32.mrf.mxu3 }
 0x989   : > { %v4081_v56 = vadd.f32 %v8010_v41, %v4080_v59 }
 0x98b   : > { %4107 = vst [vmem:[%s8015_s23 + $0x48] sm:$0xff] %v4081_v56 }
 0x998   : > { %v4083_v55 = vpop.f32.mrf.mxu3 }
 0x999   : > { %v4084_v22 = vadd.f32 %v8010_v41, %v4083_v55 }
 0x99b   : > { %4108 = vst [vmem:[%s8015_s23 + $0x50] sm:$0xff] %v4084_v22 }
 0x9a0   : > { %v4085_v4 = vpop.f32.mrf.mxu3 }
 0x9a1   : > { %v4086_v9 = vadd.f32 %v8010_v41, %v4085_v4 }
 0x9a3   : > { %4109 = vst [vmem:[%s8015_s23 + $0x58] sm:$0xff] %v4086_v9 }
 0x9ad   : > { %v4088_v46 = vpop.f32.mrf.mxu3 }
 0x9ae   : > { %v4089_v25 = vadd.f32 %v8010_v41, %v4088_v46 }
 0x9b0   : > { %4110 = vst [vmem:[%s8015_s23 + $0x60] sm:$0xff] %v4089_v25 }
 0x9b5   : > { %v4090_v8 = vpop.f32.mrf.mxu3 }
 0x9b6   : > { %v4091_v0 = vadd.f32 %v8010_v41, %v4090_v8 }
 0x9b8   : > { %4111 = vst [vmem:[%s8015_s23 + $0x68] sm:$0xff] %v4091_v0 }
 0x9e8   : > { %v4093_v58 = vpop.f32.mrf.mxu3 }
 0x9e9   : > { %v4094_v53 = vadd.f32 %v8010_v41, %v4093_v58 }
 0x9eb   : > { %4112 = vst [vmem:[%s8015_s23 + $0x70] sm:$0xff] %v4094_v53 }
 0x9f0   : > { %v4095_v61 = vpop.f32.mrf.mxu3 }
 0x9f1   : > { %v4096_v29 = vadd.f32 %v8010_v41, %v4095_v61 }
 0x9f3   : > { %4113 = vst [vmem:[%s8015_s23 + $0x78] sm:$0xff] %v4096_v29 }
 0x9f4   : > { %5294 = shalt.err (!%p5291_p10)
}
 0x9f5   : > { %s5350_s20 = smov 128   ;;  %s5351_s9 = smov 8  }
 0x9f6   : > { %4316 = dma.vmem_to_hbm [thread:$0]  (%p5449_p3), %s4128_s11, 2048, %s4130_s12, %s4115_s21, %s5350_s20, %s5350_s20, %s5351_s9  }
 0x9f7 PF: > { %s4144_s24 = sand.u32 1, %s5325_s15   ;;  %p8560_p12 = scmp.ge.s32.totalorder %s5337_s18, 2 }
 0x9f8   : > { %s4145_s23 = scalar_lea.sflag [#allocation4], %s4144_s24 }
 0x9f9   : > { %p4330_p13 = pnand %p8560_p12, %p5412_p6 }
 0x9fb   : > { %p4331_p0 = pneg %p4330_p13 }
 0x9fd   : > { %5320 = dma.done.wait (%p4331_p0), %s4145_s23, 2048  }
 0x9fe   : > { %5322 = vsyncadd (%p4331_p0), %s4145_s23, 4294965248  ;;  %p18_p5 = scmp.ge.s32.totalorder %s5439_s10, 4   ;;  %s8561_s15 = smov %s5329_s16 }
 0x9ff   : > { %s8562_s16 = smov %s5333_s17  ;;  %s8563_s17 = smov %s5455_s14 }
 0xa00   : > { %s8564_s18 = smov %s5439_s10  ;;  %20 = sbr.rel (!%p18_p5) target bundleno = 6 (0x6), region = 89 }
 0xa05   :  { %4151 = vsyncpa [#allocation3], 1 }
 0xa06   :  { %4153 = vsyncpa [#allocation3 + $0x1], 1 }
 0xa07   :  { %4154 = vsyncpa [#allocation6], 1 }
 0xa08   :  { %4155 = vsyncpa [#allocation4], 1 }
 0xa09   :  { %4157 = vsyncpa [#allocation4 + $0x1], 1 }

</bundles_post_ra>
